<compile_context>
chip_gen: v6e
topology: v6e:2x2x1
jax: 0.10.0
libtpu: 0.0.40
codegen_flags: <defaults>
</compile_context>

<pallas_src>
import functools

import jax
import jax.numpy as jnp
from jax import lax
from jax.experimental import pallas as pl
from jax.experimental.pallas import tpu as pltpu

_TC = 8  # time-chunk (sublane aligned); wrapper rounds T up to a multiple of 8


def _round_up(x, m):
    return (x + m - 1) // m * m


def gru_user_kernel(x_ref, lens_ref, w_ih_ref, w_hh_ref, bx_ref, bhn_ref,
                    w_dec_ref, b_dec_ref, out_ref):
    Tp, Bt, Ep = x_ref.shape           # time-major tile: (Tp, Bt, Ep), bf16
    Hp = w_hh_ref.shape[0]
    n_chunks = Tp // _TC

    lens = lens_ref[...]               # (Bt, 1) int32
    bx = bx_ref[...]                   # (1, 3*Hp) f32 (b_ih + b_hh for r,z; b_in)
    # Hoisted broadcast (JAX does not CSE broadcast_in_dim inside the loop).
    b_hn_b = jnp.broadcast_to(bhn_ref[...], (Bt, Hp))   # (Bt, Hp) f32

    def chunk_body(c, h):
        # ---- projection for this time chunk: one MXU matmul, M = Tc*Bt -----
        t0 = c * _TC
        if not isinstance(t0, int):
            t0 = pl.multiple_of(t0, _TC)
        x_c = x_ref[pl.ds(t0, _TC)]                        # (Tc, Bt, Ep) bf16
        gates = (jnp.dot(x_c.reshape(_TC * Bt, Ep), w_ih_ref[...],
                         preferred_element_type=jnp.float32)
                 + bx).reshape(_TC, Bt, 3 * Hp)            # f32 pre-activations

        # ---- recurrence: one fused (Bt,Hp)x(Hp,3*Hp) bf16 matmul per step --
        for tt in range(_TC):
            g_t = gates[tt]                                        # (Bt, 3*Hp)
            hh = jnp.dot(h.astype(jnp.bfloat16), w_hh_ref[...],
                         preferred_element_type=jnp.float32)       # (Bt, 3*Hp)
            r = jax.nn.sigmoid(g_t[:, :Hp] + hh[:, :Hp])
            z = jax.nn.sigmoid(g_t[:, Hp:2 * Hp] + hh[:, Hp:2 * Hp])
            n = jnp.tanh(g_t[:, 2 * Hp:] + r * (hh[:, 2 * Hp:] + b_hn_b))
            h_new = (1.0 - z) * n + z * h
            # pack_padded_sequence semantics: freeze h once t >= len(b)
            t = c * _TC + tt
            h = jnp.where(t < lens, h_new, h)
        return h

    h0 = jnp.zeros((Bt, Hp), jnp.float32)
    if n_chunks == 1:
        h = chunk_body(0, h0)          # static indices, no dynamic slice
    else:
        h = lax.fori_loop(0, n_chunks, chunk_body, h0)

    # ---- dec + tanh, zero-fill users with empty history --------------------
    dec = jnp.tanh(jnp.dot(h.astype(jnp.bfloat16), w_dec_ref[...],
                           preferred_element_type=jnp.float32)
                   + b_dec_ref[...])
    out_ref[...] = jnp.where(lens > 0, dec, 0.0)


def _default_block_b():
    # v5e MXU is 128x128 -> M=128 fills it; v6e/v7x are 256-wide -> M=256.
    try:
        kind = jax.devices()[0].device_kind.lower()
        if "v5 lite" in kind or "v5e" in kind or "v5litepod" in kind:
            return 128
    except Exception:
        pass
    return 256


def gru_user_encoder(history_embedding, user_history_mask, params, news_num,
                     block_b=None):
    B, T, E = history_embedding.shape
    Hd = params["w_hh"].shape[-1]

    if block_b is None:
        block_b = _default_block_b()

    Ep = _round_up(E, 128)              # lane-dense embedding dim
    Hp = _round_up(Hd, 128)             # lane-dense hidden dim
    Tp = _round_up(T, _TC)              # sublane / chunk aligned time dim
    Bt = min(block_b, _round_up(B, 8))  # batch tile (multiple of 8)
    Bp = _round_up(B, Bt)

    # Time-major, zero-padded, bf16 input via jnp.pad (no full zero scatter).
    # Padded timesteps / batch rows are inert: the length mask freezes them
    # and padded users have lens == 0.
    # TODO(synk): for production, emit the news_encoder output directly
    # time-major in bf16 to remove this relayout pass entirely.
    x_tm = jnp.transpose(history_embedding.astype(jnp.bfloat16), (1, 0, 2))
    x_tm = jnp.pad(x_tm, ((0, Tp - T), (0, Bp - B), (0, Ep - E)))

    lens = user_history_mask.sum(axis=1).astype(jnp.int32)
    lens = jnp.pad(lens, (0, Bp - B))[:, None]              # (Bp, 1)

    # Fused + padded parameters (gate order r, z, n). Padded rows/cols are
    # zero so padded hidden lanes stay exactly 0 through the recurrence.
    # Matmul operands in bf16; biases stay f32 (added post-accumulation).
    w_ih_cat = jnp.zeros((Ep, 3 * Hp), jnp.float32)
    w_hh_cat = jnp.zeros((Hp, 3 * Hp), jnp.float32)
    bias_x = jnp.zeros((1, 3 * Hp), jnp.float32)
    for g in range(3):
        w_ih_cat = w_ih_cat.at[:E, g * Hp:g * Hp + Hd].set(params["w_ih"][g])
        w_hh_cat = w_hh_cat.at[:Hd, g * Hp:g * Hp + Hd].set(params["w_hh"][g])
    bias_x = bias_x.at[0, 0 * Hp:0 * Hp + Hd].set(
        params["b_ih"][0, 0] + params["b_hh"][0, 0])
    bias_x = bias_x.at[0, 1 * Hp:1 * Hp + Hd].set(
        params["b_ih"][1, 0] + params["b_hh"][1, 0])
    bias_x = bias_x.at[0, 2 * Hp:2 * Hp + Hd].set(params["b_ih"][2, 0])
    b_hn = jnp.zeros((1, Hp), jnp.float32).at[0, :Hd].set(params["b_hh"][2, 0])
    w_dec = jnp.zeros((Hp, Ep), jnp.float32).at[:Hd, :E].set(params["w_dec"])
    b_dec = jnp.zeros((1, Ep), jnp.float32).at[0, :E].set(params["b_dec"][0])

    w_ih_cat = w_ih_cat.astype(jnp.bfloat16)
    w_hh_cat = w_hh_cat.astype(jnp.bfloat16)
    w_dec = w_dec.astype(jnp.bfloat16)

    # ---- VMEM budget (per tile) --------------------------------------------
    x_tile = 2 * Tp * Bt * Ep * 2                     # double-buffered bf16 x
    weights = (Ep * 3 * Hp + Hp * 3 * Hp + Hp * Ep) * 2 * 2   # worst case 2-buf
    biases = ((3 * Hp) + Hp + Ep) * 4 * 2
    lens_b = Bt * 128 * 4 * 2
    out_tile = 2 * Bt * Ep * 4
    gates_tmp = _TC * Bt * 3 * Hp * 4                 # one chunk of f32 gates
    misc = 8 * Bt * 3 * Hp * 4                        # hh / gate temporaries
    footprint = x_tile + weights + biases + lens_b + out_tile + gates_tmp + misc
    vmem_limit = int(min(64 << 20, max(footprint + (4 << 20), 32 << 20)))

    grid = (Bp // Bt,)

    def _call(weight_mode):
        def wspec(shape):
            if weight_mode is None:
                return pl.BlockSpec(shape, lambda i: (0, 0))
            return pl.BlockSpec(shape, lambda i: (0, 0),
                                pipeline_mode=weight_mode)

        return pl.pallas_call(
            gru_user_kernel,
            out_shape=jax.ShapeDtypeStruct((Bp, Ep), jnp.float32),
            grid_spec=pltpu.PrefetchScalarGridSpec(
                num_scalar_prefetch=0,
                grid=grid,
                in_specs=[
                    pl.BlockSpec((Tp, Bt, Ep), lambda i: (0, i, 0)),  # x
                    pl.BlockSpec((Bt, 1), lambda i: (i, 0)),          # lens
                    wspec((Ep, 3 * Hp)),                              # W_ih
                    wspec((Hp, 3 * Hp)),                              # W_hh
                    wspec((1, 3 * Hp)),                               # folded bias
                    wspec((1, Hp)),                                   # b_hn
                    wspec((Hp, Ep)),                                  # W_dec
                    wspec((1, Ep)),                                   # b_dec
                ],
                out_specs=pl.BlockSpec((Bt, Ep), lambda i: (i, 0)),
            ),
            compiler_params=pltpu.CompilerParams(
                dimension_semantics=("parallel",),
                vmem_limit_bytes=vmem_limit),
        )(x_tm, lens, w_ih_cat, w_hh_cat, bias_x, b_hn, w_dec, b_dec)

    try:
        # Grid-invariant weights: single-buffer (saves VMEM, esp. on v7x).
        out_padded = _call(pl.Buffered(1))
    except Exception:
        out_padded = _call(None)

    user_rep = out_padded[:B, :E]
    # glue: unsqueeze(1).expand(-1, news_num, -1)
    return jnp.broadcast_to(user_rep[:, None, :], (B, news_num, E))


def _reference(history_embedding, user_history_mask, params, news_num):
    """Pure-JAX f32 reference of the same semantics (sanity check)."""
    B, T, E = history_embedding.shape
    Hd = params["w_hh"].shape[-1]
    lens = user_history_mask.sum(axis=1).astype(jnp.int32)
    h = jnp.zeros((B, Hd), jnp.float32)
    for t in range(T):
        x_t = history_embedding[:, t, :]
        r = jax.nn.sigmoid(x_t @ params["w_ih"][0] + params["b_ih"][0]
                           + h @ params["w_hh"][0] + params["b_hh"][0])
        z = jax.nn.sigmoid(x_t @ params["w_ih"][1] + params["b_ih"][1]
                           + h @ params["w_hh"][1] + params["b_hh"][1])
        n = jnp.tanh(x_t @ params["w_ih"][2] + params["b_ih"][2]
                     + r * (h @ params["w_hh"][2] + params["b_hh"][2]))
        h_new = (1.0 - z) * n + z * h
        act = (t < lens)[:, None].astype(h.dtype)
        h = act * h_new + (1.0 - act) * h
    dec = jnp.tanh(h @ params["w_dec"] + params["b_dec"])
    dec = dec * (lens > 0)[:, None].astype(dec.dtype)
    return jnp.broadcast_to(dec[:, None, :], (B, news_num, E))


if __name__ == "__main__":
    key = jax.random.PRNGKey(0)
    B, T, E, Hd, news_num = 2, 8, 64, 32, 4
    k1, k2, k3, k4, k5, k6, k7, k8, k9 = jax.random.split(key, 9)

    # TODO(synk): news_encoder is an abstract external dependency; its output
    # (history_embedding [B, T, E]) is taken directly as the kernel input.
    history_embedding = jax.random.normal(k1, (B, T, E), jnp.float32)
    # first user has 5 valid history items, second has all T (prefix masks)
    user_history_mask = (jnp.arange(T)[None, :]
                         < jnp.array([[5], [T]])).astype(jnp.float32)
    candidate_news_representation = jax.random.normal(
        k2, (B, news_num, E), jnp.float32)  # only its shape (news_num) is used

    # Deterministic synthetic parameters (gate order r, z, n; weights stored
    # pre-transposed to (in, out) per gate). Nonzero biases exercise folding.
    scale = 0.1
    params = {
        "w_ih": scale * jax.random.normal(k3, (3, E, Hd), jnp.float32),
        "w_hh": scale * jax.random.normal(k4, (3, Hd, Hd), jnp.float32),
        "b_ih": 0.05 * jax.random.normal(k6, (3, 1, Hd), jnp.float32),
        "b_hh": 0.05 * jax.random.normal(k7, (3, 1, Hd), jnp.float32),
        "w_dec": scale * jax.random.normal(k5, (Hd, E), jnp.float32),
        "b_dec": 0.05 * jax.random.normal(k8, (1, E), jnp.float32),
    }

    out = gru_user_encoder(history_embedding, user_history_mask, params,
                           candidate_news_representation.shape[1])
    out = jax.block_until_ready(out)
    assert out.shape == (B, news_num, E)

    ref = _reference(history_embedding, user_history_mask, params,
                     candidate_news_representation.shape[1])
    # bf16 matmul operands (f32 accumulation) -> relaxed tolerance vs f32 ref.
    assert jnp.allclose(out, ref, atol=3e-2, rtol=3e-2), \
        float(jnp.max(jnp.abs(out - ref)))

    print("KERNEL_OK")
</pallas_src>

<mosaic_0001>
module attributes {stable_mosaic.version = 11 : i64} {
  func.func @gru_user_kernel(%arg0: i32, %arg1: memref<8x8x128xbf16, #tpu.memory_space<vmem>>, %arg2: memref<8x1xi32, #tpu.memory_space<vmem>>, %arg3: memref<128x384xbf16, #tpu.memory_space<vmem>>, %arg4: memref<128x384xbf16, #tpu.memory_space<vmem>>, %arg5: memref<1x384xf32, #tpu.memory_space<vmem>>, %arg6: memref<1x128xf32, #tpu.memory_space<vmem>>, %arg7: memref<128x128xbf16, #tpu.memory_space<vmem>>, %arg8: memref<1x128xf32, #tpu.memory_space<vmem>>, %arg9: memref<8x128xf32, #tpu.memory_space<vmem>>) attributes {dimension_semantics = [#tpu.dimension_semantics<parallel>], iteration_bounds = array<i64: 1>, scalar_prefetch = 0 : i64, scratch_operands = 0 : i64, tpu.core_type = #tpu.core_type<tc>, window_params = [{transform_indices = @transform_0, window_bounds = array<i64: 8, 8, 128>}, {transform_indices = @transform_1, window_bounds = array<i64: 8, 1>}, {pipeline_mode = #tpu.pipeline_mode<synchronous>, transform_indices = @transform_2, window_bounds = array<i64: 128, 384>}, {pipeline_mode = #tpu.pipeline_mode<synchronous>, transform_indices = @transform_3, window_bounds = array<i64: 128, 384>}, {pipeline_mode = #tpu.pipeline_mode<synchronous>, transform_indices = @transform_4, window_bounds = array<i64: 1, 384>}, {pipeline_mode = #tpu.pipeline_mode<synchronous>, transform_indices = @transform_5, window_bounds = array<i64: 1, 128>}, {pipeline_mode = #tpu.pipeline_mode<synchronous>, transform_indices = @transform_6, window_bounds = array<i64: 128, 128>}, {pipeline_mode = #tpu.pipeline_mode<synchronous>, transform_indices = @transform_7, window_bounds = array<i64: 1, 128>}, {transform_indices = @transform_8, window_bounds = array<i64: 8, 128>}]} {
    %c0 = arith.constant 0 : index
    %c0_0 = arith.constant 0 : index
    %0 = vector.load %arg2[%c0, %c0_0] : memref<8x1xi32, #tpu.memory_space<vmem>>, vector<8x1xi32>
    %c0_1 = arith.constant 0 : index
    %c0_2 = arith.constant 0 : index
    %1 = vector.load %arg5[%c0_1, %c0_2] : memref<1x384xf32, #tpu.memory_space<vmem>>, vector<1x384xf32>
    %c0_3 = arith.constant 0 : index
    %c0_4 = arith.constant 0 : index
    %2 = vector.load %arg6[%c0_3, %c0_4] : memref<1x128xf32, #tpu.memory_space<vmem>>, vector<1x128xf32>
    %3 = vector.shape_cast %2 : vector<1x128xf32> to vector<1x128xf32>
    %4 = vector.broadcast %3 : vector<1x128xf32> to vector<8x128xf32>
    %cst = arith.constant 0.000000e+00 : f32
    %5 = vector.broadcast %cst : f32 to vector<8x128xf32>
    %c0_5 = arith.constant 0 : index
    %c0_6 = arith.constant 0 : index
    %c0_7 = arith.constant 0 : index
    %6 = vector.load %arg1[%c0_5, %c0_6, %c0_7] : memref<8x8x128xbf16, #tpu.memory_space<vmem>>, vector<8x8x128xbf16>
    %7 = vector.shape_cast %6 : vector<8x8x128xbf16> to vector<64x128xbf16>
    %c0_8 = arith.constant 0 : index
    %c0_9 = arith.constant 0 : index
    %8 = vector.load %arg3[%c0_8, %c0_9] : memref<128x384xbf16, #tpu.memory_space<vmem>>, vector<128x384xbf16>
    %cst_10 = arith.constant dense<0.000000e+00> : vector<64x384xf32>
    %9 = tpu.matmul %7, %8, %cst_10 {dimension_numbers = #tpu.dot_dimension_numbers<[1], [0], [0], [1], [0, 0, 1, 1], [], []>} : vector<64x128xbf16>, vector<128x384xbf16>, vector<64x384xf32> -> vector<64x384xf32>
    %10 = vector.broadcast %1 : vector<1x384xf32> to vector<64x384xf32>
    %11 = arith.addf %9, %10 : vector<64x384xf32>
    %12 = vector.shape_cast %11 : vector<64x384xf32> to vector<8x8x384xf32>
    %13 = vector.extract_strided_slice %12 {offsets = [0, 0, 0], sizes = [1, 8, 384], strides = [1, 1, 1]} : vector<8x8x384xf32> to vector<1x8x384xf32>
    %14 = vector.shape_cast %13 : vector<1x8x384xf32> to vector<8x384xf32>
    %15 = arith.truncf %5 : vector<8x128xf32> to vector<8x128xbf16>
    %c0_11 = arith.constant 0 : index
    %c0_12 = arith.constant 0 : index
    %16 = vector.load %arg4[%c0_11, %c0_12] : memref<128x384xbf16, #tpu.memory_space<vmem>>, vector<128x384xbf16>
    %cst_13 = arith.constant dense<0.000000e+00> : vector<8x384xf32>
    %17 = tpu.matmul %15, %16, %cst_13 {dimension_numbers = #tpu.dot_dimension_numbers<[1], [0], [0], [1], [0, 0, 1, 1], [], []>} : vector<8x128xbf16>, vector<128x384xbf16>, vector<8x384xf32> -> vector<8x384xf32>
    %18 = vector.extract_strided_slice %14 {offsets = [0, 0], sizes = [8, 128], strides = [1, 1]} : vector<8x384xf32> to vector<8x128xf32>
    %19 = vector.extract_strided_slice %17 {offsets = [0, 0], sizes = [8, 128], strides = [1, 1]} : vector<8x384xf32> to vector<8x128xf32>
    %20 = arith.addf %18, %19 : vector<8x128xf32>
    %21 = arith.negf %20 : vector<8x128xf32>
    %22 = math.exp %21 : vector<8x128xf32>
    %cst_14 = arith.constant 1.000000e+00 : f32
    %23 = vector.broadcast %cst_14 : f32 to vector<8x128xf32>
    %24 = arith.addf %23, %22 : vector<8x128xf32>
    %25 = arith.divf %23, %24 : vector<8x128xf32>
    %26 = vector.extract_strided_slice %14 {offsets = [0, 128], sizes = [8, 128], strides = [1, 1]} : vector<8x384xf32> to vector<8x128xf32>
    %27 = vector.extract_strided_slice %17 {offsets = [0, 128], sizes = [8, 128], strides = [1, 1]} : vector<8x384xf32> to vector<8x128xf32>
    %28 = arith.addf %26, %27 : vector<8x128xf32>
    %29 = arith.negf %28 : vector<8x128xf32>
    %30 = math.exp %29 : vector<8x128xf32>
    %cst_15 = arith.constant 1.000000e+00 : f32
    %31 = vector.broadcast %cst_15 : f32 to vector<8x128xf32>
    %32 = arith.addf %31, %30 : vector<8x128xf32>
    %33 = arith.divf %31, %32 : vector<8x128xf32>
    %34 = vector.extract_strided_slice %14 {offsets = [0, 256], sizes = [8, 128], strides = [1, 1]} : vector<8x384xf32> to vector<8x128xf32>
    %35 = vector.extract_strided_slice %17 {offsets = [0, 256], sizes = [8, 128], strides = [1, 1]} : vector<8x384xf32> to vector<8x128xf32>
    %36 = arith.addf %35, %4 : vector<8x128xf32>
    %37 = arith.mulf %25, %36 : vector<8x128xf32>
    %38 = arith.addf %34, %37 : vector<8x128xf32>
    %39 = math.tanh %38 : vector<8x128xf32>
    %cst_16 = arith.constant 1.000000e+00 : f32
    %40 = vector.broadcast %cst_16 : f32 to vector<8x128xf32>
    %41 = arith.subf %40, %33 : vector<8x128xf32>
    %42 = arith.mulf %41, %39 : vector<8x128xf32>
    %43 = arith.mulf %33, %5 : vector<8x128xf32>
    %44 = arith.addf %42, %43 : vector<8x128xf32>
    %c0_i32 = arith.constant 0 : i32
    %45 = vector.broadcast %c0_i32 : i32 to vector<8x1xi32>
    %46 = arith.cmpi sgt, %0, %45 : vector<8x1xi32>
    %47 = vector.shape_cast %46 : vector<8x1xi1> to vector<8x1xi1>
    %48 = vector.broadcast %47 : vector<8x1xi1> to vector<8x128xi1>
    %49 = arith.select %48, %44, %5 : vector<8x128xi1>, vector<8x128xf32>
    %50 = vector.extract_strided_slice %12 {offsets = [1, 0, 0], sizes = [1, 8, 384], strides = [1, 1, 1]} : vector<8x8x384xf32> to vector<1x8x384xf32>
    %51 = vector.shape_cast %50 : vector<1x8x384xf32> to vector<8x384xf32>
    %52 = arith.truncf %49 : vector<8x128xf32> to vector<8x128xbf16>
    %c0_17 = arith.constant 0 : index
    %c0_18 = arith.constant 0 : index
    %53 = vector.load %arg4[%c0_17, %c0_18] : memref<128x384xbf16, #tpu.memory_space<vmem>>, vector<128x384xbf16>
    %cst_19 = arith.constant dense<0.000000e+00> : vector<8x384xf32>
    %54 = tpu.matmul %52, %53, %cst_19 {dimension_numbers = #tpu.dot_dimension_numbers<[1], [0], [0], [1], [0, 0, 1, 1], [], []>} : vector<8x128xbf16>, vector<128x384xbf16>, vector<8x384xf32> -> vector<8x384xf32>
    %55 = vector.extract_strided_slice %51 {offsets = [0, 0], sizes = [8, 128], strides = [1, 1]} : vector<8x384xf32> to vector<8x128xf32>
    %56 = vector.extract_strided_slice %54 {offsets = [0, 0], sizes = [8, 128], strides = [1, 1]} : vector<8x384xf32> to vector<8x128xf32>
    %57 = arith.addf %55, %56 : vector<8x128xf32>
    %58 = arith.negf %57 : vector<8x128xf32>
    %59 = math.exp %58 : vector<8x128xf32>
    %cst_20 = arith.constant 1.000000e+00 : f32
    %60 = vector.broadcast %cst_20 : f32 to vector<8x128xf32>
    %61 = arith.addf %60, %59 : vector<8x128xf32>
    %62 = arith.divf %60, %61 : vector<8x128xf32>
    %63 = vector.extract_strided_slice %51 {offsets = [0, 128], sizes = [8, 128], strides = [1, 1]} : vector<8x384xf32> to vector<8x128xf32>
    %64 = vector.extract_strided_slice %54 {offsets = [0, 128], sizes = [8, 128], strides = [1, 1]} : vector<8x384xf32> to vector<8x128xf32>
    %65 = arith.addf %63, %64 : vector<8x128xf32>
    %66 = arith.negf %65 : vector<8x128xf32>
    %67 = math.exp %66 : vector<8x128xf32>
    %cst_21 = arith.constant 1.000000e+00 : f32
    %68 = vector.broadcast %cst_21 : f32 to vector<8x128xf32>
    %69 = arith.addf %68, %67 : vector<8x128xf32>
    %70 = arith.divf %68, %69 : vector<8x128xf32>
    %71 = vector.extract_strided_slice %51 {offsets = [0, 256], sizes = [8, 128], strides = [1, 1]} : vector<8x384xf32> to vector<8x128xf32>
    %72 = vector.extract_strided_slice %54 {offsets = [0, 256], sizes = [8, 128], strides = [1, 1]} : vector<8x384xf32> to vector<8x128xf32>
    %73 = arith.addf %72, %4 : vector<8x128xf32>
    %74 = arith.mulf %62, %73 : vector<8x128xf32>
    %75 = arith.addf %71, %74 : vector<8x128xf32>
    %76 = math.tanh %75 : vector<8x128xf32>
    %cst_22 = arith.constant 1.000000e+00 : f32
    %77 = vector.broadcast %cst_22 : f32 to vector<8x128xf32>
    %78 = arith.subf %77, %70 : vector<8x128xf32>
    %79 = arith.mulf %78, %76 : vector<8x128xf32>
    %80 = arith.mulf %70, %49 : vector<8x128xf32>
    %81 = arith.addf %79, %80 : vector<8x128xf32>
    %c1_i32 = arith.constant 1 : i32
    %82 = vector.broadcast %c1_i32 : i32 to vector<8x1xi32>
    %83 = arith.cmpi sgt, %0, %82 : vector<8x1xi32>
    %84 = vector.shape_cast %83 : vector<8x1xi1> to vector<8x1xi1>
    %85 = vector.broadcast %84 : vector<8x1xi1> to vector<8x128xi1>
    %86 = arith.select %85, %81, %49 : vector<8x128xi1>, vector<8x128xf32>
    %87 = vector.extract_strided_slice %12 {offsets = [2, 0, 0], sizes = [1, 8, 384], strides = [1, 1, 1]} : vector<8x8x384xf32> to vector<1x8x384xf32>
    %88 = vector.shape_cast %87 : vector<1x8x384xf32> to vector<8x384xf32>
    %89 = arith.truncf %86 : vector<8x128xf32> to vector<8x128xbf16>
    %c0_23 = arith.constant 0 : index
    %c0_24 = arith.constant 0 : index
    %90 = vector.load %arg4[%c0_23, %c0_24] : memref<128x384xbf16, #tpu.memory_space<vmem>>, vector<128x384xbf16>
    %cst_25 = arith.constant dense<0.000000e+00> : vector<8x384xf32>
    %91 = tpu.matmul %89, %90, %cst_25 {dimension_numbers = #tpu.dot_dimension_numbers<[1], [0], [0], [1], [0, 0, 1, 1], [], []>} : vector<8x128xbf16>, vector<128x384xbf16>, vector<8x384xf32> -> vector<8x384xf32>
    %92 = vector.extract_strided_slice %88 {offsets = [0, 0], sizes = [8, 128], strides = [1, 1]} : vector<8x384xf32> to vector<8x128xf32>
    %93 = vector.extract_strided_slice %91 {offsets = [0, 0], sizes = [8, 128], strides = [1, 1]} : vector<8x384xf32> to vector<8x128xf32>
    %94 = arith.addf %92, %93 : vector<8x128xf32>
    %95 = arith.negf %94 : vector<8x128xf32>
    %96 = math.exp %95 : vector<8x128xf32>
    %cst_26 = arith.constant 1.000000e+00 : f32
    %97 = vector.broadcast %cst_26 : f32 to vector<8x128xf32>
    %98 = arith.addf %97, %96 : vector<8x128xf32>
    %99 = arith.divf %97, %98 : vector<8x128xf32>
    %100 = vector.extract_strided_slice %88 {offsets = [0, 128], sizes = [8, 128], strides = [1, 1]} : vector<8x384xf32> to vector<8x128xf32>
    %101 = vector.extract_strided_slice %91 {offsets = [0, 128], sizes = [8, 128], strides = [1, 1]} : vector<8x384xf32> to vector<8x128xf32>
    %102 = arith.addf %100, %101 : vector<8x128xf32>
    %103 = arith.negf %102 : vector<8x128xf32>
    %104 = math.exp %103 : vector<8x128xf32>
    %cst_27 = arith.constant 1.000000e+00 : f32
    %105 = vector.broadcast %cst_27 : f32 to vector<8x128xf32>
    %106 = arith.addf %105, %104 : vector<8x128xf32>
    %107 = arith.divf %105, %106 : vector<8x128xf32>
    %108 = vector.extract_strided_slice %88 {offsets = [0, 256], sizes = [8, 128], strides = [1, 1]} : vector<8x384xf32> to vector<8x128xf32>
    %109 = vector.extract_strided_slice %91 {offsets = [0, 256], sizes = [8, 128], strides = [1, 1]} : vector<8x384xf32> to vector<8x128xf32>
    %110 = arith.addf %109, %4 : vector<8x128xf32>
    %111 = arith.mulf %99, %110 : vector<8x128xf32>
    %112 = arith.addf %108, %111 : vector<8x128xf32>
    %113 = math.tanh %112 : vector<8x128xf32>
    %cst_28 = arith.constant 1.000000e+00 : f32
    %114 = vector.broadcast %cst_28 : f32 to vector<8x128xf32>
    %115 = arith.subf %114, %107 : vector<8x128xf32>
    %116 = arith.mulf %115, %113 : vector<8x128xf32>
    %117 = arith.mulf %107, %86 : vector<8x128xf32>
    %118 = arith.addf %116, %117 : vector<8x128xf32>
    %c2_i32 = arith.constant 2 : i32
    %119 = vector.broadcast %c2_i32 : i32 to vector<8x1xi32>
    %120 = arith.cmpi sgt, %0, %119 : vector<8x1xi32>
    %121 = vector.shape_cast %120 : vector<8x1xi1> to vector<8x1xi1>
    %122 = vector.broadcast %121 : vector<8x1xi1> to vector<8x128xi1>
    %123 = arith.select %122, %118, %86 : vector<8x128xi1>, vector<8x128xf32>
    %124 = vector.extract_strided_slice %12 {offsets = [3, 0, 0], sizes = [1, 8, 384], strides = [1, 1, 1]} : vector<8x8x384xf32> to vector<1x8x384xf32>
    %125 = vector.shape_cast %124 : vector<1x8x384xf32> to vector<8x384xf32>
    %126 = arith.truncf %123 : vector<8x128xf32> to vector<8x128xbf16>
    %c0_29 = arith.constant 0 : index
    %c0_30 = arith.constant 0 : index
    %127 = vector.load %arg4[%c0_29, %c0_30] : memref<128x384xbf16, #tpu.memory_space<vmem>>, vector<128x384xbf16>
    %cst_31 = arith.constant dense<0.000000e+00> : vector<8x384xf32>
    %128 = tpu.matmul %126, %127, %cst_31 {dimension_numbers = #tpu.dot_dimension_numbers<[1], [0], [0], [1], [0, 0, 1, 1], [], []>} : vector<8x128xbf16>, vector<128x384xbf16>, vector<8x384xf32> -> vector<8x384xf32>
    %129 = vector.extract_strided_slice %125 {offsets = [0, 0], sizes = [8, 128], strides = [1, 1]} : vector<8x384xf32> to vector<8x128xf32>
    %130 = vector.extract_strided_slice %128 {offsets = [0, 0], sizes = [8, 128], strides = [1, 1]} : vector<8x384xf32> to vector<8x128xf32>
    %131 = arith.addf %129, %130 : vector<8x128xf32>
    %132 = arith.negf %131 : vector<8x128xf32>
    %133 = math.exp %132 : vector<8x128xf32>
    %cst_32 = arith.constant 1.000000e+00 : f32
    %134 = vector.broadcast %cst_32 : f32 to vector<8x128xf32>
    %135 = arith.addf %134, %133 : vector<8x128xf32>
    %136 = arith.divf %134, %135 : vector<8x128xf32>
    %137 = vector.extract_strided_slice %125 {offsets = [0, 128], sizes = [8, 128], strides = [1, 1]} : vector<8x384xf32> to vector<8x128xf32>
    %138 = vector.extract_strided_slice %128 {offsets = [0, 128], sizes = [8, 128], strides = [1, 1]} : vector<8x384xf32> to vector<8x128xf32>
    %139 = arith.addf %137, %138 : vector<8x128xf32>
    %140 = arith.negf %139 : vector<8x128xf32>
    %141 = math.exp %140 : vector<8x128xf32>
    %cst_33 = arith.constant 1.000000e+00 : f32
    %142 = vector.broadcast %cst_33 : f32 to vector<8x128xf32>
    %143 = arith.addf %142, %141 : vector<8x128xf32>
    %144 = arith.divf %142, %143 : vector<8x128xf32>
    %145 = vector.extract_strided_slice %125 {offsets = [0, 256], sizes = [8, 128], strides = [1, 1]} : vector<8x384xf32> to vector<8x128xf32>
    %146 = vector.extract_strided_slice %128 {offsets = [0, 256], sizes = [8, 128], strides = [1, 1]} : vector<8x384xf32> to vector<8x128xf32>
    %147 = arith.addf %146, %4 : vector<8x128xf32>
    %148 = arith.mulf %136, %147 : vector<8x128xf32>
    %149 = arith.addf %145, %148 : vector<8x128xf32>
    %150 = math.tanh %149 : vector<8x128xf32>
    %cst_34 = arith.constant 1.000000e+00 : f32
    %151 = vector.broadcast %cst_34 : f32 to vector<8x128xf32>
    %152 = arith.subf %151, %144 : vector<8x128xf32>
    %153 = arith.mulf %152, %150 : vector<8x128xf32>
    %154 = arith.mulf %144, %123 : vector<8x128xf32>
    %155 = arith.addf %153, %154 : vector<8x128xf32>
    %c3_i32 = arith.constant 3 : i32
    %156 = vector.broadcast %c3_i32 : i32 to vector<8x1xi32>
    %157 = arith.cmpi sgt, %0, %156 : vector<8x1xi32>
    %158 = vector.shape_cast %157 : vector<8x1xi1> to vector<8x1xi1>
    %159 = vector.broadcast %158 : vector<8x1xi1> to vector<8x128xi1>
    %160 = arith.select %159, %155, %123 : vector<8x128xi1>, vector<8x128xf32>
    %161 = vector.extract_strided_slice %12 {offsets = [4, 0, 0], sizes = [1, 8, 384], strides = [1, 1, 1]} : vector<8x8x384xf32> to vector<1x8x384xf32>
    %162 = vector.shape_cast %161 : vector<1x8x384xf32> to vector<8x384xf32>
    %163 = arith.truncf %160 : vector<8x128xf32> to vector<8x128xbf16>
    %c0_35 = arith.constant 0 : index
    %c0_36 = arith.constant 0 : index
    %164 = vector.load %arg4[%c0_35, %c0_36] : memref<128x384xbf16, #tpu.memory_space<vmem>>, vector<128x384xbf16>
    %cst_37 = arith.constant dense<0.000000e+00> : vector<8x384xf32>
    %165 = tpu.matmul %163, %164, %cst_37 {dimension_numbers = #tpu.dot_dimension_numbers<[1], [0], [0], [1], [0, 0, 1, 1], [], []>} : vector<8x128xbf16>, vector<128x384xbf16>, vector<8x384xf32> -> vector<8x384xf32>
    %166 = vector.extract_strided_slice %162 {offsets = [0, 0], sizes = [8, 128], strides = [1, 1]} : vector<8x384xf32> to vector<8x128xf32>
    %167 = vector.extract_strided_slice %165 {offsets = [0, 0], sizes = [8, 128], strides = [1, 1]} : vector<8x384xf32> to vector<8x128xf32>
    %168 = arith.addf %166, %167 : vector<8x128xf32>
    %169 = arith.negf %168 : vector<8x128xf32>
    %170 = math.exp %169 : vector<8x128xf32>
    %cst_38 = arith.constant 1.000000e+00 : f32
    %171 = vector.broadcast %cst_38 : f32 to vector<8x128xf32>
    %172 = arith.addf %171, %170 : vector<8x128xf32>
    %173 = arith.divf %171, %172 : vector<8x128xf32>
    %174 = vector.extract_strided_slice %162 {offsets = [0, 128], sizes = [8, 128], strides = [1, 1]} : vector<8x384xf32> to vector<8x128xf32>
    %175 = vector.extract_strided_slice %165 {offsets = [0, 128], sizes = [8, 128], strides = [1, 1]} : vector<8x384xf32> to vector<8x128xf32>
    %176 = arith.addf %174, %175 : vector<8x128xf32>
    %177 = arith.negf %176 : vector<8x128xf32>
    %178 = math.exp %177 : vector<8x128xf32>
    %cst_39 = arith.constant 1.000000e+00 : f32
    %179 = vector.broadcast %cst_39 : f32 to vector<8x128xf32>
    %180 = arith.addf %179, %178 : vector<8x128xf32>
    %181 = arith.divf %179, %180 : vector<8x128xf32>
    %182 = vector.extract_strided_slice %162 {offsets = [0, 256], sizes = [8, 128], strides = [1, 1]} : vector<8x384xf32> to vector<8x128xf32>
    %183 = vector.extract_strided_slice %165 {offsets = [0, 256], sizes = [8, 128], strides = [1, 1]} : vector<8x384xf32> to vector<8x128xf32>
    %184 = arith.addf %183, %4 : vector<8x128xf32>
    %185 = arith.mulf %173, %184 : vector<8x128xf32>
    %186 = arith.addf %182, %185 : vector<8x128xf32>
    %187 = math.tanh %186 : vector<8x128xf32>
    %cst_40 = arith.constant 1.000000e+00 : f32
    %188 = vector.broadcast %cst_40 : f32 to vector<8x128xf32>
    %189 = arith.subf %188, %181 : vector<8x128xf32>
    %190 = arith.mulf %189, %187 : vector<8x128xf32>
    %191 = arith.mulf %181, %160 : vector<8x128xf32>
    %192 = arith.addf %190, %191 : vector<8x128xf32>
    %c4_i32 = arith.constant 4 : i32
    %193 = vector.broadcast %c4_i32 : i32 to vector<8x1xi32>
    %194 = arith.cmpi sgt, %0, %193 : vector<8x1xi32>
    %195 = vector.shape_cast %194 : vector<8x1xi1> to vector<8x1xi1>
    %196 = vector.broadcast %195 : vector<8x1xi1> to vector<8x128xi1>
    %197 = arith.select %196, %192, %160 : vector<8x128xi1>, vector<8x128xf32>
    %198 = vector.extract_strided_slice %12 {offsets = [5, 0, 0], sizes = [1, 8, 384], strides = [1, 1, 1]} : vector<8x8x384xf32> to vector<1x8x384xf32>
    %199 = vector.shape_cast %198 : vector<1x8x384xf32> to vector<8x384xf32>
    %200 = arith.truncf %197 : vector<8x128xf32> to vector<8x128xbf16>
    %c0_41 = arith.constant 0 : index
    %c0_42 = arith.constant 0 : index
    %201 = vector.load %arg4[%c0_41, %c0_42] : memref<128x384xbf16, #tpu.memory_space<vmem>>, vector<128x384xbf16>
    %cst_43 = arith.constant dense<0.000000e+00> : vector<8x384xf32>
    %202 = tpu.matmul %200, %201, %cst_43 {dimension_numbers = #tpu.dot_dimension_numbers<[1], [0], [0], [1], [0, 0, 1, 1], [], []>} : vector<8x128xbf16>, vector<128x384xbf16>, vector<8x384xf32> -> vector<8x384xf32>
    %203 = vector.extract_strided_slice %199 {offsets = [0, 0], sizes = [8, 128], strides = [1, 1]} : vector<8x384xf32> to vector<8x128xf32>
    %204 = vector.extract_strided_slice %202 {offsets = [0, 0], sizes = [8, 128], strides = [1, 1]} : vector<8x384xf32> to vector<8x128xf32>
    %205 = arith.addf %203, %204 : vector<8x128xf32>
    %206 = arith.negf %205 : vector<8x128xf32>
    %207 = math.exp %206 : vector<8x128xf32>
    %cst_44 = arith.constant 1.000000e+00 : f32
    %208 = vector.broadcast %cst_44 : f32 to vector<8x128xf32>
    %209 = arith.addf %208, %207 : vector<8x128xf32>
    %210 = arith.divf %208, %209 : vector<8x128xf32>
    %211 = vector.extract_strided_slice %199 {offsets = [0, 128], sizes = [8, 128], strides = [1, 1]} : vector<8x384xf32> to vector<8x128xf32>
    %212 = vector.extract_strided_slice %202 {offsets = [0, 128], sizes = [8, 128], strides = [1, 1]} : vector<8x384xf32> to vector<8x128xf32>
    %213 = arith.addf %211, %212 : vector<8x128xf32>
    %214 = arith.negf %213 : vector<8x128xf32>
    %215 = math.exp %214 : vector<8x128xf32>
    %cst_45 = arith.constant 1.000000e+00 : f32
    %216 = vector.broadcast %cst_45 : f32 to vector<8x128xf32>
    %217 = arith.addf %216, %215 : vector<8x128xf32>
    %218 = arith.divf %216, %217 : vector<8x128xf32>
    %219 = vector.extract_strided_slice %199 {offsets = [0, 256], sizes = [8, 128], strides = [1, 1]} : vector<8x384xf32> to vector<8x128xf32>
    %220 = vector.extract_strided_slice %202 {offsets = [0, 256], sizes = [8, 128], strides = [1, 1]} : vector<8x384xf32> to vector<8x128xf32>
    %221 = arith.addf %220, %4 : vector<8x128xf32>
    %222 = arith.mulf %210, %221 : vector<8x128xf32>
    %223 = arith.addf %219, %222 : vector<8x128xf32>
    %224 = math.tanh %223 : vector<8x128xf32>
    %cst_46 = arith.constant 1.000000e+00 : f32
    %225 = vector.broadcast %cst_46 : f32 to vector<8x128xf32>
    %226 = arith.subf %225, %218 : vector<8x128xf32>
    %227 = arith.mulf %226, %224 : vector<8x128xf32>
    %228 = arith.mulf %218, %197 : vector<8x128xf32>
    %229 = arith.addf %227, %228 : vector<8x128xf32>
    %c5_i32 = arith.constant 5 : i32
    %230 = vector.broadcast %c5_i32 : i32 to vector<8x1xi32>
    %231 = arith.cmpi sgt, %0, %230 : vector<8x1xi32>
    %232 = vector.shape_cast %231 : vector<8x1xi1> to vector<8x1xi1>
    %233 = vector.broadcast %232 : vector<8x1xi1> to vector<8x128xi1>
    %234 = arith.select %233, %229, %197 : vector<8x128xi1>, vector<8x128xf32>
    %235 = vector.extract_strided_slice %12 {offsets = [6, 0, 0], sizes = [1, 8, 384], strides = [1, 1, 1]} : vector<8x8x384xf32> to vector<1x8x384xf32>
    %236 = vector.shape_cast %235 : vector<1x8x384xf32> to vector<8x384xf32>
    %237 = arith.truncf %234 : vector<8x128xf32> to vector<8x128xbf16>
    %c0_47 = arith.constant 0 : index
    %c0_48 = arith.constant 0 : index
    %238 = vector.load %arg4[%c0_47, %c0_48] : memref<128x384xbf16, #tpu.memory_space<vmem>>, vector<128x384xbf16>
    %cst_49 = arith.constant dense<0.000000e+00> : vector<8x384xf32>
    %239 = tpu.matmul %237, %238, %cst_49 {dimension_numbers = #tpu.dot_dimension_numbers<[1], [0], [0], [1], [0, 0, 1, 1], [], []>} : vector<8x128xbf16>, vector<128x384xbf16>, vector<8x384xf32> -> vector<8x384xf32>
    %240 = vector.extract_strided_slice %236 {offsets = [0, 0], sizes = [8, 128], strides = [1, 1]} : vector<8x384xf32> to vector<8x128xf32>
    %241 = vector.extract_strided_slice %239 {offsets = [0, 0], sizes = [8, 128], strides = [1, 1]} : vector<8x384xf32> to vector<8x128xf32>
    %242 = arith.addf %240, %241 : vector<8x128xf32>
    %243 = arith.negf %242 : vector<8x128xf32>
    %244 = math.exp %243 : vector<8x128xf32>
    %cst_50 = arith.constant 1.000000e+00 : f32
    %245 = vector.broadcast %cst_50 : f32 to vector<8x128xf32>
    %246 = arith.addf %245, %244 : vector<8x128xf32>
    %247 = arith.divf %245, %246 : vector<8x128xf32>
    %248 = vector.extract_strided_slice %236 {offsets = [0, 128], sizes = [8, 128], strides = [1, 1]} : vector<8x384xf32> to vector<8x128xf32>
    %249 = vector.extract_strided_slice %239 {offsets = [0, 128], sizes = [8, 128], strides = [1, 1]} : vector<8x384xf32> to vector<8x128xf32>
    %250 = arith.addf %248, %249 : vector<8x128xf32>
    %251 = arith.negf %250 : vector<8x128xf32>
    %252 = math.exp %251 : vector<8x128xf32>
    %cst_51 = arith.constant 1.000000e+00 : f32
    %253 = vector.broadcast %cst_51 : f32 to vector<8x128xf32>
    %254 = arith.addf %253, %252 : vector<8x128xf32>
    %255 = arith.divf %253, %254 : vector<8x128xf32>
    %256 = vector.extract_strided_slice %236 {offsets = [0, 256], sizes = [8, 128], strides = [1, 1]} : vector<8x384xf32> to vector<8x128xf32>
    %257 = vector.extract_strided_slice %239 {offsets = [0, 256], sizes = [8, 128], strides = [1, 1]} : vector<8x384xf32> to vector<8x128xf32>
    %258 = arith.addf %257, %4 : vector<8x128xf32>
    %259 = arith.mulf %247, %258 : vector<8x128xf32>
    %260 = arith.addf %256, %259 : vector<8x128xf32>
    %261 = math.tanh %260 : vector<8x128xf32>
    %cst_52 = arith.constant 1.000000e+00 : f32
    %262 = vector.broadcast %cst_52 : f32 to vector<8x128xf32>
    %263 = arith.subf %262, %255 : vector<8x128xf32>
    %264 = arith.mulf %263, %261 : vector<8x128xf32>
    %265 = arith.mulf %255, %234 : vector<8x128xf32>
    %266 = arith.addf %264, %265 : vector<8x128xf32>
    %c6_i32 = arith.constant 6 : i32
    %267 = vector.broadcast %c6_i32 : i32 to vector<8x1xi32>
    %268 = arith.cmpi sgt, %0, %267 : vector<8x1xi32>
    %269 = vector.shape_cast %268 : vector<8x1xi1> to vector<8x1xi1>
    %270 = vector.broadcast %269 : vector<8x1xi1> to vector<8x128xi1>
    %271 = arith.select %270, %266, %234 : vector<8x128xi1>, vector<8x128xf32>
    %272 = vector.extract_strided_slice %12 {offsets = [7, 0, 0], sizes = [1, 8, 384], strides = [1, 1, 1]} : vector<8x8x384xf32> to vector<1x8x384xf32>
    %273 = vector.shape_cast %272 : vector<1x8x384xf32> to vector<8x384xf32>
    %274 = arith.truncf %271 : vector<8x128xf32> to vector<8x128xbf16>
    %c0_53 = arith.constant 0 : index
    %c0_54 = arith.constant 0 : index
    %275 = vector.load %arg4[%c0_53, %c0_54] : memref<128x384xbf16, #tpu.memory_space<vmem>>, vector<128x384xbf16>
    %cst_55 = arith.constant dense<0.000000e+00> : vector<8x384xf32>
    %276 = tpu.matmul %274, %275, %cst_55 {dimension_numbers = #tpu.dot_dimension_numbers<[1], [0], [0], [1], [0, 0, 1, 1], [], []>} : vector<8x128xbf16>, vector<128x384xbf16>, vector<8x384xf32> -> vector<8x384xf32>
    %277 = vector.extract_strided_slice %273 {offsets = [0, 0], sizes = [8, 128], strides = [1, 1]} : vector<8x384xf32> to vector<8x128xf32>
    %278 = vector.extract_strided_slice %276 {offsets = [0, 0], sizes = [8, 128], strides = [1, 1]} : vector<8x384xf32> to vector<8x128xf32>
    %279 = arith.addf %277, %278 : vector<8x128xf32>
    %280 = arith.negf %279 : vector<8x128xf32>
    %281 = math.exp %280 : vector<8x128xf32>
    %cst_56 = arith.constant 1.000000e+00 : f32
    %282 = vector.broadcast %cst_56 : f32 to vector<8x128xf32>
    %283 = arith.addf %282, %281 : vector<8x128xf32>
    %284 = arith.divf %282, %283 : vector<8x128xf32>
    %285 = vector.extract_strided_slice %273 {offsets = [0, 128], sizes = [8, 128], strides = [1, 1]} : vector<8x384xf32> to vector<8x128xf32>
    %286 = vector.extract_strided_slice %276 {offsets = [0, 128], sizes = [8, 128], strides = [1, 1]} : vector<8x384xf32> to vector<8x128xf32>
    %287 = arith.addf %285, %286 : vector<8x128xf32>
    %288 = arith.negf %287 : vector<8x128xf32>
    %289 = math.exp %288 : vector<8x128xf32>
    %cst_57 = arith.constant 1.000000e+00 : f32
    %290 = vector.broadcast %cst_57 : f32 to vector<8x128xf32>
    %291 = arith.addf %290, %289 : vector<8x128xf32>
    %292 = arith.divf %290, %291 : vector<8x128xf32>
    %293 = vector.extract_strided_slice %273 {offsets = [0, 256], sizes = [8, 128], strides = [1, 1]} : vector<8x384xf32> to vector<8x128xf32>
    %294 = vector.extract_strided_slice %276 {offsets = [0, 256], sizes = [8, 128], strides = [1, 1]} : vector<8x384xf32> to vector<8x128xf32>
    %295 = arith.addf %294, %4 : vector<8x128xf32>
    %296 = arith.mulf %284, %295 : vector<8x128xf32>
    %297 = arith.addf %293, %296 : vector<8x128xf32>
    %298 = math.tanh %297 : vector<8x128xf32>
    %cst_58 = arith.constant 1.000000e+00 : f32
    %299 = vector.broadcast %cst_58 : f32 to vector<8x128xf32>
    %300 = arith.subf %299, %292 : vector<8x128xf32>
    %301 = arith.mulf %300, %298 : vector<8x128xf32>
    %302 = arith.mulf %292, %271 : vector<8x128xf32>
    %303 = arith.addf %301, %302 : vector<8x128xf32>
    %c7_i32 = arith.constant 7 : i32
    %304 = vector.broadcast %c7_i32 : i32 to vector<8x1xi32>
    %305 = arith.cmpi sgt, %0, %304 : vector<8x1xi32>
    %306 = vector.shape_cast %305 : vector<8x1xi1> to vector<8x1xi1>
    %307 = vector.broadcast %306 : vector<8x1xi1> to vector<8x128xi1>
    %308 = arith.select %307, %303, %271 : vector<8x128xi1>, vector<8x128xf32>
    %309 = arith.truncf %308 : vector<8x128xf32> to vector<8x128xbf16>
    %c0_59 = arith.constant 0 : index
    %c0_60 = arith.constant 0 : index
    %310 = vector.load %arg7[%c0_59, %c0_60] : memref<128x128xbf16, #tpu.memory_space<vmem>>, vector<128x128xbf16>
    %cst_61 = arith.constant dense<0.000000e+00> : vector<8x128xf32>
    %311 = tpu.matmul %309, %310, %cst_61 {dimension_numbers = #tpu.dot_dimension_numbers<[1], [0], [0], [1], [0, 0, 1, 1], [], []>} : vector<8x128xbf16>, vector<128x128xbf16>, vector<8x128xf32> -> vector<8x128xf32>
    %c0_62 = arith.constant 0 : index
    %c0_63 = arith.constant 0 : index
    %312 = vector.load %arg8[%c0_62, %c0_63] : memref<1x128xf32, #tpu.memory_space<vmem>>, vector<1x128xf32>
    %313 = vector.broadcast %312 : vector<1x128xf32> to vector<8x128xf32>
    %314 = arith.addf %311, %313 : vector<8x128xf32>
    %315 = math.tanh %314 : vector<8x128xf32>
    %c0_i32_64 = arith.constant 0 : i32
    %316 = vector.broadcast %c0_i32_64 : i32 to vector<8x1xi32>
    %317 = arith.cmpi sgt, %0, %316 : vector<8x1xi32>
    %cst_65 = arith.constant 0.000000e+00 : f32
    %318 = vector.shape_cast %317 : vector<8x1xi1> to vector<8x1xi1>
    %319 = vector.broadcast %318 : vector<8x1xi1> to vector<8x128xi1>
    %320 = vector.broadcast %cst_65 : f32 to vector<8x128xf32>
    %321 = arith.select %319, %315, %320 : vector<8x128xi1>, vector<8x128xf32>
    %c0_66 = arith.constant 0 : index
    %c0_67 = arith.constant 0 : index
    %322 = vector.load %arg9[%c0_66, %c0_67] : memref<8x128xf32, #tpu.memory_space<vmem>>, vector<8x128xf32>
    tpu.vector_store %arg9[%c0_66, %c0_67], %321 {strides = array<i32>} : memref<8x128xf32, #tpu.memory_space<vmem>>, vector<8x128xf32>,
    return
  }
  func.func @transform_0(%arg0: i32) -> (i32, i32, i32) {
    %c0_i32 = arith.constant 0 : i32
    %c0_i32_0 = arith.constant 0 : i32
    %c0_i32_1 = arith.constant 0 : i32
    return %c0_i32, %arg0, %c0_i32_0 : i32, i32, i32
  }
  func.func @transform_1(%arg0: i32) -> (i32, i32) {
    %c0_i32 = arith.constant 0 : i32
    %c0_i32_0 = arith.constant 0 : i32
    return %arg0, %c0_i32 : i32, i32
  }
  func.func @transform_2(%arg0: i32) -> (i32, i32) {
    %c0_i32 = arith.constant 0 : i32
    %c0_i32_0 = arith.constant 0 : i32
    %c0_i32_1 = arith.constant 0 : i32
    return %c0_i32, %c0_i32_0 : i32, i32
  }
  func.func @transform_3(%arg0: i32) -> (i32, i32) {
    %c0_i32 = arith.constant 0 : i32
    %c0_i32_0 = arith.constant 0 : i32
    %c0_i32_1 = arith.constant 0 : i32
    return %c0_i32, %c0_i32_0 : i32, i32
  }
  func.func @transform_4(%arg0: i32) -> (i32, i32) {
    %c0_i32 = arith.constant 0 : i32
    %c0_i32_0 = arith.constant 0 : i32
    %c0_i32_1 = arith.constant 0 : i32
    return %c0_i32, %c0_i32_0 : i32, i32
  }
  func.func @transform_5(%arg0: i32) -> (i32, i32) {
    %c0_i32 = arith.constant 0 : i32
    %c0_i32_0 = arith.constant 0 : i32
    %c0_i32_1 = arith.constant 0 : i32
    return %c0_i32, %c0_i32_0 : i32, i32
  }
  func.func @transform_6(%arg0: i32) -> (i32, i32) {
    %c0_i32 = arith.constant 0 : i32
    %c0_i32_0 = arith.constant 0 : i32
    %c0_i32_1 = arith.constant 0 : i32
    return %c0_i32, %c0_i32_0 : i32, i32
  }
  func.func @transform_7(%arg0: i32) -> (i32, i32) {
    %c0_i32 = arith.constant 0 : i32
    %c0_i32_0 = arith.constant 0 : i32
    %c0_i32_1 = arith.constant 0 : i32
    return %c0_i32, %c0_i32_0 : i32, i32
  }
  func.func @transform_8(%arg0: i32) -> (i32, i32) {
    %c0_i32 = arith.constant 0 : i32
    %c0_i32_0 = arith.constant 0 : i32
    return %arg0, %c0_i32 : i32, i32
  }
}

module attributes {stable_mosaic.version = 11 : i64} {
  func.func @gru_user_kernel(%arg0: i32, %arg1: memref<8x8x128xbf16, #tpu.memory_space<vmem>>, %arg2: memref<8x1xi32, #tpu.memory_space<vmem>>, %arg3: memref<128x384xbf16, #tpu.memory_space<vmem>>, %arg4: memref<128x384xbf16, #tpu.memory_space<vmem>>, %arg5: memref<1x384xf32, #tpu.memory_space<vmem>>, %arg6: memref<1x128xf32, #tpu.memory_space<vmem>>, %arg7: memref<128x128xbf16, #tpu.memory_space<vmem>>, %arg8: memref<1x128xf32, #tpu.memory_space<vmem>>, %arg9: memref<8x128xf32, #tpu.memory_space<vmem>>) attributes {dimension_semantics = [#tpu.dimension_semantics<parallel>], iteration_bounds = array<i64: 1>, scalar_prefetch = 0 : i64, scratch_operands = 0 : i64, tpu.core_type = #tpu.core_type<tc>, window_params = [{transform_indices = @transform_0, window_bounds = array<i64: 8, 8, 128>}, {transform_indices = @transform_1, window_bounds = array<i64: 8, 1>}, {pipeline_mode = #tpu.pipeline_mode<synchronous>, transform_indices = @transform_2, window_bounds = array<i64: 128, 384>}, {pipeline_mode = #tpu.pipeline_mode<synchronous>, transform_indices = @transform_3, window_bounds = array<i64: 128, 384>}, {pipeline_mode = #tpu.pipeline_mode<synchronous>, transform_indices = @transform_4, window_bounds = array<i64: 1, 384>}, {pipeline_mode = #tpu.pipeline_mode<synchronous>, transform_indices = @transform_5, window_bounds = array<i64: 1, 128>}, {pipeline_mode = #tpu.pipeline_mode<synchronous>, transform_indices = @transform_6, window_bounds = array<i64: 128, 128>}, {pipeline_mode = #tpu.pipeline_mode<synchronous>, transform_indices = @transform_7, window_bounds = array<i64: 1, 128>}, {transform_indices = @transform_8, window_bounds = array<i64: 8, 128>}]} {
    %c0 = arith.constant 0 : index
    %c0_0 = arith.constant 0 : index
    %0 = vector.load %arg2[%c0, %c0_0] : memref<8x1xi32, #tpu.memory_space<vmem>>, vector<8x1xi32>
    %c0_1 = arith.constant 0 : index
    %c0_2 = arith.constant 0 : index
    %1 = vector.load %arg5[%c0_1, %c0_2] : memref<1x384xf32, #tpu.memory_space<vmem>>, vector<1x384xf32>
    %c0_3 = arith.constant 0 : index
    %c0_4 = arith.constant 0 : index
    %2 = vector.load %arg6[%c0_3, %c0_4] : memref<1x128xf32, #tpu.memory_space<vmem>>, vector<1x128xf32>
    %3 = vector.shape_cast %2 : vector<1x128xf32> to vector<1x128xf32>
    %4 = vector.broadcast %3 : vector<1x128xf32> to vector<8x128xf32>
    %cst = arith.constant 0.000000e+00 : f32
    %5 = vector.broadcast %cst : f32 to vector<8x128xf32>
    %c0_5 = arith.constant 0 : index
    %c0_6 = arith.constant 0 : index
    %c0_7 = arith.constant 0 : index
    %6 = vector.load %arg1[%c0_5, %c0_6, %c0_7] : memref<8x8x128xbf16, #tpu.memory_space<vmem>>, vector<8x8x128xbf16>
    %7 = vector.shape_cast %6 : vector<8x8x128xbf16> to vector<64x128xbf16>
    %c0_8 = arith.constant 0 : index
    %c0_9 = arith.constant 0 : index
    %8 = vector.load %arg3[%c0_8, %c0_9] : memref<128x384xbf16, #tpu.memory_space<vmem>>, vector<128x384xbf16>
    %cst_10 = arith.constant dense<0.000000e+00> : vector<64x384xf32>
    %9 = tpu.matmul %7, %8, %cst_10 {dimension_numbers = #tpu.dot_dimension_numbers<[1], [0], [0], [1], [0, 0, 1, 1], [], []>} : vector<64x128xbf16>, vector<128x384xbf16>, vector<64x384xf32> -> vector<64x384xf32>
    %10 = vector.broadcast %1 : vector<1x384xf32> to vector<64x384xf32>
    %11 = arith.addf %9, %10 : vector<64x384xf32>
    %12 = vector.shape_cast %11 : vector<64x384xf32> to vector<8x8x384xf32>
    %13 = vector.extract_strided_slice %12 {offsets = [0, 0, 0], sizes = [1, 8, 384], strides = [1, 1, 1]} : vector<8x8x384xf32> to vector<1x8x384xf32>
    %14 = vector.shape_cast %13 : vector<1x8x384xf32> to vector<8x384xf32>
    %15 = arith.truncf %5 : vector<8x128xf32> to vector<8x128xbf16>
    %c0_11 = arith.constant 0 : index
    %c0_12 = arith.constant 0 : index
    %16 = vector.load %arg4[%c0_11, %c0_12] : memref<128x384xbf16, #tpu.memory_space<vmem>>, vector<128x384xbf16>
    %cst_13 = arith.constant dense<0.000000e+00> : vector<8x384xf32>
    %17 = tpu.matmul %15, %16, %cst_13 {dimension_numbers = #tpu.dot_dimension_numbers<[1], [0], [0], [1], [0, 0, 1, 1], [], []>} : vector<8x128xbf16>, vector<128x384xbf16>, vector<8x384xf32> -> vector<8x384xf32>
    %18 = vector.extract_strided_slice %14 {offsets = [0, 0], sizes = [8, 128], strides = [1, 1]} : vector<8x384xf32> to vector<8x128xf32>
    %19 = vector.extract_strided_slice %17 {offsets = [0, 0], sizes = [8, 128], strides = [1, 1]} : vector<8x384xf32> to vector<8x128xf32>
    %20 = arith.addf %18, %19 : vector<8x128xf32>
    %21 = arith.negf %20 : vector<8x128xf32>
    %22 = math.exp %21 : vector<8x128xf32>
    %cst_14 = arith.constant 1.000000e+00 : f32
    %23 = vector.broadcast %cst_14 : f32 to vector<8x128xf32>
    %24 = arith.addf %23, %22 : vector<8x128xf32>
    %25 = arith.divf %23, %24 : vector<8x128xf32>
    %26 = vector.extract_strided_slice %14 {offsets = [0, 128], sizes = [8, 128], strides = [1, 1]} : vector<8x384xf32> to vector<8x128xf32>
    %27 = vector.extract_strided_slice %17 {offsets = [0, 128], sizes = [8, 128], strides = [1, 1]} : vector<8x384xf32> to vector<8x128xf32>
    %28 = arith.addf %26, %27 : vector<8x128xf32>
    %29 = arith.negf %28 : vector<8x128xf32>
    %30 = math.exp %29 : vector<8x128xf32>
    %cst_15 = arith.constant 1.000000e+00 : f32
    %31 = vector.broadcast %cst_15 : f32 to vector<8x128xf32>
    %32 = arith.addf %31, %30 : vector<8x128xf32>
    %33 = arith.divf %31, %32 : vector<8x128xf32>
    %34 = vector.extract_strided_slice %14 {offsets = [0, 256], sizes = [8, 128], strides = [1, 1]} : vector<8x384xf32> to vector<8x128xf32>
    %35 = vector.extract_strided_slice %17 {offsets = [0, 256], sizes = [8, 128], strides = [1, 1]} : vector<8x384xf32> to vector<8x128xf32>
    %36 = arith.addf %35, %4 : vector<8x128xf32>
    %37 = arith.mulf %25, %36 : vector<8x128xf32>
    %38 = arith.addf %34, %37 : vector<8x128xf32>
    %39 = math.tanh %38 : vector<8x128xf32>
    %cst_16 = arith.constant 1.000000e+00 : f32
    %40 = vector.broadcast %cst_16 : f32 to vector<8x128xf32>
    %41 = arith.subf %40, %33 : vector<8x128xf32>
    %42 = arith.mulf %41, %39 : vector<8x128xf32>
    %43 = arith.mulf %33, %5 : vector<8x128xf32>
    %44 = arith.addf %42, %43 : vector<8x128xf32>
    %c0_i32 = arith.constant 0 : i32
    %45 = vector.broadcast %c0_i32 : i32 to vector<8x1xi32>
    %46 = arith.cmpi sgt, %0, %45 : vector<8x1xi32>
    %47 = vector.shape_cast %46 : vector<8x1xi1> to vector<8x1xi1>
    %48 = vector.broadcast %47 : vector<8x1xi1> to vector<8x128xi1>
    %49 = arith.select %48, %44, %5 : vector<8x128xi1>, vector<8x128xf32>
    %50 = vector.extract_strided_slice %12 {offsets = [1, 0, 0], sizes = [1, 8, 384], strides = [1, 1, 1]} : vector<8x8x384xf32> to vector<1x8x384xf32>
    %51 = vector.shape_cast %50 : vector<1x8x384xf32> to vector<8x384xf32>
    %52 = arith.truncf %49 : vector<8x128xf32> to vector<8x128xbf16>
    %c0_17 = arith.constant 0 : index
    %c0_18 = arith.constant 0 : index
    %53 = vector.load %arg4[%c0_17, %c0_18] : memref<128x384xbf16, #tpu.memory_space<vmem>>, vector<128x384xbf16>
    %cst_19 = arith.constant dense<0.000000e+00> : vector<8x384xf32>
    %54 = tpu.matmul %52, %53, %cst_19 {dimension_numbers = #tpu.dot_dimension_numbers<[1], [0], [0], [1], [0, 0, 1, 1], [], []>} : vector<8x128xbf16>, vector<128x384xbf16>, vector<8x384xf32> -> vector<8x384xf32>
    %55 = vector.extract_strided_slice %51 {offsets = [0, 0], sizes = [8, 128], strides = [1, 1]} : vector<8x384xf32> to vector<8x128xf32>
    %56 = vector.extract_strided_slice %54 {offsets = [0, 0], sizes = [8, 128], strides = [1, 1]} : vector<8x384xf32> to vector<8x128xf32>
    %57 = arith.addf %55, %56 : vector<8x128xf32>
    %58 = arith.negf %57 : vector<8x128xf32>
    %59 = math.exp %58 : vector<8x128xf32>
    %cst_20 = arith.constant 1.000000e+00 : f32
    %60 = vector.broadcast %cst_20 : f32 to vector<8x128xf32>
    %61 = arith.addf %60, %59 : vector<8x128xf32>
    %62 = arith.divf %60, %61 : vector<8x128xf32>
    %63 = vector.extract_strided_slice %51 {offsets = [0, 128], sizes = [8, 128], strides = [1, 1]} : vector<8x384xf32> to vector<8x128xf32>
    %64 = vector.extract_strided_slice %54 {offsets = [0, 128], sizes = [8, 128], strides = [1, 1]} : vector<8x384xf32> to vector<8x128xf32>
    %65 = arith.addf %63, %64 : vector<8x128xf32>
    %66 = arith.negf %65 : vector<8x128xf32>
    %67 = math.exp %66 : vector<8x128xf32>
    %cst_21 = arith.constant 1.000000e+00 : f32
    %68 = vector.broadcast %cst_21 : f32 to vector<8x128xf32>
    %69 = arith.addf %68, %67 : vector<8x128xf32>
    %70 = arith.divf %68, %69 : vector<8x128xf32>
    %71 = vector.extract_strided_slice %51 {offsets = [0, 256], sizes = [8, 128], strides = [1, 1]} : vector<8x384xf32> to vector<8x128xf32>
    %72 = vector.extract_strided_slice %54 {offsets = [0, 256], sizes = [8, 128], strides = [1, 1]} : vector<8x384xf32> to vector<8x128xf32>
    %73 = arith.addf %72, %4 : vector<8x128xf32>
    %74 = arith.mulf %62, %73 : vector<8x128xf32>
    %75 = arith.addf %71, %74 : vector<8x128xf32>
    %76 = math.tanh %75 : vector<8x128xf32>
    %cst_22 = arith.constant 1.000000e+00 : f32
    %77 = vector.broadcast %cst_22 : f32 to vector<8x128xf32>
    %78 = arith.subf %77, %70 : vector<8x128xf32>
    %79 = arith.mulf %78, %76 : vector<8x128xf32>
    %80 = arith.mulf %70, %49 : vector<8x128xf32>
    %81 = arith.addf %79, %80 : vector<8x128xf32>
    %c1_i32 = arith.constant 1 : i32
    %82 = vector.broadcast %c1_i32 : i32 to vector<8x1xi32>
    %83 = arith.cmpi sgt, %0, %82 : vector<8x1xi32>
    %84 = vector.shape_cast %83 : vector<8x1xi1> to vector<8x1xi1>
    %85 = vector.broadcast %84 : vector<8x1xi1> to vector<8x128xi1>
    %86 = arith.select %85, %81, %49 : vector<8x128xi1>, vector<8x128xf32>
    %87 = vector.extract_strided_slice %12 {offsets = [2, 0, 0], sizes = [1, 8, 384], strides = [1, 1, 1]} : vector<8x8x384xf32> to vector<1x8x384xf32>
    %88 = vector.shape_cast %87 : vector<1x8x384xf32> to vector<8x384xf32>
    %89 = arith.truncf %86 : vector<8x128xf32> to vector<8x128xbf16>
    %c0_23 = arith.constant 0 : index
    %c0_24 = arith.constant 0 : index
    %90 = vector.load %arg4[%c0_23, %c0_24] : memref<128x384xbf16, #tpu.memory_space<vmem>>, vector<128x384xbf16>
    %cst_25 = arith.constant dense<0.000000e+00> : vector<8x384xf32>
    %91 = tpu.matmul %89, %90, %cst_25 {dimension_numbers = #tpu.dot_dimension_numbers<[1], [0], [0], [1], [0, 0, 1, 1], [], []>} : vector<8x128xbf16>, vector<128x384xbf16>, vector<8x384xf32> -> vector<8x384xf32>
    %92 = vector.extract_strided_slice %88 {offsets = [0, 0], sizes = [8, 128], strides = [1, 1]} : vector<8x384xf32> to vector<8x128xf32>
    %93 = vector.extract_strided_slice %91 {offsets = [0, 0], sizes = [8, 128], strides = [1, 1]} : vector<8x384xf32> to vector<8x128xf32>
    %94 = arith.addf %92, %93 : vector<8x128xf32>
    %95 = arith.negf %94 : vector<8x128xf32>
    %96 = math.exp %95 : vector<8x128xf32>
    %cst_26 = arith.constant 1.000000e+00 : f32
    %97 = vector.broadcast %cst_26 : f32 to vector<8x128xf32>
    %98 = arith.addf %97, %96 : vector<8x128xf32>
    %99 = arith.divf %97, %98 : vector<8x128xf32>
    %100 = vector.extract_strided_slice %88 {offsets = [0, 128], sizes = [8, 128], strides = [1, 1]} : vector<8x384xf32> to vector<8x128xf32>
    %101 = vector.extract_strided_slice %91 {offsets = [0, 128], sizes = [8, 128], strides = [1, 1]} : vector<8x384xf32> to vector<8x128xf32>
    %102 = arith.addf %100, %101 : vector<8x128xf32>
    %103 = arith.negf %102 : vector<8x128xf32>
    %104 = math.exp %103 : vector<8x128xf32>
    %cst_27 = arith.constant 1.000000e+00 : f32
    %105 = vector.broadcast %cst_27 : f32 to vector<8x128xf32>
    %106 = arith.addf %105, %104 : vector<8x128xf32>
    %107 = arith.divf %105, %106 : vector<8x128xf32>
    %108 = vector.extract_strided_slice %88 {offsets = [0, 256], sizes = [8, 128], strides = [1, 1]} : vector<8x384xf32> to vector<8x128xf32>
    %109 = vector.extract_strided_slice %91 {offsets = [0, 256], sizes = [8, 128], strides = [1, 1]} : vector<8x384xf32> to vector<8x128xf32>
    %110 = arith.addf %109, %4 : vector<8x128xf32>
    %111 = arith.mulf %99, %110 : vector<8x128xf32>
    %112 = arith.addf %108, %111 : vector<8x128xf32>
    %113 = math.tanh %112 : vector<8x128xf32>
    %cst_28 = arith.constant 1.000000e+00 : f32
    %114 = vector.broadcast %cst_28 : f32 to vector<8x128xf32>
    %115 = arith.subf %114, %107 : vector<8x128xf32>
    %116 = arith.mulf %115, %113 : vector<8x128xf32>
    %117 = arith.mulf %107, %86 : vector<8x128xf32>
    %118 = arith.addf %116, %117 : vector<8x128xf32>
    %c2_i32 = arith.constant 2 : i32
    %119 = vector.broadcast %c2_i32 : i32 to vector<8x1xi32>
    %120 = arith.cmpi sgt, %0, %119 : vector<8x1xi32>
    %121 = vector.shape_cast %120 : vector<8x1xi1> to vector<8x1xi1>
    %122 = vector.broadcast %121 : vector<8x1xi1> to vector<8x128xi1>
    %123 = arith.select %122, %118, %86 : vector<8x128xi1>, vector<8x128xf32>
    %124 = vector.extract_strided_slice %12 {offsets = [3, 0, 0], sizes = [1, 8, 384], strides = [1, 1, 1]} : vector<8x8x384xf32> to vector<1x8x384xf32>
    %125 = vector.shape_cast %124 : vector<1x8x384xf32> to vector<8x384xf32>
    %126 = arith.truncf %123 : vector<8x128xf32> to vector<8x128xbf16>
    %c0_29 = arith.constant 0 : index
    %c0_30 = arith.constant 0 : index
    %127 = vector.load %arg4[%c0_29, %c0_30] : memref<128x384xbf16, #tpu.memory_space<vmem>>, vector<128x384xbf16>
    %cst_31 = arith.constant dense<0.000000e+00> : vector<8x384xf32>
    %128 = tpu.matmul %126, %127, %cst_31 {dimension_numbers = #tpu.dot_dimension_numbers<[1], [0], [0], [1], [0, 0, 1, 1], [], []>} : vector<8x128xbf16>, vector<128x384xbf16>, vector<8x384xf32> -> vector<8x384xf32>
    %129 = vector.extract_strided_slice %125 {offsets = [0, 0], sizes = [8, 128], strides = [1, 1]} : vector<8x384xf32> to vector<8x128xf32>
    %130 = vector.extract_strided_slice %128 {offsets = [0, 0], sizes = [8, 128], strides = [1, 1]} : vector<8x384xf32> to vector<8x128xf32>
    %131 = arith.addf %129, %130 : vector<8x128xf32>
    %132 = arith.negf %131 : vector<8x128xf32>
    %133 = math.exp %132 : vector<8x128xf32>
    %cst_32 = arith.constant 1.000000e+00 : f32
    %134 = vector.broadcast %cst_32 : f32 to vector<8x128xf32>
    %135 = arith.addf %134, %133 : vector<8x128xf32>
    %136 = arith.divf %134, %135 : vector<8x128xf32>
    %137 = vector.extract_strided_slice %125 {offsets = [0, 128], sizes = [8, 128], strides = [1, 1]} : vector<8x384xf32> to vector<8x128xf32>
    %138 = vector.extract_strided_slice %128 {offsets = [0, 128], sizes = [8, 128], strides = [1, 1]} : vector<8x384xf32> to vector<8x128xf32>
    %139 = arith.addf %137, %138 : vector<8x128xf32>
    %140 = arith.negf %139 : vector<8x128xf32>
    %141 = math.exp %140 : vector<8x128xf32>
    %cst_33 = arith.constant 1.000000e+00 : f32
    %142 = vector.broadcast %cst_33 : f32 to vector<8x128xf32>
    %143 = arith.addf %142, %141 : vector<8x128xf32>
    %144 = arith.divf %142, %143 : vector<8x128xf32>
    %145 = vector.extract_strided_slice %125 {offsets = [0, 256], sizes = [8, 128], strides = [1, 1]} : vector<8x384xf32> to vector<8x128xf32>
    %146 = vector.extract_strided_slice %128 {offsets = [0, 256], sizes = [8, 128], strides = [1, 1]} : vector<8x384xf32> to vector<8x128xf32>
    %147 = arith.addf %146, %4 : vector<8x128xf32>
    %148 = arith.mulf %136, %147 : vector<8x128xf32>
    %149 = arith.addf %145, %148 : vector<8x128xf32>
    %150 = math.tanh %149 : vector<8x128xf32>
    %cst_34 = arith.constant 1.000000e+00 : f32
    %151 = vector.broadcast %cst_34 : f32 to vector<8x128xf32>
    %152 = arith.subf %151, %144 : vector<8x128xf32>
    %153 = arith.mulf %152, %150 : vector<8x128xf32>
    %154 = arith.mulf %144, %123 : vector<8x128xf32>
    %155 = arith.addf %153, %154 : vector<8x128xf32>
    %c3_i32 = arith.constant 3 : i32
    %156 = vector.broadcast %c3_i32 : i32 to vector<8x1xi32>
    %157 = arith.cmpi sgt, %0, %156 : vector<8x1xi32>
    %158 = vector.shape_cast %157 : vector<8x1xi1> to vector<8x1xi1>
    %159 = vector.broadcast %158 : vector<8x1xi1> to vector<8x128xi1>
    %160 = arith.select %159, %155, %123 : vector<8x128xi1>, vector<8x128xf32>
    %161 = vector.extract_strided_slice %12 {offsets = [4, 0, 0], sizes = [1, 8, 384], strides = [1, 1, 1]} : vector<8x8x384xf32> to vector<1x8x384xf32>
    %162 = vector.shape_cast %161 : vector<1x8x384xf32> to vector<8x384xf32>
    %163 = arith.truncf %160 : vector<8x128xf32> to vector<8x128xbf16>
    %c0_35 = arith.constant 0 : index
    %c0_36 = arith.constant 0 : index
    %164 = vector.load %arg4[%c0_35, %c0_36] : memref<128x384xbf16, #tpu.memory_space<vmem>>, vector<128x384xbf16>
    %cst_37 = arith.constant dense<0.000000e+00> : vector<8x384xf32>
    %165 = tpu.matmul %163, %164, %cst_37 {dimension_numbers = #tpu.dot_dimension_numbers<[1], [0], [0], [1], [0, 0, 1, 1], [], []>} : vector<8x128xbf16>, vector<128x384xbf16>, vector<8x384xf32> -> vector<8x384xf32>
    %166 = vector.extract_strided_slice %162 {offsets = [0, 0], sizes = [8, 128], strides = [1, 1]} : vector<8x384xf32> to vector<8x128xf32>
    %167 = vector.extract_strided_slice %165 {offsets = [0, 0], sizes = [8, 128], strides = [1, 1]} : vector<8x384xf32> to vector<8x128xf32>
    %168 = arith.addf %166, %167 : vector<8x128xf32>
    %169 = arith.negf %168 : vector<8x128xf32>
    %170 = math.exp %169 : vector<8x128xf32>
    %cst_38 = arith.constant 1.000000e+00 : f32
    %171 = vector.broadcast %cst_38 : f32 to vector<8x128xf32>
    %172 = arith.addf %171, %170 : vector<8x128xf32>
    %173 = arith.divf %171, %172 : vector<8x128xf32>
    %174 = vector.extract_strided_slice %162 {offsets = [0, 128], sizes = [8, 128], strides = [1, 1]} : vector<8x384xf32> to vector<8x128xf32>
    %175 = vector.extract_strided_slice %165 {offsets = [0, 128], sizes = [8, 128], strides = [1, 1]} : vector<8x384xf32> to vector<8x128xf32>
    %176 = arith.addf %174, %175 : vector<8x128xf32>
    %177 = arith.negf %176 : vector<8x128xf32>
    %178 = math.exp %177 : vector<8x128xf32>
    %cst_39 = arith.constant 1.000000e+00 : f32
    %179 = vector.broadcast %cst_39 : f32 to vector<8x128xf32>
    %180 = arith.addf %179, %178 : vector<8x128xf32>
    %181 = arith.divf %179, %180 : vector<8x128xf32>
    %182 = vector.extract_strided_slice %162 {offsets = [0, 256], sizes = [8, 128], strides = [1, 1]} : vector<8x384xf32> to vector<8x128xf32>
    %183 = vector.extract_strided_slice %165 {offsets = [0, 256], sizes = [8, 128], strides = [1, 1]} : vector<8x384xf32> to vector<8x128xf32>
    %184 = arith.addf %183, %4 : vector<8x128xf32>
    %185 = arith.mulf %173, %184 : vector<8x128xf32>
    %186 = arith.addf %182, %185 : vector<8x128xf32>
    %187 = math.tanh %186 : vector<8x128xf32>
    %cst_40 = arith.constant 1.000000e+00 : f32
    %188 = vector.broadcast %cst_40 : f32 to vector<8x128xf32>
    %189 = arith.subf %188, %181 : vector<8x128xf32>
    %190 = arith.mulf %189, %187 : vector<8x128xf32>
    %191 = arith.mulf %181, %160 : vector<8x128xf32>
    %192 = arith.addf %190, %191 : vector<8x128xf32>
    %c4_i32 = arith.constant 4 : i32
    %193 = vector.broadcast %c4_i32 : i32 to vector<8x1xi32>
    %194 = arith.cmpi sgt, %0, %193 : vector<8x1xi32>
    %195 = vector.shape_cast %194 : vector<8x1xi1> to vector<8x1xi1>
    %196 = vector.broadcast %195 : vector<8x1xi1> to vector<8x128xi1>
    %197 = arith.select %196, %192, %160 : vector<8x128xi1>, vector<8x128xf32>
    %198 = vector.extract_strided_slice %12 {offsets = [5, 0, 0], sizes = [1, 8, 384], strides = [1, 1, 1]} : vector<8x8x384xf32> to vector<1x8x384xf32>
    %199 = vector.shape_cast %198 : vector<1x8x384xf32> to vector<8x384xf32>
    %200 = arith.truncf %197 : vector<8x128xf32> to vector<8x128xbf16>
    %c0_41 = arith.constant 0 : index
    %c0_42 = arith.constant 0 : index
    %201 = vector.load %arg4[%c0_41, %c0_42] : memref<128x384xbf16, #tpu.memory_space<vmem>>, vector<128x384xbf16>
    %cst_43 = arith.constant dense<0.000000e+00> : vector<8x384xf32>
    %202 = tpu.matmul %200, %201, %cst_43 {dimension_numbers = #tpu.dot_dimension_numbers<[1], [0], [0], [1], [0, 0, 1, 1], [], []>} : vector<8x128xbf16>, vector<128x384xbf16>, vector<8x384xf32> -> vector<8x384xf32>
    %203 = vector.extract_strided_slice %199 {offsets = [0, 0], sizes = [8, 128], strides = [1, 1]} : vector<8x384xf32> to vector<8x128xf32>
    %204 = vector.extract_strided_slice %202 {offsets = [0, 0], sizes = [8, 128], strides = [1, 1]} : vector<8x384xf32> to vector<8x128xf32>
    %205 = arith.addf %203, %204 : vector<8x128xf32>
    %206 = arith.negf %205 : vector<8x128xf32>
    %207 = math.exp %206 : vector<8x128xf32>
    %cst_44 = arith.constant 1.000000e+00 : f32
    %208 = vector.broadcast %cst_44 : f32 to vector<8x128xf32>
    %209 = arith.addf %208, %207 : vector<8x128xf32>
    %210 = arith.divf %208, %209 : vector<8x128xf32>
    %211 = vector.extract_strided_slice %199 {offsets = [0, 128], sizes = [8, 128], strides = [1, 1]} : vector<8x384xf32> to vector<8x128xf32>
    %212 = vector.extract_strided_slice %202 {offsets = [0, 128], sizes = [8, 128], strides = [1, 1]} : vector<8x384xf32> to vector<8x128xf32>
    %213 = arith.addf %211, %212 : vector<8x128xf32>
    %214 = arith.negf %213 : vector<8x128xf32>
    %215 = math.exp %214 : vector<8x128xf32>
    %cst_45 = arith.constant 1.000000e+00 : f32
    %216 = vector.broadcast %cst_45 : f32 to vector<8x128xf32>
    %217 = arith.addf %216, %215 : vector<8x128xf32>
    %218 = arith.divf %216, %217 : vector<8x128xf32>
    %219 = vector.extract_strided_slice %199 {offsets = [0, 256], sizes = [8, 128], strides = [1, 1]} : vector<8x384xf32> to vector<8x128xf32>
    %220 = vector.extract_strided_slice %202 {offsets = [0, 256], sizes = [8, 128], strides = [1, 1]} : vector<8x384xf32> to vector<8x128xf32>
    %221 = arith.addf %220, %4 : vector<8x128xf32>
    %222 = arith.mulf %210, %221 : vector<8x128xf32>
    %223 = arith.addf %219, %222 : vector<8x128xf32>
    %224 = math.tanh %223 : vector<8x128xf32>
    %cst_46 = arith.constant 1.000000e+00 : f32
    %225 = vector.broadcast %cst_46 : f32 to vector<8x128xf32>
    %226 = arith.subf %225, %218 : vector<8x128xf32>
    %227 = arith.mulf %226, %224 : vector<8x128xf32>
    %228 = arith.mulf %218, %197 : vector<8x128xf32>
    %229 = arith.addf %227, %228 : vector<8x128xf32>
    %c5_i32 = arith.constant 5 : i32
    %230 = vector.broadcast %c5_i32 : i32 to vector<8x1xi32>
    %231 = arith.cmpi sgt, %0, %230 : vector<8x1xi32>
    %232 = vector.shape_cast %231 : vector<8x1xi1> to vector<8x1xi1>
    %233 = vector.broadcast %232 : vector<8x1xi1> to vector<8x128xi1>
    %234 = arith.select %233, %229, %197 : vector<8x128xi1>, vector<8x128xf32>
    %235 = vector.extract_strided_slice %12 {offsets = [6, 0, 0], sizes = [1, 8, 384], strides = [1, 1, 1]} : vector<8x8x384xf32> to vector<1x8x384xf32>
    %236 = vector.shape_cast %235 : vector<1x8x384xf32> to vector<8x384xf32>
    %237 = arith.truncf %234 : vector<8x128xf32> to vector<8x128xbf16>
    %c0_47 = arith.constant 0 : index
    %c0_48 = arith.constant 0 : index
    %238 = vector.load %arg4[%c0_47, %c0_48] : memref<128x384xbf16, #tpu.memory_space<vmem>>, vector<128x384xbf16>
    %cst_49 = arith.constant dense<0.000000e+00> : vector<8x384xf32>
    %239 = tpu.matmul %237, %238, %cst_49 {dimension_numbers = #tpu.dot_dimension_numbers<[1], [0], [0], [1], [0, 0, 1, 1], [], []>} : vector<8x128xbf16>, vector<128x384xbf16>, vector<8x384xf32> -> vector<8x384xf32>
    %240 = vector.extract_strided_slice %236 {offsets = [0, 0], sizes = [8, 128], strides = [1, 1]} : vector<8x384xf32> to vector<8x128xf32>
    %241 = vector.extract_strided_slice %239 {offsets = [0, 0], sizes = [8, 128], strides = [1, 1]} : vector<8x384xf32> to vector<8x128xf32>
    %242 = arith.addf %240, %241 : vector<8x128xf32>
    %243 = arith.negf %242 : vector<8x128xf32>
    %244 = math.exp %243 : vector<8x128xf32>
    %cst_50 = arith.constant 1.000000e+00 : f32
    %245 = vector.broadcast %cst_50 : f32 to vector<8x128xf32>
    %246 = arith.addf %245, %244 : vector<8x128xf32>
    %247 = arith.divf %245, %246 : vector<8x128xf32>
    %248 = vector.extract_strided_slice %236 {offsets = [0, 128], sizes = [8, 128], strides = [1, 1]} : vector<8x384xf32> to vector<8x128xf32>
    %249 = vector.extract_strided_slice %239 {offsets = [0, 128], sizes = [8, 128], strides = [1, 1]} : vector<8x384xf32> to vector<8x128xf32>
    %250 = arith.addf %248, %249 : vector<8x128xf32>
    %251 = arith.negf %250 : vector<8x128xf32>
    %252 = math.exp %251 : vector<8x128xf32>
    %cst_51 = arith.constant 1.000000e+00 : f32
    %253 = vector.broadcast %cst_51 : f32 to vector<8x128xf32>
    %254 = arith.addf %253, %252 : vector<8x128xf32>
    %255 = arith.divf %253, %254 : vector<8x128xf32>
    %256 = vector.extract_strided_slice %236 {offsets = [0, 256], sizes = [8, 128], strides = [1, 1]} : vector<8x384xf32> to vector<8x128xf32>
    %257 = vector.extract_strided_slice %239 {offsets = [0, 256], sizes = [8, 128], strides = [1, 1]} : vector<8x384xf32> to vector<8x128xf32>
    %258 = arith.addf %257, %4 : vector<8x128xf32>
    %259 = arith.mulf %247, %258 : vector<8x128xf32>
    %260 = arith.addf %256, %259 : vector<8x128xf32>
    %261 = math.tanh %260 : vector<8x128xf32>
    %cst_52 = arith.constant 1.000000e+00 : f32
    %262 = vector.broadcast %cst_52 : f32 to vector<8x128xf32>
    %263 = arith.subf %262, %255 : vector<8x128xf32>
    %264 = arith.mulf %263, %261 : vector<8x128xf32>
    %265 = arith.mulf %255, %234 : vector<8x128xf32>
    %266 = arith.addf %264, %265 : vector<8x128xf32>
    %c6_i32 = arith.constant 6 : i32
    %267 = vector.broadcast %c6_i32 : i32 to vector<8x1xi32>
    %268 = arith.cmpi sgt, %0, %267 : vector<8x1xi32>
    %269 = vector.shape_cast %268 : vector<8x1xi1> to vector<8x1xi1>
    %270 = vector.broadcast %269 : vector<8x1xi1> to vector<8x128xi1>
    %271 = arith.select %270, %266, %234 : vector<8x128xi1>, vector<8x128xf32>
    %272 = vector.extract_strided_slice %12 {offsets = [7, 0, 0], sizes = [1, 8, 384], strides = [1, 1, 1]} : vector<8x8x384xf32> to vector<1x8x384xf32>
    %273 = vector.shape_cast %272 : vector<1x8x384xf32> to vector<8x384xf32>
    %274 = arith.truncf %271 : vector<8x128xf32> to vector<8x128xbf16>
    %c0_53 = arith.constant 0 : index
    %c0_54 = arith.constant 0 : index
    %275 = vector.load %arg4[%c0_53, %c0_54] : memref<128x384xbf16, #tpu.memory_space<vmem>>, vector<128x384xbf16>
    %cst_55 = arith.constant dense<0.000000e+00> : vector<8x384xf32>
    %276 = tpu.matmul %274, %275, %cst_55 {dimension_numbers = #tpu.dot_dimension_numbers<[1], [0], [0], [1], [0, 0, 1, 1], [], []>} : vector<8x128xbf16>, vector<128x384xbf16>, vector<8x384xf32> -> vector<8x384xf32>
    %277 = vector.extract_strided_slice %273 {offsets = [0, 0], sizes = [8, 128], strides = [1, 1]} : vector<8x384xf32> to vector<8x128xf32>
    %278 = vector.extract_strided_slice %276 {offsets = [0, 0], sizes = [8, 128], strides = [1, 1]} : vector<8x384xf32> to vector<8x128xf32>
    %279 = arith.addf %277, %278 : vector<8x128xf32>
    %280 = arith.negf %279 : vector<8x128xf32>
    %281 = math.exp %280 : vector<8x128xf32>
    %cst_56 = arith.constant 1.000000e+00 : f32
    %282 = vector.broadcast %cst_56 : f32 to vector<8x128xf32>
    %283 = arith.addf %282, %281 : vector<8x128xf32>
    %284 = arith.divf %282, %283 : vector<8x128xf32>
    %285 = vector.extract_strided_slice %273 {offsets = [0, 128], sizes = [8, 128], strides = [1, 1]} : vector<8x384xf32> to vector<8x128xf32>
    %286 = vector.extract_strided_slice %276 {offsets = [0, 128], sizes = [8, 128], strides = [1, 1]} : vector<8x384xf32> to vector<8x128xf32>
    %287 = arith.addf %285, %286 : vector<8x128xf32>
    %288 = arith.negf %287 : vector<8x128xf32>
    %289 = math.exp %288 : vector<8x128xf32>
    %cst_57 = arith.constant 1.000000e+00 : f32
    %290 = vector.broadcast %cst_57 : f32 to vector<8x128xf32>
    %291 = arith.addf %290, %289 : vector<8x128xf32>
    %292 = arith.divf %290, %291 : vector<8x128xf32>
    %293 = vector.extract_strided_slice %273 {offsets = [0, 256], sizes = [8, 128], strides = [1, 1]} : vector<8x384xf32> to vector<8x128xf32>
    %294 = vector.extract_strided_slice %276 {offsets = [0, 256], sizes = [8, 128], strides = [1, 1]} : vector<8x384xf32> to vector<8x128xf32>
    %295 = arith.addf %294, %4 : vector<8x128xf32>
    %296 = arith.mulf %284, %295 : vector<8x128xf32>
    %297 = arith.addf %293, %296 : vector<8x128xf32>
    %298 = math.tanh %297 : vector<8x128xf32>
    %cst_58 = arith.constant 1.000000e+00 : f32
    %299 = vector.broadcast %cst_58 : f32 to vector<8x128xf32>
    %300 = arith.subf %299, %292 : vector<8x128xf32>
    %301 = arith.mulf %300, %298 : vector<8x128xf32>
    %302 = arith.mulf %292, %271 : vector<8x128xf32>
    %303 = arith.addf %301, %302 : vector<8x128xf32>
    %c7_i32 = arith.constant 7 : i32
    %304 = vector.broadcast %c7_i32 : i32 to vector<8x1xi32>
    %305 = arith.cmpi sgt, %0, %304 : vector<8x1xi32>
    %306 = vector.shape_cast %305 : vector<8x1xi1> to vector<8x1xi1>
    %307 = vector.broadcast %306 : vector<8x1xi1> to vector<8x128xi1>
    %308 = arith.select %307, %303, %271 : vector<8x128xi1>, vector<8x128xf32>
    %309 = arith.truncf %308 : vector<8x128xf32> to vector<8x128xbf16>
    %c0_59 = arith.constant 0 : index
    %c0_60 = arith.constant 0 : index
    %310 = vector.load %arg7[%c0_59, %c0_60] : memref<128x128xbf16, #tpu.memory_space<vmem>>, vector<128x128xbf16>
    %cst_61 = arith.constant dense<0.000000e+00> : vector<8x128xf32>
    %311 = tpu.matmul %309, %310, %cst_61 {dimension_numbers = #tpu.dot_dimension_numbers<[1], [0], [0], [1], [0, 0, 1, 1], [], []>} : vector<8x128xbf16>, vector<128x128xbf16>, vector<8x128xf32> -> vector<8x128xf32>
    %c0_62 = arith.constant 0 : index
    %c0_63 = arith.constant 0 : index
    %312 = vector.load %arg8[%c0_62, %c0_63] : memref<1x128xf32, #tpu.memory_space<vmem>>, vector<1x128xf32>
    %313 = vector.broadcast %312 : vector<1x128xf32> to vector<8x128xf32>
    %314 = arith.addf %311, %313 : vector<8x128xf32>
    %315 = math.tanh %314 : vector<8x128xf32>
    %c0_i32_64 = arith.constant 0 : i32
    %316 = vector.broadcast %c0_i32_64 : i32 to vector<8x1xi32>
    %317 = arith.cmpi sgt, %0, %316 : vector<8x1xi32>
    %cst_65 = arith.constant 0.000000e+00 : f32
    %318 = vector.shape_cast %317 : vector<8x1xi1> to vector<8x1xi1>
    %319 = vector.broadcast %318 : vector<8x1xi1> to vector<8x128xi1>
    %320 = vector.broadcast %cst_65 : f32 to vector<8x128xf32>
    %321 = arith.select %319, %315, %320 : vector<8x128xi1>, vector<8x128xf32>
    %c0_66 = arith.constant 0 : index
    %c0_67 = arith.constant 0 : index
    %322 = vector.load %arg9[%c0_66, %c0_67] : memref<8x128xf32, #tpu.memory_space<vmem>>, vector<8x128xf32>
    tpu.vector_store %arg9[%c0_66, %c0_67], %321 {strides = array<i32>} : memref<8x128xf32, #tpu.memory_space<vmem>>, vector<8x128xf32>,
    return
  }
  func.func @transform_0(%arg0: i32) -> (i32, i32, i32) {
    %c0_i32 = arith.constant 0 : i32
    %c0_i32_0 = arith.constant 0 : i32
    %c0_i32_1 = arith.constant 0 : i32
    return %c0_i32, %arg0, %c0_i32_0 : i32, i32, i32
  }
  func.func @transform_1(%arg0: i32) -> (i32, i32) {
    %c0_i32 = arith.constant 0 : i32
    %c0_i32_0 = arith.constant 0 : i32
    return %arg0, %c0_i32 : i32, i32
  }
  func.func @transform_2(%arg0: i32) -> (i32, i32) {
    %c0_i32 = arith.constant 0 : i32
    %c0_i32_0 = arith.constant 0 : i32
    %c0_i32_1 = arith.constant 0 : i32
    return %c0_i32, %c0_i32_0 : i32, i32
  }
  func.func @transform_3(%arg0: i32) -> (i32, i32) {
    %c0_i32 = arith.constant 0 : i32
    %c0_i32_0 = arith.constant 0 : i32
    %c0_i32_1 = arith.constant 0 : i32
    return %c0_i32, %c0_i32_0 : i32, i32
  }
  func.func @transform_4(%arg0: i32) -> (i32, i32) {
    %c0_i32 = arith.constant 0 : i32
    %c0_i32_0 = arith.constant 0 : i32
    %c0_i32_1 = arith.constant 0 : i32
    return %c0_i32, %c0_i32_0 : i32, i32
  }
  func.func @transform_5(%arg0: i32) -> (i32, i32) {
    %c0_i32 = arith.constant 0 : i32
    %c0_i32_0 = arith.constant 0 : i32
    %c0_i32_1 = arith.constant 0 : i32
    return %c0_i32, %c0_i32_0 : i32, i32
  }
  func.func @transform_6(%arg0: i32) -> (i32, i32) {
    %c0_i32 = arith.constant 0 : i32
    %c0_i32_0 = arith.constant 0 : i32
    %c0_i32_1 = arith.constant 0 : i32
    return %c0_i32, %c0_i32_0 : i32, i32
  }
  func.func @transform_7(%arg0: i32) -> (i32, i32) {
    %c0_i32 = arith.constant 0 : i32
    %c0_i32_0 = arith.constant 0 : i32
    %c0_i32_1 = arith.constant 0 : i32
    return %c0_i32, %c0_i32_0 : i32, i32
  }
  func.func @transform_8(%arg0: i32) -> (i32, i32) {
    %c0_i32 = arith.constant 0 : i32
    %c0_i32_0 = arith.constant 0 : i32
    return %arg0, %c0_i32 : i32, i32
  }
}

</mosaic_0001>

<bundles_post_ra>
// kernel: tpu_custom_call.1
= control target key start
LH: loop header
LB: loop body
LE: loop exit
PB: predicated region body
PF: predicated region fallthrough
CT: control target
= control target key end

     0   :  { %13 = vsyncpa [#allocation3], 0  ;;  %s2899_s0 = inlined_call_operand.hbm [shape: bf16[8,8,128], index: 0, kind: input, shape index: {}]   ;;  %s2900_s1 = inlined_call_operand.vmem [shape: s32[8,1], index: 1, kind: input, shape index: {}]   ;;  %s2901_s2 = inlined_call_operand.hbm [shape: bf16[128,384], index: 2, kind: input, shape index: {}]   ;;  %s2902_s3 = inlined_call_operand.hbm [shape: bf16[128,384], index: 3, kind: input, shape index: {}]   ;;  %s2903_s4 = inlined_call_operand.vmem [shape: f32[1,384], index: 4, kind: input, shape index: {}]   ;;  %s2904_s5 = inlined_call_operand.vmem [shape: f32[1,128], index: 5, kind: input, shape index: {}]   ;;  %s2905_s6 = inlined_call_operand.hbm [shape: bf16[128,128], index: 6, kind: input, shape index: {}]   ;;  %s2906_s7 = inlined_call_operand.vmem [shape: f32[1,128], index: 7, kind: input, shape index: {}]   ;;  %s2907_s8 = inlined_call_operand.hbm [shape: f32[8,128], index: 8, kind: output, shape index: {}]  }
   0x1   :  { %14 = vsyncpa [#allocation6], 0 }
   0x2   :  { %15 = vsyncpa [#allocation9], 0 }
   0x3   :  { %16 = vsyncpa [#allocation4], 0  ;;  %s2305_s27 = smov [#allocation5]  }
   0x4   :  { %s36_s28 = sshll.u32 %s2305_s27, 4  ;;  %s37_s28 = int_to_ptr.vmem [resolvable:$true] %s36_s28 }
   0x5   :  { %s2205_s29 = scalar_lea.vmem %s37_s28, 3072  ;;  %p2210_p1 = scmp.lt.s32.totalorder %s37_s28, %s37_s28 }
   0x6   :  { %p2206_p0 = scmp.ne.s32.totalorder %s37_s28, %s2205_s29  ;;  %p2211_p2 = scmp.lt.s32.totalorder %s2205_s29, %s2205_s29 }
   0x8   :  { %p2212_p3 = por %p2211_p2, %p2210_p1 }
   0xa   :  { %p2213_p4 = pnand %p2212_p3, %p2206_p0 }
   0xc   :  { %2216 = shalt.err (!%p2213_p4)
}
   0xd   :  { %s2306_s30 = smov 192   ;;  %s2307_s9 = smov 12  }
   0xe   :  { %42 = dma.hbm_to_vmem [thread:$0]  %s2901_s2, 3072, %s37_s28, [#allocation6], %s2306_s30, %s2306_s30, %s2307_s9  }
   0xf   :  { %s2308_s12 = smov [#allocation2]  }
  0x10   :  { %s22_s13 = sshll.u32 %s2308_s12, 4  ;;  %s23_s13 = int_to_ptr.vmem [resolvable:$true] %s22_s13 }
  0x11   :  { %s2225_s14 = scalar_lea.vmem %s23_s13, 512  ;;  %p2230_p6 = scmp.lt.s32.totalorder %s23_s13, %s23_s13 }
  0x12   :  { %p2226_p5 = scmp.ne.s32.totalorder %s23_s13, %s2225_s14  ;;  %p2231_p7 = scmp.lt.s32.totalorder %s2225_s14, %s2225_s14 }
  0x14   :  { %p2232_p8 = por %p2231_p7, %p2230_p6 }
  0x16   :  { %p2233_p9 = pnand %p2232_p8, %p2226_p5 }
  0x18   :  { %2236 = shalt.err (!%p2233_p9)
}
  0x19   :  { %s2309_s15 = smov 64   ;;  %s2310_s16 = smov 4  }
  0x1a   :  { %28 = dma.hbm_to_vmem [thread:$0]  %s2899_s0, 512, %s23_s13, [#allocation3], %s2309_s15, %s2309_s15, %s2310_s16  }
  0x1b   :  { %s2311_s19 = smov [#allocation7]   ;;  %s2312_s21 = smov [#allocation8]  }
  0x1c   :  { %s48_s20 = sshll.u32 %s2311_s19, 4  ;;  %s64_s2 = sshll.u32 %s2312_s21, 4  ;;  %s49_s20 = int_to_ptr.vmem [resolvable:$true] %s48_s20  ;;  %s65_s2 = int_to_ptr.vmem [resolvable:$true] %s64_s2 }
  0x1d   :  { %s2245_s22 = scalar_lea.vmem %s49_s20, 3072  ;;  %p2250_p11 = scmp.lt.s32.totalorder %s49_s20, %s49_s20 }
  0x1e   :  { %p2246_p10 = scmp.ne.s32.totalorder %s49_s20, %s2245_s22  ;;  %p2251_p12 = scmp.lt.s32.totalorder %s2245_s22, %s2245_s22 }
  0x20   :  { %p2252_p13 = por %p2251_p12, %p2250_p11 }
  0x22   :  { %p2253_p0 = pnand %p2252_p13, %p2246_p10 }
  0x24   :  { %2256 = shalt.err (!%p2253_p0)
}
  0x25   :  { %54 = dma.hbm_to_vmem [thread:$0]  %s2902_s3, 3072, %s49_s20, [#allocation6], %s2306_s30, %s2306_s30, %s2307_s9  }
  0x26   :  { %s2265_s0 = scalar_lea.vmem %s65_s2, 1024  ;;  %p2270_p2 = scmp.lt.s32.totalorder %s65_s2, %s65_s2 }
  0x27   :  { %p2266_p1 = scmp.ne.s32.totalorder %s65_s2, %s2265_s0  ;;  %p2271_p3 = scmp.lt.s32.totalorder %s2265_s0, %s2265_s0 }
  0x29   :  { %p2272_p4 = por %p2271_p3, %p2270_p2 }
  0x2b   :  { %p2273_p5 = pnand %p2272_p4, %p2266_p1 }
  0x2d   :  { %2276 = shalt.err (!%p2273_p5)
}
  0x2e   :  { %70 = dma.hbm_to_vmem [thread:$0]  %s2905_s6, 1024, %s65_s2, [#allocation9], %s2309_s15, %s2309_s15, %s2310_s16  }
  0x2f   :  { %2297 = dma.done.wait [#allocation3], 512  }
  0x30   :  { %2298 = vsyncadd [#allocation3], 4294966784 }
  0x31   :  { %2299 = dma.done.wait [#allocation6], 6144  }
  0x32   :  { %2300 = vsyncadd [#allocation6], 4294961152 }
  0x33   :  { %2301 = dma.done.wait [#allocation9], 1024  }
  0x34   :  { %2302 = vsyncadd [#allocation9], 4294966272  ;;  %v2908_v0 = vmov 0   ;;  %v2015_v1 = vld [vmem:[#allocation5 + $0xac] ss:$12 sps:$4 sm:$0xff]   ;;  %v2041_v12 = vld [vmem:[#allocation2] sm:$0xff]   ;;  %v136_v59 = vlaneseq }
  0x35   :  { %335 = vmatprep.mubr.bf16.mxu0 %v2908_v0  ;;  %2013 = vset.pattern.permute.xlu0 %v2908_v0  ;;  %v2017_v2 = vld [vmem:[#allocation5 + $0xa8] ss:$12 sps:$4 sm:$0xff]   ;;  %v2020_v4 = vld [vmem:[#allocation5 + $0x90] ss:$12 sps:$4 sm:$0xff]   ;;  %v2023_v6 = vld [vmem:[#allocation5 + $0x78] ss:$12 sps:$4 sm:$0xff]  }
  0x36   :  { %2014 = vset.pattern.permute.xlu1 %v2908_v0  ;;  %303 = vmatprep.subr.bf16.mxu0 %v2015_v1  ;;  %v2018_v3 = vld [vmem:[#allocation5 + $0x94] ss:$12 sps:$4 sm:$0xff]   ;;  %v2021_v5 = vld [vmem:[#allocation5 + $0x7c] ss:$12 sps:$4 sm:$0xff]   ;;  %v2024_v7 = vld [vmem:[#allocation5 + $0x64] ss:$12 sps:$4 sm:$0xff]  }
  0x37   :  { %304 = vmatpush1.bf16.msra.mxu0 %v2017_v2  ;;  %v2036_v8 = vld [vmem:[#allocation5 + $0xb0] ss:$12 sps:$4 sm:$0xff]   ;;  %v2026_v9 = vld [vmem:[#allocation5 + $0x60] ss:$12 sps:$4 sm:$0xff]   ;;  %v2040_v11 = vld [vmem:[#allocation5 + $0x98] ss:$12 sps:$4 sm:$0xff]   ;;  %1813 = vmatprep.mubr.bf16.mxu1 %v2041_v12 }
  0x38   :  { %305 = vmatprep.subr.bf16.mxu0 %v2018_v3  ;;  %v2027_v10 = vld [vmem:[#allocation5 + $0x4c] ss:$12 sps:$4 sm:$0xff]   ;;  %1797 = vmatprep.subr.bf16.mxu1 %v2036_v8  ;;  %v2029_v13 = vld [vmem:[#allocation5 + $0x48] ss:$12 sps:$4 sm:$0xff]   ;;  %v2032_v17 = vld [vmem:[#allocation5 + $0x30] ss:$12 sps:$4 sm:$0xff]  }
  0x39   :  { %1798 = vmatpush3.bf16.msra.mxu1 %v2036_v8  ;;  %v2045_v14 = vld [vmem:[#allocation5 + $0x80] ss:$12 sps:$4 sm:$0xff]   ;;  %v2049_v16 = vld [vmem:[#allocation5 + $0x68] ss:$12 sps:$4 sm:$0xff]   ;;  %v2054_v19 = vld [vmem:[#allocation5 + $0x50] ss:$12 sps:$4 sm:$0xff]  }
  0x3a   :  { %1799 = vmatprep.subr.bf16.mxu1 %v2040_v11  ;;  %v2030_v15 = vld [vmem:[#allocation5 + $0x34] ss:$12 sps:$4 sm:$0xff]   ;;  %v2033_v18 = vld [vmem:[#allocation5 + $0x1c] ss:$12 sps:$4 sm:$0xff]   ;;  %v2035_v20 = vld [vmem:[#allocation5 + $0x18] ss:$12 sps:$4 sm:$0xff]  }
  0x3b   :  { %306 = vmatpush1.bf16.msra.mxu0 %v2020_v4  ;;  %v2037_v21 = vld [vmem:[#allocation5 + $0x4] ss:$12 sps:$4 sm:$0xff]   ;;  %v2039_v23 = vld [vmem:[#allocation5] ss:$12 sps:$4 sm:$0xff]   ;;  %v2385_v26 = vld [vmem:[#allocation7 + $0xa8] ss:$12 sps:$4 sm:$0xff]  }
  0x3c   :  { %307 = vmatprep.subr.bf16.mxu0 %v2021_v5  ;;  %v2058_v22 = vld [vmem:[#allocation5 + $0x38] ss:$12 sps:$4 sm:$0xff]   ;;  %v2063_v25 = vld [vmem:[#allocation5 + $0x20] ss:$12 sps:$4 sm:$0xff]   ;;  %v2067_v28 = vld [vmem:[#allocation5 + $0x8] ss:$12 sps:$4 sm:$0xff]  }
  0x3d   :  { %1800 = vmatpush3.bf16.msra.mxu1 %v2040_v11  ;;  %v2383_v24 = vld [vmem:[#allocation7 + $0xac] ss:$12 sps:$4 sm:$0xff]   ;;  %v2388_v27 = vld [vmem:[#allocation7 + $0x94] ss:$12 sps:$4 sm:$0xff]   ;;  %v2391_v29 = vld [vmem:[#allocation7 + $0x90] ss:$12 sps:$4 sm:$0xff]  }
  0x3e   :  { %1801 = vmatprep.subr.bf16.mxu1 %v2045_v14  ;;  %v2395_v30 = vld [vmem:[#allocation7 + $0x7c] ss:$12 sps:$4 sm:$0xff]   ;;  %v2398_v32 = vld [vmem:[#allocation7 + $0x78] ss:$12 sps:$4 sm:$0xff]   ;;  %v2403_v34 = vld [vmem:[#allocation7 + $0x60] ss:$12 sps:$4 sm:$0xff]  }
  0x3f   :  { %308 = vmatpush1.bf16.msra.mxu0 %v2023_v6  ;;  %v2050_v31 = vld [vmem:[#allocation2 + $0x8] sm:$0xff]   ;;  %v2401_v33 = vld [vmem:[#allocation7 + $0x64] ss:$12 sps:$4 sm:$0xff]   ;;  %v2910_v38 = vmov 0.0   ;;  %v2425_v43 = vld [vmem:[#allocation7 + $0x34] ss:$12 sps:$4 sm:$0xff]  }
  0x40   :  { %309 = vmatprep.subr.bf16.mxu0 %v2024_v7  ;;  %v2405_v35 = vld [vmem:[#allocation7 + $0xb0] ss:$12 sps:$4 sm:$0xff]   ;;  %v2410_v36 = vld [vmem:[%s2900_s1] sm:$0xff]  ;;  %v2412_v37 = vld [vmem:[#allocation7 + $0x4c] ss:$12 sps:$4 sm:$0xff]   ;;  %vm2315_vm2 = vmmov 0  }
  0x41   :  { %1802 = vmatpush3.bf16.msra.mxu1 %v2045_v14  ;;  %vm704_vm0 = vcmp.gt.s32.totalorder %v2410_v36, 0  ;;  %v2059_v39 = vld [vmem:[#allocation2 + $0x10] sm:$0xff]   ;;  %v2418_v40 = vld [vmem:[#allocation7 + $0x98] ss:$12 sps:$4 sm:$0xff]   ;;  %vm815_vm1 = vcmp.gt.s32.totalorder %v2410_v36, 1  ;;  %vm1148_vm3 = vcmp.gt.s32.totalorder %v2410_v36, 4 }
  0x42   :  { %1803 = vmatprep.subr.bf16.mxu1 %v2049_v16  ;;  %v705_v41 = vsel %vm704_vm0, 1, %v2908_v0  ;;  %v2422_v42 = vld [vmem:[#allocation7 + $0x48] ss:$12 sps:$4 sm:$0xff]   ;;  %v2432_v44 = vld [vmem:[#allocation7 + $0x80] ss:$12 sps:$4 sm:$0xff]   ;;  %v2068_v45 = vld [vmem:[#allocation2 + $0x18] sm:$0xff]  }
  0x43   :  { %310 = vmatpush1.bf16.msra.mxu0 %v2026_v9  ;;  %707 = vperm.xlu0 %2013, %v705_v41   ;;  %v2436_v46 = vld [vmem:[#allocation7 + $0x30] ss:$12 sps:$4 sm:$0xff]   ;;  %v816_v47 = vsel %vm815_vm1, 1, %v2908_v0  ;;  %v2444_v49 = vld [vmem:[#allocation7 + $0x68] ss:$12 sps:$4 sm:$0xff]   ;;  %v1149_v53 = vsel %vm1148_vm3, 1, %v2908_v0 }
  0x44   :  { %311 = vmatprep.subr.bf16.mxu0 %v2027_v10  ;;  %v2441_v48 = vld [vmem:[#allocation7 + $0x1c] ss:$12 sps:$4 sm:$0xff]   ;;  %v2451_v50 = vld [vmem:[#allocation7 + $0x18] ss:$12 sps:$4 sm:$0xff]   ;;  %vm1370_vm4 = vcmp.gt.s32.totalorder %v2410_v36, 6  ;;  %v137_v60 = vshrl.u32 %v136_v59, 7 }
  0x45   :  { %1804 = vmatpush3.bf16.msra.mxu1 %v2049_v16  ;;  %v2454_v51 = vld [vmem:[#allocation7 + $0x4] ss:$12 sps:$4 sm:$0xff]   ;;  %v2463_v54 = vld [vmem:[#allocation7] ss:$12 sps:$4 sm:$0xff]   ;;  %v1371_v56 = vsel %vm1370_vm4, 1, %v2908_v0  ;;  %vm926_vm7 = vcmp.gt.s32.totalorder %v2410_v36, 2 }
  0x46   :  { %1805 = vmatprep.subr.bf16.mxu1 %v2054_v19  ;;  %v2457_v52 = vld [vmem:[#allocation7 + $0x50] ss:$12 sps:$4 sm:$0xff]   ;;  %v2468_v55 = vld [vmem:[#allocation7 + $0x38] ss:$12 sps:$4 sm:$0xff]   ;;  %v2475_v57 = vld [vmem:[#allocation7 + $0x20] ss:$12 sps:$4 sm:$0xff]  }
  0x47   :  { %312 = vmatpush1.bf16.msra.mxu0 %v2029_v13  ;;  %818 = vperm.xlu0 %2013, %v816_v47   ;;  %v2483_v58 = vld [vmem:[#allocation7 + $0x8] ss:$12 sps:$4 sm:$0xff]   ;;  %v138_v61 = vsub.s32 0, %v137_v60  ;;  %v87_v62 = vld [vmem:[%s2903_s4] sm:$0x7]  ;;  %v142_v1 = vsub.s32 1, %v137_v60 }
  0x48   :  { %313 = vmatprep.subr.bf16.mxu0 %v2030_v15  ;;  %v146_v4 = vsub.s32 2, %v137_v60  ;;  %vm1037_vm8 = vcmp.gt.s32.totalorder %v2410_v36, 3  ;;  %vm1259_vm9 = vcmp.gt.s32.totalorder %v2410_v36, 5  ;;  %vm1481_vm10 = vcmp.gt.s32.totalorder %v2410_v36, 7  ;;  %s2316_s30 = smov [#allocation10]  }
  0x49   :  { %1806 = vmatpush3.bf16.msra.mxu1 %v2054_v19  ;;  %v139_v3 = vrot.slane %v87_v62, %v138_v61  ;;  %v143_v6 = vrot.slane %v87_v62, %v142_v1  ;;  %s1609_s9 = sshll.u32 %s2316_s30, 4  ;;  %s1610_s9 = int_to_ptr.vmem [resolvable:$true] %s1609_s9 }
  0x4a   :  { %1807 = vmatprep.subr.bf16.mxu1 %v2058_v22  ;;  %v2528_v10 = vrot.slane %v87_v62, %v146_v4  ;;  %s2277_s10 = scalar_lea.vmem %s1610_s9, 128  ;;  %p2282_p7 = scmp.lt.s32.totalorder %s1610_s9, %s1610_s9 }
  0x4b   :  { %314 = vmatpush1.bf16.msra.mxu0 %v2032_v17  ;;  %1151 = vperm.xlu0 %2013, %v1149_v53   ;;  %p2278_p6 = scmp.ne.s32.totalorder %s1610_s9, %s2277_s10  ;;  %p2283_p8 = scmp.lt.s32.totalorder %s2277_s10, %s2277_s10 }
  0x4c   :  { %315 = vmatprep.subr.bf16.mxu0 %v2033_v18 }
  0x4d   :  { %1808 = vmatpush3.bf16.msra.mxu1 %v2058_v22  ;;  %p2284_p9 = por %p2283_p8, %p2282_p7 }
  0x4e   :  { %1809 = vmatprep.subr.bf16.mxu1 %v2063_v25 }
  0x4f   :  { %316 = vmatpush1.bf16.msra.mxu0 %v2035_v20  ;;  %1373 = vperm.xlu0 %2013, %v1371_v56   ;;  %p2285_p10 = pnand %p2284_p9, %p2278_p6 }
  0x50   :  { %317 = vmatprep.subr.bf16.mxu0 %v2037_v21 }
  0x51   :  { %1810 = vmatpush3.bf16.msra.mxu1 %v2063_v25 }
  0x52   :  { %1811 = vmatprep.subr.bf16.mxu1 %v2067_v28 }
  0x53   :  { %318 = vmatpush1.bf16.msra.mxu0 %v2039_v23 }
  0x54   :  { %601 = vmatprep.subr.bf16.mxu0 %v2383_v24 }
  0x55   :  { %1812 = vmatpush3.bf16.msra.mxu1 %v2067_v28 }
  0x56   :  { %336 = vmatmul.mubr.bf16.vlgmr.msra.gmra.mxu0 %v2041_v12  ;;  %1821 = vmatprep.subr.bf16.mxu1 %v2910_v38 }
  0x57   :  { %602 = vmatpush1.bf16.msra.mxu0 %v2385_v26  ;;  %345 = vmatprep.mubr.bf16.mxu0 %v2908_v0 }
  0x58   :  { %603 = vmatprep.subr.bf16.mxu0 %v2388_v27  ;;  %1814 = vmatmul.mubr.bf16.vlgmr.msra.gmra.mxu1 %v2050_v31 }
  0x59   :  { %1822 = vmatpush3.bf16.msra.mxu1 %v2405_v35  ;;  %1817 = vmatprep.mubr.bf16.mxu1 %v2059_v39 }
  0x5a   :  { %1823 = vmatprep.subr.bf16.mxu1 %v2910_v38 }
  0x5b   :  { %604 = vmatpush1.bf16.msra.mxu0 %v2391_v29 }
  0x5c   :  { %605 = vmatprep.subr.bf16.mxu0 %v2395_v30 }
  0x5d   :  { %1824 = vmatpush3.bf16.msra.mxu1 %v2418_v40 }
  0x5e   :  { %346 = vmatmul.mubr.bf16.gmra.mxu0 %v2050_v31  ;;  %1825 = vmatprep.subr.bf16.mxu1 %v2910_v38 }
  0x5f   :  { %606 = vmatpush1.bf16.msra.mxu0 %v2398_v32  ;;  %355 = vmatprep.mubr.bf16.mxu0 %v2908_v0 }
  0x60   :  { %607 = vmatprep.subr.bf16.mxu0 %v2401_v33  ;;  %1818 = vmatmul.mubr.bf16.gmra.mxu1 %v2068_v45 }
  0x61   :  { %1826 = vmatpush3.bf16.msra.mxu1 %v2432_v44  ;;  %1837 = vmatprep.mubr.msk.bf16.mxu1 %vm2315_vm2, %v2910_v38 }
  0x62   :  { %1827 = vmatprep.subr.bf16.mxu1 %v2910_v38 }
  0x63   :  { %608 = vmatpush1.bf16.msra.mxu0 %v2403_v34 }
  0x64   :  { %609 = vmatprep.subr.bf16.mxu0 %v2412_v37 }
  0x65   :  { %1828 = vmatpush3.bf16.msra.mxu1 %v2444_v49 }
  0x66   :  { %356 = vmatmul.mubr.bf16.gmra.mxu0 %v2059_v39  ;;  %1829 = vmatprep.subr.bf16.mxu1 %v2910_v38 }
  0x67   :  { %610 = vmatpush1.bf16.msra.mxu0 %v2422_v42  ;;  %365 = vmatprep.mubr.bf16.mxu0 %v2908_v0 }
  0x68   :  { %611 = vmatprep.subr.bf16.mxu0 %v2425_v43 }
  0x69   :  { %1830 = vmatpush3.bf16.msra.mxu1 %v2457_v52 }
  0x6a   :  { %1831 = vmatprep.subr.bf16.mxu1 %v2910_v38 }
  0x6b   :  { %612 = vmatpush1.bf16.msra.mxu0 %v2436_v46 }
  0x6c   :  { %613 = vmatprep.subr.bf16.mxu0 %v2441_v48 }
  0x6d   :  { %1832 = vmatpush3.bf16.msra.mxu1 %v2468_v55 }
  0x6e   :  { %366 = vmatmul.mubr.bf16.gmra.mxu0 %v2068_v45  ;;  %1833 = vmatprep.subr.bf16.mxu1 %v2910_v38 }
  0x6f   :  { %614 = vmatpush1.bf16.msra.mxu0 %v2451_v50  ;;  %633 = vmatprep.mubr.bf16.mxu0 %v2908_v0 }
  0x70   :  { %615 = vmatprep.subr.bf16.mxu0 %v2454_v51 }
  0x71   :  { %1834 = vmatpush3.bf16.msra.mxu1 %v2475_v57 }
  0x72   :  { %1835 = vmatprep.subr.bf16.mxu1 %v2910_v38 }
  0x73   :  { %616 = vmatpush1.bf16.msra.mxu0 %v2463_v54 }
  0x74   :  { %712 = vmatprep.subr.bf16.mxu0 %v2383_v24 }
  0x75   :  { %1836 = vmatpush3.bf16.msra.mxu1 %v2483_v58 }
  0x76   :  { %634 = vmatmul.mubr.bf16.vlgmr.msra.gmra.mxu0 %v2908_v0  ;;  %1841 = vmatprep.subr.bf16.mxu1 %v2910_v38 }
  0x77   :  { %713 = vmatpush1.bf16.msra.mxu0 %v2385_v26  ;;  %744 = vmatprep.mubr.bf16.mxu0 %v2908_v0 }
  0x78   :  { %714 = vmatprep.subr.bf16.mxu0 %v2388_v27  ;;  %1838 = vmatmul.mubr.bf16.vlgmr.msra.gmra.mxu1 %v2908_v0 }
  0x79   :  { %1842 = vmatpush3.bf16.msra.mxu1 %v2405_v35  ;;  %1857 = vmatprep.mubr.msk.bf16.mxu1 %vm2315_vm2, %v2910_v38 }
  0x7a   :  { %1843 = vmatprep.subr.bf16.mxu1 %v2910_v38 }
  0x7b   :  { %715 = vmatpush1.bf16.msra.mxu0 %v2391_v29 }
  0x7c   :  { %716 = vmatprep.subr.bf16.mxu0 %v2395_v30 }
  0x7d   :  { %1844 = vmatpush3.bf16.msra.mxu1 %v2418_v40 }
  0x7e   :  { %1845 = vmatprep.subr.bf16.mxu1 %v2910_v38 }
  0x7f   :  { %717 = vmatpush1.bf16.msra.mxu0 %v2398_v32 }
  0x80   :  { %718 = vmatprep.subr.bf16.mxu0 %v2401_v33 }
  0x81   :  { %1846 = vmatpush3.bf16.msra.mxu1 %v2432_v44 }
  0x82   :  { %1847 = vmatprep.subr.bf16.mxu1 %v2910_v38 }
  0x83   :  { %719 = vmatpush1.bf16.msra.mxu0 %v2403_v34 }
  0x84   :  { %720 = vmatprep.subr.bf16.mxu0 %v2412_v37 }
  0x85   :  { %1848 = vmatpush3.bf16.msra.mxu1 %v2444_v49 }
  0x86   :  { %1849 = vmatprep.subr.bf16.mxu1 %v2910_v38 }
  0x87   :  { %721 = vmatpush1.bf16.msra.mxu0 %v2422_v42 }
  0x88   :  { %722 = vmatprep.subr.bf16.mxu0 %v2425_v43 }
  0x89   :  { %1850 = vmatpush3.bf16.msra.mxu1 %v2457_v52 }
  0x8a   :  { %1851 = vmatprep.subr.bf16.mxu1 %v2910_v38 }
  0x8b   :  { %723 = vmatpush1.bf16.msra.mxu0 %v2436_v46 }
  0x8c   :  { %724 = vmatprep.subr.bf16.mxu0 %v2441_v48 }
  0x8d   :  { %1852 = vmatpush3.bf16.msra.mxu1 %v2468_v55 }
  0x8e   :  { %1853 = vmatprep.subr.bf16.mxu1 %v2910_v38 }
  0x8f   :  { %725 = vmatpush1.bf16.msra.mxu0 %v2451_v50 }
  0x90   :  { %726 = vmatprep.subr.bf16.mxu0 %v2454_v51 }
  0x91   :  { %1854 = vmatpush3.bf16.msra.mxu1 %v2475_v57 }
  0x92   :  { %1855 = vmatprep.subr.bf16.mxu1 %v2910_v38 }
  0x93   :  { %727 = vmatpush1.bf16.msra.mxu0 %v2463_v54 }
  0x94   :  { %823 = vmatprep.subr.bf16.mxu0 %v2383_v24 }
  0x95   :  { %1856 = vmatpush3.bf16.msra.mxu1 %v2483_v58 }
  0x96   :  { %1861 = vmatprep.subr.bf16.mxu1 %v2910_v38 }
 0x116   :  { %v337_v63 = vpop.f32.mrf.mxu0 }
 0x118   :  { %v339_v2 = vpop.f32.mrf.mxu0  ;;  %v1815_v14 = vpop.f32.mrf.mxu1 }
 0x119   :  { %v2535_v16 = vadd.f32 %v1815_v14, %v2528_v10 }
 0x11a   :  { %v341_v5 = vpop.f32.mrf.mxu0  ;;  %v410_v18 = vpop.f32.mrf.mxu1 }
 0x11b   :  { %v2524_v7 = vadd.f32 %v341_v5, %v139_v3 }
 0x11c   :  { %v343_v8 = vpop.f32.mrf.mxu0  ;;  %v1816_v21 = vpop.f32.mrf.mxu1 }
 0x11d   :  { %v2526_v9 = vadd.f32 %v343_v8, %v143_v6  ;;  %v2542_v23 = vadd.f32 %v1816_v21, %v2528_v10 }
 0x11e   :  { %v347_v11 = vpop.f32.mrf.mxu0  ;;  %v413_v28 = vpop.f32.mrf.mxu1 }
 0x11f   :  { %v2530_v12 = vadd.f32 %v347_v11, %v139_v3  ;;  %v2547_v39 = vadd.f32 %v413_v28, %v2528_v10 }
 0x120   :  { %v349_v13 = vpop.f32.mrf.mxu0  ;;  %v1819_v45 = vpop.f32.mrf.mxu1 }
 0x121   :  { %v2532_v15 = vadd.f32 %v349_v13, %v143_v6  ;;  %v2552_v53 = vadd.f32 %v1819_v45, %v2528_v10 }
 0x122   :  { %v351_v17 = vpop.f32.mrf.mxu0  ;;  %v426_v59 = vpop.f32.mrf.mxu1 }
 0x123   :  { %v2537_v19 = vadd.f32 %v351_v17, %v139_v3  ;;  %2912 = vst [vmem:[#allocation15_spill] sm:$0xff] %v2552_v53  ;;  %v2557_v61 = vadd.f32 %v426_v59, %v2528_v10 }
 0x124   :  { %v353_v20 = vpop.f32.mrf.mxu0  ;;  %v1820_v1 = vpop.f32.mrf.mxu1 }
 0x125   :  { %v2539_v22 = vadd.f32 %v353_v20, %v143_v6  ;;  %v2562_v5 = vadd.f32 %v1820_v1, %v2528_v10 }
 0x126   :  { %v357_v25 = vpop.f32.mrf.mxu0  ;;  %v429_v11 = vpop.f32.mrf.mxu1 }
 0x127   :  { %v2544_v31 = vadd.f32 %v357_v25, %v139_v3  ;;  %2913 = vst [vmem:[#allocation16_spill] sm:$0xff] %v2562_v5  ;;  %v2567_v14 = vadd.f32 %v429_v11, %v2528_v10 }
 0x128   :  { %v359_v41 = vpop.f32.mrf.mxu0 }
 0x129   :  { %v2549_v47 = vadd.f32 %v359_v41, %v143_v6  ;;  %v338_v41 = vadd.f32 %v337_v63, %v139_v3 }
 0x12a   :  { %v361_v56 = vpop.f32.mrf.mxu0 }
 0x12b   :  { %v2554_v60 = vadd.f32 %v361_v56, %v139_v3 }
 0x12c   :  { %v363_v62 = vpop.f32.mrf.mxu0 }
 0x12d   :  { %v2559_v4 = vadd.f32 %v363_v62, %v143_v6 }
 0x12e   :  { %v367_v8 = vpop.f32.mrf.mxu0 }
 0x12f   :  { %v2564_v13 = vadd.f32 %v367_v8, %v139_v3  ;;  %v340_v8 = vadd.f32 %v339_v2, %v143_v6 }
 0x130   :  { %v369_v17 = vpop.f32.mrf.mxu0 }
 0x131   :  { %2914 = vst [vmem:[#allocation17_spill] sm:$0xff] %v2564_v13  ;;  %v2569_v20 = vadd.f32 %v369_v17, %v143_v6 }
 0x132   :  { %v371_v21 = vpop.f32.mrf.mxu0 }
 0x133   :  { %2915 = vst [vmem:[#allocation18_spill] sm:$0xff] %v2569_v20  ;;  %v2571_v25 = vadd.f32 %v371_v21, %v139_v3  ;;  %v2578_v3 = vld [vmem:[%s2904_s5] ss:$0 sm:$0xff] }
 0x134   :  { %v373_v28 = vpop.f32.mrf.mxu0 }
 0x135   :  { %2916 = vst [vmem:[#allocation19_spill] sm:$0xff] %v2571_v25  ;;  %v2573_v45 = vadd.f32 %v373_v28, %v143_v6  ;;  %v411_v6 = vadd.f32 %v410_v18, %v2528_v10  ;;  %v2917_v18 = vmov 0.0  }
 0x136   :  { %v635_v56 = vpop.f32.mrf.mxu0 }
 0x137   :  { %v682_v59 = vadd.f32 %v635_v56, %v338_v41 }
 0x138   :  { %v637_v62 = vpop.f32.mrf.mxu0  ;;  %v676_v5 = vpop.f32.mrf.mxu1 }
 0x139   :  { %v1673_v1 = vmul.f32 -1.442695, %v682_v59  ;;  %v689_v11 = vadd.f32 %v637_v62, %v340_v8  ;;  %v696_v2 = vadd.f32 %v2578_v3, %v676_v5  ;;  %v2918_v5 = vmov 0  }
 0x13a   :  { %v639_v0 = vpop.f32.mrf.mxu0  ;;  %v1839_v17 = vpop.f32.mrf.mxu1  ;;  %v1038_v8 = vsel %vm1037_vm8, 1, %v2918_v5 }
 0x13b   :  { %2091 = vpow2.f32 %v1673_v1  ;;  %v1674_v53 = vmul.f32 -1.442695, %v689_v11  ;;  %v927_v1 = vsel %vm926_vm7, 1, %v2918_v5  ;;  %v1260_v11 = vsel %vm1259_vm9, 1, %v2918_v5 }
 0x13c   :  { %v640_v38 = vpop.f32.mrf.mxu0  ;;  %v679_v20 = vpop.f32.mrf.mxu1  ;;  %929 = vperm.xlu1 %2014, %v927_v1   ;;  %v1482_v17 = vsel %vm1481_vm10, 1, %v2918_v5 }
 0x13d   :  { %2093 = vpow2.f32 %v1674_v53 }
 0x13e   :  { %v1840_v21 = vpop.f32.mrf.mxu1 }
 0x140   :  { %1040 = vperm.xlu1 %2014, %v1038_v8  }
 0x144   :  { %1262 = vperm.xlu1 %2014, %v1260_v11  }
 0x148   :  { %v2092_v25 = vpop.eup %2091  ;;  %1484 = vperm.xlu1 %2014, %v1482_v17  }
 0x149   :  { %v686_v13 = vadd.f32 1.0, %v2092_v25 }
 0x14a   :  { %v2094_v63 = vpop.eup %2093 }
 0x14b   :  { %2095 = vrcp.f32 %v686_v13  ;;  %v693_v0 = vadd.f32 1.0, %v2094_v63  ;;  %v2582_v13 = vpop.permute.xlu0 %707 }
 0x14c   :  { %vm709_vm5 = vcmp.eq.s32.totalorder %v2582_v13, 1 }
 0x14d   :  { %2097 = vrcp.f32 %v693_v0  ;;  %vm1675_vm6 = vmpackc.low %vm709_vm5, %vm709_vm5 }
 0x158   :  { %v2096_v38 = vpop.eup %2095 }
 0x159   :  { %v697_v28 = vmul.f32 %v2096_v38, %v696_v2 }
 0x15a   :  { %v2098_v53 = vpop.eup %2097 }
 0x15b   :  { %v698_v20 = vadd.f32 %v697_v28, %v411_v6  ;;  %v700_v41 = vsub.f32 1.0, %v2098_v53  ;;  %v702_v59 = vmul.f32 0.0, %v2098_v53 }
 0x15d   :  { %2099 = vtanh.f32 %v698_v20 }
 0x16a   :  { %v2100_v25 = vpop.eup %2099 }
 0x16b   :  { %v701_v56 = vmul.f32 %v2100_v25, %v700_v41 }
 0x16d   :  { %v2585_v62 = vadd.f32 %v702_v59, %v701_v56 }
 0x16f   :  { %v1676_v10 = vpack.c.bf16 %v2585_v62, %v2585_v62 }
 0x171   :  { %1677 = vmatmul.mubr.msk.bf16.vlgmr.msra.gmra.mxu0 %vm1675_vm6, %v1676_v10  ;;  %1858 = vmatmul.mubr.msk.bf16.vlgmr.msra.gmra.mxu1 %vm1675_vm6, %v1676_v10 }
 0x172   :  { %824 = vmatpush1.bf16.msra.mxu0 %v2385_v26  ;;  %1862 = vmatpush3.bf16.msra.mxu1 %v2405_v35 }
 0x173   :  { %825 = vmatprep.subr.bf16.mxu0 %v2388_v27  ;;  %1863 = vmatprep.subr.bf16.mxu1 %v2917_v18 }
 0x174   :  { %855 = vmatprep.mubr.bf16.mxu0 %v2918_v5  ;;  %1877 = vmatprep.mubr.msk.bf16.mxu1 %vm2315_vm2, %v2917_v18 }
 0x176   :  { %826 = vmatpush1.bf16.msra.mxu0 %v2391_v29  ;;  %1864 = vmatpush3.bf16.msra.mxu1 %v2418_v40 }
 0x177   :  { %827 = vmatprep.subr.bf16.mxu0 %v2395_v30  ;;  %1865 = vmatprep.subr.bf16.mxu1 %v2917_v18 }
 0x17a   :  { %828 = vmatpush1.bf16.msra.mxu0 %v2398_v32  ;;  %1866 = vmatpush3.bf16.msra.mxu1 %v2432_v44 }
 0x17b   :  { %829 = vmatprep.subr.bf16.mxu0 %v2401_v33  ;;  %1867 = vmatprep.subr.bf16.mxu1 %v2917_v18 }
 0x17e   :  { %830 = vmatpush1.bf16.msra.mxu0 %v2403_v34  ;;  %1868 = vmatpush3.bf16.msra.mxu1 %v2444_v49 }
 0x17f   :  { %831 = vmatprep.subr.bf16.mxu0 %v2412_v37  ;;  %1869 = vmatprep.subr.bf16.mxu1 %v2917_v18 }
 0x182   :  { %832 = vmatpush1.bf16.msra.mxu0 %v2422_v42  ;;  %1870 = vmatpush3.bf16.msra.mxu1 %v2457_v52 }
 0x183   :  { %833 = vmatprep.subr.bf16.mxu0 %v2425_v43  ;;  %1871 = vmatprep.subr.bf16.mxu1 %v2917_v18 }
 0x186   :  { %834 = vmatpush1.bf16.msra.mxu0 %v2436_v46  ;;  %1872 = vmatpush3.bf16.msra.mxu1 %v2468_v55 }
 0x187   :  { %835 = vmatprep.subr.bf16.mxu0 %v2441_v48  ;;  %1873 = vmatprep.subr.bf16.mxu1 %v2917_v18 }
 0x18a   :  { %836 = vmatpush1.bf16.msra.mxu0 %v2451_v50  ;;  %1874 = vmatpush3.bf16.msra.mxu1 %v2475_v57 }
 0x18b   :  { %837 = vmatprep.subr.bf16.mxu0 %v2454_v51  ;;  %1875 = vmatprep.subr.bf16.mxu1 %v2917_v18 }
 0x18e   :  { %838 = vmatpush1.bf16.msra.mxu0 %v2463_v54  ;;  %1876 = vmatpush3.bf16.msra.mxu1 %v2483_v58 }
 0x18f   :  { %934 = vmatprep.subr.bf16.mxu0 %v2383_v24  ;;  %1881 = vmatprep.subr.bf16.mxu1 %v2917_v18 }
 0x231   :  { %v746_v21 = vpop.f32.mrf.mxu0  ;;  %v787_v63 = vpop.f32.mrf.mxu1 }
 0x232   :  { %v793_v0 = vadd.f32 %v746_v21, %v2524_v7  ;;  %v807_v7 = vadd.f32 %v2578_v3, %v787_v63 }
 0x233   :  { %v748_v2 = vpop.f32.mrf.mxu0  ;;  %v1859_v38 = vpop.f32.mrf.mxu1 }
 0x234   :  { %v1681_v6 = vmul.f32 -1.442695, %v793_v0  ;;  %v800_v28 = vadd.f32 %v748_v2, %v2526_v9  ;;  %v710_v9 = vsel %vm709_vm5, %v2585_v62, 0.0 }
 0x235   :  { %v750_v20 = vpop.f32.mrf.mxu0  ;;  %v790_v53 = vpop.f32.mrf.mxu1 }
 0x236   :  { %2101 = vpow2.f32 %v1681_v6  ;;  %v1682_v41 = vmul.f32 -1.442695, %v800_v28  ;;  %v819_v28 = vpop.permute.xlu0 %818 }
 0x237   :  { %v751_v25 = vpop.f32.mrf.mxu0  ;;  %v1860_v56 = vpop.f32.mrf.mxu1  ;;  %vm820_vm11 = vcmp.eq.s32.totalorder %v819_v28, 1 }
 0x238   :  { %2103 = vpow2.f32 %v1682_v41 }
 0x243   :  { %v2102_v36 = vpop.eup %2101 }
 0x244   :  { %v797_v59 = vadd.f32 1.0, %v2102_v36 }
 0x245   :  { %v2104_v10 = vpop.eup %2103 }
 0x246   :  { %2105 = vrcp.f32 %v797_v59  ;;  %v804_v1 = vadd.f32 1.0, %v2104_v10 }
 0x248   :  { %2107 = vrcp.f32 %v804_v1 }
 0x253   :  { %v2106_v8 = vpop.eup %2105 }
 0x254   :  { %v808_v11 = vmul.f32 %v2106_v8, %v807_v7 }
 0x255   :  { %v2108_v17 = vpop.eup %2107 }
 0x256   :  { %v809_v21 = vadd.f32 %v808_v11, %v2547_v39  ;;  %v813_v0 = vmul.f32 %v2108_v17, %v710_v9  ;;  %v811_v2 = vsub.f32 1.0, %v2108_v17 }
 0x258   :  { %2109 = vtanh.f32 %v809_v21 }
 0x265   :  { %v2110_v38 = vpop.eup %2109 }
 0x266   :  { %v812_v6 = vmul.f32 %v2110_v38, %v811_v2 }
 0x268   :  { %v814_v20 = vadd.f32 %v813_v0, %v812_v6 }
 0x26a   :  { %v2642_v53 = vsel %vm820_vm11, %v814_v20, %v710_v9 }
 0x26b   :  { %v822_v63 = vpack.c.bf16 %v2642_v53, %v2642_v53 }
 0x26d   :  { %856 = vmatmul.mubr.bf16.vlgmr.msra.gmra.mxu0 %v822_v63  ;;  %1878 = vmatmul.mubr.bf16.vlgmr.msra.gmra.mxu1 %v822_v63 }
 0x26e   :  { %935 = vmatpush1.bf16.msra.mxu0 %v2385_v26  ;;  %1882 = vmatpush3.bf16.msra.mxu1 %v2405_v35 }
 0x26f   :  { %936 = vmatprep.subr.bf16.mxu0 %v2388_v27  ;;  %1883 = vmatprep.subr.bf16.mxu1 %v2917_v18 }
 0x270   :  { %966 = vmatprep.mubr.bf16.mxu0 %v2918_v5  ;;  %1897 = vmatprep.mubr.msk.bf16.mxu1 %vm2315_vm2, %v2917_v18 }
 0x272   :  { %937 = vmatpush1.bf16.msra.mxu0 %v2391_v29  ;;  %1884 = vmatpush3.bf16.msra.mxu1 %v2418_v40 }
 0x273   :  { %938 = vmatprep.subr.bf16.mxu0 %v2395_v30  ;;  %1885 = vmatprep.subr.bf16.mxu1 %v2917_v18 }
 0x276   :  { %939 = vmatpush1.bf16.msra.mxu0 %v2398_v32  ;;  %1886 = vmatpush3.bf16.msra.mxu1 %v2432_v44 }
 0x277   :  { %940 = vmatprep.subr.bf16.mxu0 %v2401_v33  ;;  %1887 = vmatprep.subr.bf16.mxu1 %v2917_v18 }
 0x27a   :  { %941 = vmatpush1.bf16.msra.mxu0 %v2403_v34  ;;  %1888 = vmatpush3.bf16.msra.mxu1 %v2444_v49 }
 0x27b   :  { %942 = vmatprep.subr.bf16.mxu0 %v2412_v37  ;;  %1889 = vmatprep.subr.bf16.mxu1 %v2917_v18 }
 0x27e   :  { %943 = vmatpush1.bf16.msra.mxu0 %v2422_v42  ;;  %1890 = vmatpush3.bf16.msra.mxu1 %v2457_v52 }
 0x27f   :  { %944 = vmatprep.subr.bf16.mxu0 %v2425_v43  ;;  %1891 = vmatprep.subr.bf16.mxu1 %v2917_v18 }
 0x282   :  { %945 = vmatpush1.bf16.msra.mxu0 %v2436_v46  ;;  %1892 = vmatpush3.bf16.msra.mxu1 %v2468_v55 }
 0x283   :  { %946 = vmatprep.subr.bf16.mxu0 %v2441_v48  ;;  %1893 = vmatprep.subr.bf16.mxu1 %v2917_v18 }
 0x286   :  { %947 = vmatpush1.bf16.msra.mxu0 %v2451_v50  ;;  %1894 = vmatpush3.bf16.msra.mxu1 %v2475_v57 }
 0x287   :  { %948 = vmatprep.subr.bf16.mxu0 %v2454_v51  ;;  %1895 = vmatprep.subr.bf16.mxu1 %v2917_v18 }
 0x28a   :  { %949 = vmatpush1.bf16.msra.mxu0 %v2463_v54  ;;  %1896 = vmatpush3.bf16.msra.mxu1 %v2483_v58 }
 0x28b   :  { %1045 = vmatprep.subr.bf16.mxu0 %v2383_v24  ;;  %1901 = vmatprep.subr.bf16.mxu1 %v2917_v18 }
 0x32d   :  { %v857_v39 = vpop.f32.mrf.mxu0  ;;  %v898_v62 = vpop.f32.mrf.mxu1 }
 0x32e   :  { %v904_v41 = vadd.f32 %v857_v39, %v2530_v12  ;;  %v918_v2 = vadd.f32 %v2578_v3, %v898_v62  ;;  %v930_v39 = vpop.permute.xlu1 %929 }
 0x32f   :  { %v859_v25 = vpop.f32.mrf.mxu0  ;;  %v1879_v56 = vpop.f32.mrf.mxu1  ;;  %vm931_vm12 = vcmp.eq.s32.totalorder %v930_v39, 1 }
 0x330   :  { %v1683_v36 = vmul.f32 -1.442695, %v904_v41  ;;  %v911_v8 = vadd.f32 %v859_v25, %v2532_v15 }
 0x331   :  { %v861_v59 = vpop.f32.mrf.mxu0  ;;  %v901_v10 = vpop.f32.mrf.mxu1 }
 0x332   :  { %2111 = vpow2.f32 %v1683_v36  ;;  %v1684_v11 = vmul.f32 -1.442695, %v911_v8 }
 0x333   :  { %v862_v1 = vpop.f32.mrf.mxu0  ;;  %v1880_v7 = vpop.f32.mrf.mxu1 }
 0x334   :  { %2113 = vpow2.f32 %v1684_v11 }
 0x33f   :  { %v2112_v17 = vpop.eup %2111 }
 0x340   :  { %v908_v9 = vadd.f32 1.0, %v2112_v17 }
 0x341   :  { %v2114_v21 = vpop.eup %2113 }
 0x342   :  { %2115 = vrcp.f32 %v908_v9  ;;  %v915_v0 = vadd.f32 1.0, %v2114_v21 }
 0x344   :  { %2117 = vrcp.f32 %v915_v0 }
 0x34f   :  { %v2116_v12 = vpop.eup %2115 }
 0x350   :  { %v919_v38 = vmul.f32 %v2116_v12, %v918_v2 }
 0x351   :  { %v2118_v28 = vpop.eup %2117 }
 0x352   :  { %v920_v6 = vadd.f32 %v919_v38, %v2535_v16  ;;  %v922_v20 = vsub.f32 1.0, %v2118_v28  ;;  %v924_v41 = vmul.f32 %v2118_v28, %v2642_v53 }
 0x354   :  { %2119 = vtanh.f32 %v920_v6 }
 0x361   :  { %v2120_v63 = vpop.eup %2119 }
 0x362   :  { %v923_v15 = vmul.f32 %v2120_v63, %v922_v20 }
 0x364   :  { %v925_v25 = vadd.f32 %v924_v41, %v923_v15  ;;  %v1041_v41 = vpop.permute.xlu1 %1040 }
 0x365   :  { %vm1042_vm13 = vcmp.eq.s32.totalorder %v1041_v41, 1  ;;  %v2822_v41 = vld [vmem:[#allocation7 + $0x48] ss:$12 sps:$4 sm:$0xff]  }
 0x366   :  { %v2687_v56 = vsel %vm931_vm12, %v925_v25, %v2642_v53 }
 0x367   :  { %v933_v62 = vpack.c.bf16 %v2687_v56, %v2687_v56 }
 0x369   :  { %967 = vmatmul.mubr.bf16.vlgmr.msra.gmra.mxu0 %v933_v62  ;;  %1898 = vmatmul.mubr.bf16.vlgmr.msra.gmra.mxu1 %v933_v62 }
 0x36a   :  { %1046 = vmatpush1.bf16.msra.mxu0 %v2385_v26  ;;  %1902 = vmatpush3.bf16.msra.mxu1 %v2405_v35 }
 0x36b   :  { %1047 = vmatprep.subr.bf16.mxu0 %v2388_v27  ;;  %1903 = vmatprep.subr.bf16.mxu1 %v2917_v18 }
 0x36c   :  { %1077 = vmatprep.mubr.bf16.mxu0 %v2918_v5  ;;  %1917 = vmatprep.mubr.msk.bf16.mxu1 %vm2315_vm2, %v2917_v18 }
 0x36e   :  { %1048 = vmatpush1.bf16.msra.mxu0 %v2391_v29  ;;  %1904 = vmatpush3.bf16.msra.mxu1 %v2418_v40 }
 0x36f   :  { %1049 = vmatprep.subr.bf16.mxu0 %v2395_v30  ;;  %1905 = vmatprep.subr.bf16.mxu1 %v2917_v18 }
 0x372   :  { %1050 = vmatpush1.bf16.msra.mxu0 %v2398_v32  ;;  %1906 = vmatpush3.bf16.msra.mxu1 %v2432_v44 }
 0x373   :  { %1051 = vmatprep.subr.bf16.mxu0 %v2401_v33  ;;  %1907 = vmatprep.subr.bf16.mxu1 %v2917_v18 }
 0x376   :  { %1052 = vmatpush1.bf16.msra.mxu0 %v2403_v34  ;;  %1908 = vmatpush3.bf16.msra.mxu1 %v2444_v49 }
 0x377   :  { %1053 = vmatprep.subr.bf16.mxu0 %v2412_v37  ;;  %1909 = vmatprep.subr.bf16.mxu1 %v2917_v18 }
 0x37a   :  { %1054 = vmatpush1.bf16.msra.mxu0 %v2422_v42  ;;  %1910 = vmatpush3.bf16.msra.mxu1 %v2457_v52 }
 0x37b   :  { %1055 = vmatprep.subr.bf16.mxu0 %v2425_v43  ;;  %1911 = vmatprep.subr.bf16.mxu1 %v2917_v18 }
 0x37e   :  { %1056 = vmatpush1.bf16.msra.mxu0 %v2436_v46  ;;  %1912 = vmatpush3.bf16.msra.mxu1 %v2468_v55 }
 0x37f   :  { %1057 = vmatprep.subr.bf16.mxu0 %v2441_v48  ;;  %1913 = vmatprep.subr.bf16.mxu1 %v2917_v18 }
 0x382   :  { %1058 = vmatpush1.bf16.msra.mxu0 %v2451_v50  ;;  %1914 = vmatpush3.bf16.msra.mxu1 %v2475_v57 }
 0x383   :  { %1059 = vmatprep.subr.bf16.mxu0 %v2454_v51  ;;  %1915 = vmatprep.subr.bf16.mxu1 %v2917_v18 }
 0x386   :  { %1060 = vmatpush1.bf16.msra.mxu0 %v2463_v54  ;;  %1916 = vmatpush3.bf16.msra.mxu1 %v2483_v58 }
 0x387   :  { %1156 = vmatprep.subr.bf16.mxu0 %v2383_v24  ;;  %1921 = vmatprep.subr.bf16.mxu1 %v2917_v18 }
 0x429   :  { %v968_v16 = vpop.f32.mrf.mxu0  ;;  %v1009_v53 = vpop.f32.mrf.mxu1 }
 0x42a   :  { %v1015_v36 = vadd.f32 %v968_v16, %v2537_v19  ;;  %v1029_v38 = vadd.f32 %v2578_v3, %v1009_v53 }
 0x42b   :  { %v970_v59 = vpop.f32.mrf.mxu0  ;;  %v1899_v10 = vpop.f32.mrf.mxu1 }
 0x42c   :  { %v1685_v1 = vmul.f32 -1.442695, %v1015_v36  ;;  %v1022_v9 = vadd.f32 %v970_v59, %v2539_v22 }
 0x42d   :  { %v972_v7 = vpop.f32.mrf.mxu0  ;;  %v1012_v8 = vpop.f32.mrf.mxu1 }
 0x42e   :  { %2121 = vpow2.f32 %v1685_v1  ;;  %v1686_v21 = vmul.f32 -1.442695, %v1022_v9 }
 0x42f   :  { %v973_v11 = vpop.f32.mrf.mxu0  ;;  %v1900_v17 = vpop.f32.mrf.mxu1 }
 0x430   :  { %2123 = vpow2.f32 %v1686_v21 }
 0x43b   :  { %v2122_v0 = vpop.eup %2121 }
 0x43c   :  { %v1019_v24 = vadd.f32 1.0, %v2122_v0  ;;  %v1152_v0 = vpop.permute.xlu0 %1151 }
 0x43d   :  { %v2124_v2 = vpop.eup %2123  ;;  %vm1153_vm14 = vcmp.eq.s32.totalorder %v1152_v0, 1 }
 0x43e   :  { %2125 = vrcp.f32 %v1019_v24  ;;  %v1026_v12 = vadd.f32 1.0, %v2124_v2 }
 0x440   :  { %2127 = vrcp.f32 %v1026_v12 }
 0x44b   :  { %v2126_v19 = vpop.eup %2125 }
 0x44c   :  { %v1030_v6 = vmul.f32 %v2126_v19, %v1029_v38  ;;  %v2783_v38 = vld [vmem:[#allocation7 + $0xa8] ss:$12 sps:$4 sm:$0xff]  }
 0x44d   :  { %v2128_v20 = vpop.eup %2127  ;;  %v2789_v19 = vld [vmem:[#allocation7 + $0x94] ss:$12 sps:$4 sm:$0xff]  }
 0x44e   :  { %v1031_v28 = vadd.f32 %v1030_v6, %v2542_v23  ;;  %v1033_v63 = vsub.f32 1.0, %v2128_v20  ;;  %v1035_v22 = vmul.f32 %v2128_v20, %v2687_v56  ;;  %v2796_v6 = vld [vmem:[#allocation7 + $0x90] ss:$12 sps:$4 sm:$0xff]  }
 0x44f   :  { %v2802_v20 = vld [vmem:[#allocation7 + $0x7c] ss:$12 sps:$4 sm:$0xff]  }
 0x450   :  { %2129 = vtanh.f32 %v1031_v28  ;;  %v2799_v28 = vld [vmem:[#allocation7 + $0x98] ss:$12 sps:$4 sm:$0xff]  }
 0x45d   :  { %v2130_v39 = vpop.eup %2129 }
 0x45e   :  { %v1034_v15 = vmul.f32 %v2130_v39, %v1033_v63  ;;  %v2806_v63 = vld [vmem:[#allocation7 + $0x78] ss:$12 sps:$4 sm:$0xff]  }
 0x45f   :  { %v2810_v39 = vld [vmem:[#allocation7 + $0x64] ss:$12 sps:$4 sm:$0xff]  }
 0x460   :  { %v1036_v25 = vadd.f32 %v1035_v22, %v1034_v15  ;;  %v2814_v15 = vld [vmem:[#allocation7 + $0x60] ss:$12 sps:$4 sm:$0xff]  }
 0x461   :  { %v2818_v22 = vld [vmem:[#allocation7 + $0x4c] ss:$12 sps:$4 sm:$0xff]  }
 0x462   :  { %v2732_v62 = vsel %vm1042_vm13, %v1036_v25, %v2687_v56 }
 0x463   :  { %v1044_v16 = vpack.c.bf16 %v2732_v62, %v2732_v62 }
 0x465   :  { %1078 = vmatmul.mubr.bf16.vlgmr.msra.gmra.mxu0 %v1044_v16  ;;  %1918 = vmatmul.mubr.bf16.vlgmr.msra.gmra.mxu1 %v1044_v16 }
 0x466   :  { %1157 = vmatpush1.bf16.msra.mxu0 %v2385_v26  ;;  %1922 = vmatpush3.bf16.msra.mxu1 %v2405_v35  ;;  %v2769_v26 = vld [vmem:[#allocation7 + $0xac] ss:$12 sps:$4 sm:$0xff]  }
 0x467   :  { %1158 = vmatprep.subr.bf16.mxu0 %v2388_v27  ;;  %1923 = vmatprep.subr.bf16.mxu1 %v2917_v18 }
 0x468   :  { %1188 = vmatprep.mubr.bf16.mxu0 %v2918_v5  ;;  %1937 = vmatprep.mubr.msk.bf16.mxu1 %vm2315_vm2, %v2917_v18 }
 0x46a   :  { %1159 = vmatpush1.bf16.msra.mxu0 %v2391_v29  ;;  %1924 = vmatpush3.bf16.msra.mxu1 %v2418_v40 }
 0x46b   :  { %1160 = vmatprep.subr.bf16.mxu0 %v2395_v30  ;;  %1925 = vmatprep.subr.bf16.mxu1 %v2917_v18 }
 0x46e   :  { %1161 = vmatpush1.bf16.msra.mxu0 %v2398_v32  ;;  %1926 = vmatpush3.bf16.msra.mxu1 %v2432_v44 }
 0x46f   :  { %1162 = vmatprep.subr.bf16.mxu0 %v2401_v33  ;;  %1927 = vmatprep.subr.bf16.mxu1 %v2917_v18 }
 0x472   :  { %1163 = vmatpush1.bf16.msra.mxu0 %v2403_v34  ;;  %1928 = vmatpush3.bf16.msra.mxu1 %v2444_v49 }
 0x473   :  { %1164 = vmatprep.subr.bf16.mxu0 %v2412_v37  ;;  %1929 = vmatprep.subr.bf16.mxu1 %v2917_v18 }
 0x476   :  { %1165 = vmatpush1.bf16.msra.mxu0 %v2422_v42  ;;  %1930 = vmatpush3.bf16.msra.mxu1 %v2457_v52 }
 0x477   :  { %1166 = vmatprep.subr.bf16.mxu0 %v2425_v43  ;;  %1931 = vmatprep.subr.bf16.mxu1 %v2917_v18 }
 0x47a   :  { %1167 = vmatpush1.bf16.msra.mxu0 %v2436_v46  ;;  %1932 = vmatpush3.bf16.msra.mxu1 %v2468_v55 }
 0x47b   :  { %1168 = vmatprep.subr.bf16.mxu0 %v2441_v48  ;;  %1933 = vmatprep.subr.bf16.mxu1 %v2917_v18 }
 0x47e   :  { %1169 = vmatpush1.bf16.msra.mxu0 %v2451_v50  ;;  %1934 = vmatpush3.bf16.msra.mxu1 %v2475_v57 }
 0x47f   :  { %1170 = vmatprep.subr.bf16.mxu0 %v2454_v51  ;;  %1935 = vmatprep.subr.bf16.mxu1 %v2917_v18 }
 0x482   :  { %1171 = vmatpush1.bf16.msra.mxu0 %v2463_v54  ;;  %1936 = vmatpush3.bf16.msra.mxu1 %v2483_v58 }
 0x483   :  { %1267 = vmatprep.subr.bf16.mxu0 %v2769_v26  ;;  %1941 = vmatprep.subr.bf16.mxu1 %v2917_v18 }
 0x525   :  { %v1079_v27 = vpop.f32.mrf.mxu0  ;;  %v1120_v29 = vpop.f32.mrf.mxu1 }
 0x526   :  { %v1126_v30 = vadd.f32 %v1079_v27, %v2544_v31  ;;  %v1140_v1 = vadd.f32 %v2578_v3, %v1120_v29 }
 0x527   :  { %v1081_v32 = vpop.f32.mrf.mxu0  ;;  %v1919_v33 = vpop.f32.mrf.mxu1 }
 0x528   :  { %v1687_v34 = vmul.f32 -1.442695, %v1126_v30  ;;  %v1133_v23 = vadd.f32 %v1081_v32, %v2549_v47 }
 0x529   :  { %v1083_v35 = vpop.f32.mrf.mxu0  ;;  %v1123_v37 = vpop.f32.mrf.mxu1 }
 0x52a   :  { %2131 = vpow2.f32 %v1687_v34  ;;  %v1688_v56 = vmul.f32 -1.442695, %v1133_v23  ;;  %v1263_v37 = vpop.permute.xlu1 %1262 }
 0x52b   :  { %v1084_v40 = vpop.f32.mrf.mxu0  ;;  %v1920_v42 = vpop.f32.mrf.mxu1  ;;  %vm1264_vm15 = vcmp.eq.s32.totalorder %v1263_v37, 1 }
 0x52c   :  { %2133 = vpow2.f32 %v1688_v56  ;;  %v2187_v56 = vld [vmem:[#allocation7 + $0x50] ss:$12 sps:$4 sm:$0xff]  }
 0x537   :  { %v2132_v53 = vpop.eup %2131 }
 0x538   :  { %v1130_v36 = vadd.f32 1.0, %v2132_v53  ;;  %v2188_v53 = vld [vmem:[#allocation7 + $0x34] ss:$12 sps:$4 sm:$0xff]  }
 0x539   :  { %v2134_v59 = vpop.eup %2133 }
 0x53a   :  { %2135 = vrcp.f32 %v1130_v36  ;;  %v1137_v10 = vadd.f32 1.0, %v2134_v59  ;;  %v2189_v36 = vld [vmem:[#allocation7 + $0x30] ss:$12 sps:$4 sm:$0xff]   ;;  %v2190_v59 = vld [vmem:[#allocation7 + $0x38] ss:$12 sps:$4 sm:$0xff]  }
 0x53c   :  { %2137 = vrcp.f32 %v1137_v10  ;;  %v2191_v10 = vld [vmem:[#allocation7 + $0x1c] ss:$12 sps:$4 sm:$0xff]  }
 0x547   :  { %v2136_v31 = vpop.eup %2135 }
 0x548   :  { %v1141_v7 = vmul.f32 %v2136_v31, %v1140_v1  ;;  %v2192_v1 = vld [vmem:[#allocation7 + $0x18] ss:$12 sps:$4 sm:$0xff]   ;;  %v2193_v31 = vld [vmem:[#allocation7 + $0x20] ss:$12 sps:$4 sm:$0xff]  }
 0x549   :  { %v2138_v11 = vpop.eup %2137 }
 0x54a   :  { %v1142_v8 = vadd.f32 %v1141_v7, %v2557_v61  ;;  %v1144_v17 = vsub.f32 1.0, %v2138_v11  ;;  %v1146_v47 = vmul.f32 %v2138_v11, %v2732_v62  ;;  %v2786_v61 = vld [vmem:[#allocation7 + $0xb0] ss:$12 sps:$4 sm:$0xff]   ;;  %v2196_v11 = vld [vmem:[#allocation7 + $0x8] ss:$12 sps:$4 sm:$0xff]  }
 0x54b   :  { %v2194_v7 = vld [vmem:[#allocation7 + $0x4] ss:$12 sps:$4 sm:$0xff]  }
 0x54c   :  { %2139 = vtanh.f32 %v1142_v8  ;;  %v2195_v8 = vld [vmem:[#allocation7] ss:$12 sps:$4 sm:$0xff]  }
 0x559   :  { %v2140_v9 = vpop.eup %2139 }
 0x55a   :  { %v1145_v21 = vmul.f32 %v2140_v9, %v1144_v17 }
 0x55c   :  { %v1147_v24 = vadd.f32 %v1146_v47, %v1145_v21  ;;  %v2919_v21 = vld [vmem:[#allocation17_spill] sm:$0xff] }
 0x55e   :  { %v2779_v2 = vsel %vm1153_vm14, %v1147_v24, %v2732_v62 }
 0x55f   :  { %v1155_v12 = vpack.c.bf16 %v2779_v2, %v2779_v2 }
 0x561   :  { %1189 = vmatmul.mubr.bf16.vlgmr.msra.gmra.mxu0 %v1155_v12  ;;  %1938 = vmatmul.mubr.bf16.vlgmr.msra.gmra.mxu1 %v1155_v12 }
 0x562   :  { %1268 = vmatpush1.bf16.msra.mxu0 %v2783_v38  ;;  %1942 = vmatpush3.bf16.msra.mxu1 %v2786_v61 }
 0x563   :  { %1269 = vmatprep.subr.bf16.mxu0 %v2789_v19  ;;  %1943 = vmatprep.subr.bf16.mxu1 %v2917_v18 }
 0x564   :  { %1299 = vmatprep.mubr.bf16.mxu0 %v2918_v5  ;;  %1957 = vmatprep.mubr.msk.bf16.mxu1 %vm2315_vm2, %v2917_v18 }
 0x566   :  { %1270 = vmatpush1.bf16.msra.mxu0 %v2796_v6  ;;  %1944 = vmatpush3.bf16.msra.mxu1 %v2799_v28 }
 0x567   :  { %1271 = vmatprep.subr.bf16.mxu0 %v2802_v20  ;;  %1945 = vmatprep.subr.bf16.mxu1 %v2917_v18 }
 0x56a   :  { %1272 = vmatpush1.bf16.msra.mxu0 %v2806_v63  ;;  %1946 = vmatpush3.bf16.msra.mxu1 %v2432_v44 }
 0x56b   :  { %1273 = vmatprep.subr.bf16.mxu0 %v2810_v39  ;;  %1947 = vmatprep.subr.bf16.mxu1 %v2917_v18 }
 0x56e   :  { %1274 = vmatpush1.bf16.msra.mxu0 %v2814_v15  ;;  %1948 = vmatpush3.bf16.msra.mxu1 %v2444_v49 }
 0x56f   :  { %1275 = vmatprep.subr.bf16.mxu0 %v2818_v22  ;;  %1949 = vmatprep.subr.bf16.mxu1 %v2917_v18 }
 0x572   :  { %1276 = vmatpush1.bf16.msra.mxu0 %v2822_v41  ;;  %1950 = vmatpush3.bf16.msra.mxu1 %v2457_v52 }
 0x573   :  { %1277 = vmatprep.subr.bf16.mxu0 %v2425_v43  ;;  %1951 = vmatprep.subr.bf16.mxu1 %v2917_v18 }
 0x576   :  { %1278 = vmatpush1.bf16.msra.mxu0 %v2436_v46  ;;  %1952 = vmatpush3.bf16.msra.mxu1 %v2468_v55 }
 0x577   :  { %1279 = vmatprep.subr.bf16.mxu0 %v2441_v48  ;;  %1953 = vmatprep.subr.bf16.mxu1 %v2917_v18 }
 0x57a   :  { %1280 = vmatpush1.bf16.msra.mxu0 %v2451_v50  ;;  %1954 = vmatpush3.bf16.msra.mxu1 %v2475_v57 }
 0x57b   :  { %1281 = vmatprep.subr.bf16.mxu0 %v2454_v51  ;;  %1955 = vmatprep.subr.bf16.mxu1 %v2917_v18 }
 0x57e   :  { %1282 = vmatpush1.bf16.msra.mxu0 %v2463_v54  ;;  %1956 = vmatpush3.bf16.msra.mxu1 %v2483_v58 }
 0x57f   :  { %1378 = vmatprep.subr.bf16.mxu0 %v2769_v26  ;;  %1961 = vmatprep.subr.bf16.mxu1 %v2917_v18 }
 0x621   :  { %v1190_v43 = vpop.f32.mrf.mxu0  ;;  %v1231_v44 = vpop.f32.mrf.mxu1 }
 0x622   :  { %v1237_v46 = vadd.f32 %v1190_v43, %v2554_v60  ;;  %v1251_v27 = vadd.f32 %v2578_v3, %v1231_v44 }
 0x623   :  { %v1192_v48 = vpop.f32.mrf.mxu0  ;;  %v1939_v49 = vpop.f32.mrf.mxu1 }
 0x624   :  { %v1689_v50 = vmul.f32 -1.442695, %v1237_v46  ;;  %v1244_v54 = vadd.f32 %v1192_v48, %v2559_v4  ;;  %v2921_v46 = vld [vmem:[#allocation15_spill] sm:$0xff] }
 0x625   :  { %v1194_v52 = vpop.f32.mrf.mxu0  ;;  %v1234_v55 = vpop.f32.mrf.mxu1 }
 0x626   :  { %2141 = vpow2.f32 %v1689_v50  ;;  %v1690_v25 = vmul.f32 -1.442695, %v1244_v54  ;;  %v1374_v55 = vpop.permute.xlu0 %1373 }
 0x627   :  { %v1195_v51 = vpop.f32.mrf.mxu0  ;;  %v1940_v57 = vpop.f32.mrf.mxu1  ;;  %vm1375_vm0 = vcmp.eq.s32.totalorder %v1374_v55, 1 }
 0x628   :  { %2143 = vpow2.f32 %v1690_v25 }
 0x633   :  { %v2142_v58 = vpop.eup %2141 }
 0x634   :  { %v1241_v62 = vadd.f32 1.0, %v2142_v58 }
 0x635   :  { %v2144_v16 = vpop.eup %2143 }
 0x636   :  { %2145 = vrcp.f32 %v1241_v62  ;;  %v1248_v26 = vadd.f32 1.0, %v2144_v16  ;;  %v2083_v62 = vld [vmem:[#allocation8 + $0x38] sm:$0xff]   ;;  %v2084_v16 = vld [vmem:[#allocation8 + $0x30] sm:$0xff]  }
 0x638   :  { %2147 = vrcp.f32 %v1248_v26  ;;  %v2085_v26 = vld [vmem:[#allocation8 + $0x28] sm:$0xff]  }
 0x643   :  { %v2146_v60 = vpop.eup %2145 }
 0x644   :  { %v1252_v29 = vmul.f32 %v2146_v60, %v1251_v27  ;;  %v2086_v27 = vld [vmem:[#allocation8 + $0x20] sm:$0xff]   ;;  %v2087_v60 = vld [vmem:[#allocation8 + $0x18] sm:$0xff]  }
 0x645   :  { %v2148_v32 = vpop.eup %2147 }
 0x646   :  { %v1253_v30 = vadd.f32 %v1252_v29, %v2567_v14  ;;  %v1255_v33 = vsub.f32 1.0, %v2148_v32  ;;  %v1257_v4 = vmul.f32 %v2148_v32, %v2779_v2  ;;  %v2185_v14 = vld [vmem:[#allocation7 + $0x80] ss:$12 sps:$4 sm:$0xff]   ;;  %v2088_v29 = vld [vmem:[#allocation8 + $0x10] sm:$0xff]  }
 0x647   :  { %v2090_v32 = vld [vmem:[#allocation8] sm:$0xff]  }
 0x648   :  { %2149 = vtanh.f32 %v1253_v30  ;;  %v2089_v30 = vld [vmem:[#allocation8 + $0x8] sm:$0xff]  }
 0x655   :  { %v2150_v34 = vpop.eup %2149 }
 0x656   :  { %v1256_v35 = vmul.f32 %v2150_v34, %v1255_v33 }
 0x658   :  { %v1258_v40 = vadd.f32 %v1257_v4, %v1256_v35  ;;  %v2922_v35 = vld [vmem:[#allocation19_spill] sm:$0xff] }
 0x65a   :  { %v2846_v42 = vsel %vm1264_vm15, %v1258_v40, %v2779_v2 }
 0x65b   :  { %v1266_v23 = vpack.c.bf16 %v2846_v42, %v2846_v42 }
 0x65d   :  { %1300 = vmatmul.mubr.bf16.vlgmr.msra.gmra.mxu0 %v1266_v23  ;;  %1958 = vmatmul.mubr.bf16.vlgmr.msra.gmra.mxu1 %v1266_v23 }
 0x65e   :  { %1379 = vmatpush1.bf16.msra.mxu0 %v2783_v38  ;;  %1962 = vmatpush3.bf16.msra.mxu1 %v2786_v61 }
 0x65f   :  { %1380 = vmatprep.subr.bf16.mxu0 %v2789_v19  ;;  %1963 = vmatprep.subr.bf16.mxu1 %v2917_v18 }
 0x660   :  { %1410 = vmatprep.mubr.bf16.mxu0 %v2918_v5  ;;  %1977 = vmatprep.mubr.msk.bf16.mxu1 %vm2315_vm2, %v2917_v18  ;;  %v2186_v5 = vld [vmem:[#allocation7 + $0x68] ss:$12 sps:$4 sm:$0xff]  }
 0x662   :  { %1381 = vmatpush1.bf16.msra.mxu0 %v2796_v6  ;;  %1964 = vmatpush3.bf16.msra.mxu1 %v2799_v28  ;;  %v2920_v6 = vld [vmem:[#allocation18_spill] sm:$0xff] }
 0x663   :  { %1382 = vmatprep.subr.bf16.mxu0 %v2802_v20  ;;  %1965 = vmatprep.subr.bf16.mxu1 %v2917_v18 }
 0x666   :  { %1383 = vmatpush1.bf16.msra.mxu0 %v2806_v63  ;;  %1966 = vmatpush3.bf16.msra.mxu1 %v2185_v14 }
 0x667   :  { %1384 = vmatprep.subr.bf16.mxu0 %v2810_v39  ;;  %1967 = vmatprep.subr.bf16.mxu1 %v2917_v18 }
 0x66a   :  { %1385 = vmatpush1.bf16.msra.mxu0 %v2814_v15  ;;  %1968 = vmatpush3.bf16.msra.mxu1 %v2186_v5 }
 0x66b   :  { %1386 = vmatprep.subr.bf16.mxu0 %v2818_v22  ;;  %1969 = vmatprep.subr.bf16.mxu1 %v2917_v18 }
 0x66e   :  { %1387 = vmatpush1.bf16.msra.mxu0 %v2822_v41  ;;  %1970 = vmatpush3.bf16.msra.mxu1 %v2187_v56 }
 0x66f   :  { %1388 = vmatprep.subr.bf16.mxu0 %v2188_v53  ;;  %1971 = vmatprep.subr.bf16.mxu1 %v2917_v18 }
 0x672   :  { %1389 = vmatpush1.bf16.msra.mxu0 %v2189_v36  ;;  %1972 = vmatpush3.bf16.msra.mxu1 %v2190_v59 }
 0x673   :  { %1390 = vmatprep.subr.bf16.mxu0 %v2191_v10  ;;  %1973 = vmatprep.subr.bf16.mxu1 %v2917_v18 }
 0x676   :  { %1391 = vmatpush1.bf16.msra.mxu0 %v2192_v1  ;;  %1974 = vmatpush3.bf16.msra.mxu1 %v2193_v31 }
 0x677   :  { %1392 = vmatprep.subr.bf16.mxu0 %v2194_v7  ;;  %1975 = vmatprep.subr.bf16.mxu1 %v2917_v18 }
 0x67a   :  { %1393 = vmatpush1.bf16.msra.mxu0 %v2195_v8  ;;  %1976 = vmatpush3.bf16.msra.mxu1 %v2196_v11  ;;  %v2923_v11 = vld [vmem:[#allocation16_spill] sm:$0xff] }
 0x67b   :  { %1981 = vmatprep.subr.bf16.mxu0 %v2917_v18 }
 0x71d   :  { %v1301_v17 = vpop.f32.mrf.mxu0  ;;  %v1342_v9 = vpop.f32.mrf.mxu1 }
 0x71e   :  { %v1348_v47 = vadd.f32 %v1301_v17, %v2919_v21  ;;  %v1362_v41 = vadd.f32 %v2578_v3, %v1342_v9 }
 0x71f   :  { %v1303_v0 = vpop.f32.mrf.mxu0  ;;  %v1959_v24 = vpop.f32.mrf.mxu1 }
 0x720   :  { %v1691_v2 = vmul.f32 -1.442695, %v1348_v47  ;;  %v1355_v28 = vadd.f32 %v1303_v0, %v2920_v6  ;;  %v1485_v0 = vpop.permute.xlu1 %1484 }
 0x721   :  { %v1305_v12 = vpop.f32.mrf.mxu0  ;;  %v1345_v38 = vpop.f32.mrf.mxu1  ;;  %vm1486_vm1 = vcmp.eq.s32.totalorder %v1485_v0, 1 }
 0x722   :  { %2151 = vpow2.f32 %v1691_v2  ;;  %v1692_v20 = vmul.f32 -1.442695, %v1355_v28 }
 0x723   :  { %v1306_v61 = vpop.f32.mrf.mxu0  ;;  %v1960_v19 = vpop.f32.mrf.mxu1 }
 0x724   :  { %2153 = vpow2.f32 %v1692_v20 }
 0x72f   :  { %v2152_v63 = vpop.eup %2151 }
 0x730   :  { %v1352_v39 = vadd.f32 1.0, %v2152_v63 }
 0x731   :  { %v2154_v15 = vpop.eup %2153 }
 0x732   :  { %2155 = vrcp.f32 %v1352_v39  ;;  %v1359_v22 = vadd.f32 1.0, %v2154_v15 }
 0x734   :  { %2157 = vrcp.f32 %v1359_v22 }
 0x73f   :  { %v2156_v43 = vpop.eup %2155 }
 0x740   :  { %v1363_v44 = vmul.f32 %v2156_v43, %v1362_v41 }
 0x741   :  { %v2158_v49 = vpop.eup %2157 }
 0x742   :  { %v1364_v48 = vadd.f32 %v1363_v44, %v2921_v46  ;;  %v1366_v50 = vsub.f32 1.0, %v2158_v49  ;;  %v1368_v57 = vmul.f32 %v2158_v49, %v2846_v42 }
 0x744   :  { %2159 = vtanh.f32 %v1364_v48 }
 0x751   :  { %v2160_v52 = vpop.eup %2159 }
 0x752   :  { %v1367_v51 = vmul.f32 %v2160_v52, %v1366_v50 }
 0x754   :  { %v1369_v54 = vadd.f32 %v1368_v57, %v1367_v51 }
 0x756   :  { %v1376_v25 = vsel %vm1375_vm0, %v1369_v54, %v2846_v42 }
 0x757   :  { %v1377_v58 = vpack.c.bf16 %v1376_v25, %v1376_v25 }
 0x759   :  { %1411 = vmatmul.mubr.bf16.vlgmr.msra.gmra.mxu0 %v1377_v58  ;;  %1978 = vmatmul.mubr.bf16.vlgmr.msra.gmra.mxu1 %v1377_v58 }
 0x75a   :  { %1997 = vmatprep.mubr.msk.bf16.mxu0 %vm2315_vm2, %v2917_v18  ;;  %1982 = vmatpush3.bf16.msra.mxu0 %v2083_v62 }
 0x75b   :  { %1983 = vmatprep.subr.bf16.mxu0 %v2917_v18 }
 0x75e   :  { %1984 = vmatpush3.bf16.msra.mxu0 %v2084_v16 }
 0x75f   :  { %1985 = vmatprep.subr.bf16.mxu0 %v2917_v18 }
 0x762   :  { %1986 = vmatpush3.bf16.msra.mxu0 %v2085_v26 }
 0x763   :  { %1987 = vmatprep.subr.bf16.mxu0 %v2917_v18 }
 0x766   :  { %1988 = vmatpush3.bf16.msra.mxu0 %v2086_v27 }
 0x767   :  { %1989 = vmatprep.subr.bf16.mxu0 %v2917_v18 }
 0x76a   :  { %1990 = vmatpush3.bf16.msra.mxu0 %v2087_v60 }
 0x76b   :  { %1991 = vmatprep.subr.bf16.mxu0 %v2917_v18 }
 0x76e   :  { %1992 = vmatpush3.bf16.msra.mxu0 %v2088_v29 }
 0x76f   :  { %1993 = vmatprep.subr.bf16.mxu0 %v2917_v18 }
 0x772   :  { %1994 = vmatpush3.bf16.msra.mxu0 %v2089_v30 }
 0x773   :  { %1995 = vmatprep.subr.bf16.mxu0 %v2917_v18 }
 0x776   :  { %1996 = vmatpush3.bf16.msra.mxu0 %v2090_v32 }
 0x819   :  { %v1412_v33 = vpop.f32.mrf.mxu0  ;;  %v1453_v34 = vpop.f32.mrf.mxu1 }
 0x81a   :  { %v1459_v4 = vadd.f32 %v1412_v33, %v2922_v35  ;;  %v1473_v31 = vadd.f32 %v2578_v3, %v1453_v34  ;;  %v1695_v3 = vld [vmem:[%s2906_s7] ss:$0 sm:$0xff] }
 0x81b   :  { %v1414_v37 = vpop.f32.mrf.mxu0  ;;  %v1979_v40 = vpop.f32.mrf.mxu1 }
 0x81c   :  { %v1693_v42 = vmul.f32 -1.442695, %v1459_v4  ;;  %v1466_v53 = vadd.f32 %v1414_v37, %v2573_v45 }
 0x81d   :  { %v1416_v23 = vpop.f32.mrf.mxu0  ;;  %v1456_v14 = vpop.f32.mrf.mxu1 }
 0x81e   :  { %2161 = vpow2.f32 %v1693_v42  ;;  %v1694_v36 = vmul.f32 -1.442695, %v1466_v53 }
 0x81f   :  { %v1417_v5 = vpop.f32.mrf.mxu0  ;;  %v1980_v56 = vpop.f32.mrf.mxu1 }
 0x820   :  { %2163 = vpow2.f32 %v1694_v36 }
 0x82b   :  { %v2162_v59 = vpop.eup %2161 }
 0x82c   :  { %v1463_v10 = vadd.f32 1.0, %v2162_v59 }
 0x82d   :  { %v2164_v18 = vpop.eup %2163 }
 0x82e   :  { %2165 = vrcp.f32 %v1463_v10  ;;  %v1470_v1 = vadd.f32 1.0, %v2164_v18 }
 0x830   :  { %2167 = vrcp.f32 %v1470_v1 }
 0x83b   :  { %v2166_v7 = vpop.eup %2165 }
 0x83c   :  { %v1474_v8 = vmul.f32 %v2166_v7, %v1473_v31 }
 0x83d   :  { %v2168_v9 = vpop.eup %2167 }
 0x83e   :  { %v1475_v17 = vadd.f32 %v1474_v8, %v2923_v11  ;;  %v1477_v21 = vsub.f32 1.0, %v2168_v9  ;;  %v1479_v24 = vmul.f32 %v2168_v9, %v1376_v25 }
 0x840   :  { %2169 = vtanh.f32 %v1475_v17 }
 0x84d   :  { %v2170_v47 = vpop.eup %2169 }
 0x84e   :  { %v1478_v45 = vmul.f32 %v2170_v47, %v1477_v21 }
 0x850   :  { %v1480_v2 = vadd.f32 %v1479_v24, %v1478_v45 }
 0x852   :  { %v1487_v12 = vsel %vm1486_vm1, %v1480_v2, %v1376_v25 }
 0x853   :  { %v1488_v38 = vpack.c.bf16 %v1487_v12, %v1487_v12 }
 0x855   :  { %1998 = vmatmul.mubr.bf16.vlgmr.msra.gmra.mxu0 %v1488_v38 }
 0x915   :  { %v1594_v61 = vpop.f32.mrf.mxu0 }
 0x916   :  { %v1595_v19 = vadd.f32 %v1695_v3, %v1594_v61 }
 0x917   :  { %v1999_v6 = vpop.f32.mrf.mxu0 }
 0x918   :  { %2171 = vtanh.f32 %v1595_v19 }
 0x919   :  { %v1597_v28 = vpop.f32.mrf.mxu0 }
 0x91b   :  { %v2000_v20 = vpop.f32.mrf.mxu0 }
 0x925   :  { %v2172_v63 = vpop.eup %2171 }
 0x926   :  { %v1601_v39 = vsel %vm709_vm5, %v2172_v63, 0.0 }
 0x927   :  { %1602 = vst [vmem:[#allocation10] sm:$0xff] %v1601_v39 }
 0x928   :  { %2288 = shalt.err (!%p2285_p10)
}
 0x929   :  { %1612 = dma.vmem_to_hbm [thread:$0]  %s1610_s9, 128, %s2907_s8, [#allocation4]  }
 0x92a   :  { %2303 = dma.done.wait [#allocation4], 128  }
 0x92b   :  { %2304 = vsyncadd [#allocation4], 4294967168 }
 0x92c   :  { %1616 = vsyncpa [#allocation3], 1 }
 0x92d   :  { %1617 = vsyncpa [#allocation6], 1 }
 0x92e   :  { %1618 = vsyncpa [#allocation9], 1 }
 0x92f   :  { %1619 = vsyncpa [#allocation4], 1 }

// kernel: tpu_custom_call.1
= control target key start
LH: loop header
LB: loop body
LE: loop exit
PB: predicated region body
PF: predicated region fallthrough
CT: control target
= control target key end

     0   :  { %13 = vsyncpa [#allocation3], 0  ;;  %s2899_s0 = inlined_call_operand.hbm [shape: bf16[8,8,128], index: 0, kind: input, shape index: {}]   ;;  %s2900_s1 = inlined_call_operand.vmem [shape: s32[8,1], index: 1, kind: input, shape index: {}]   ;;  %s2901_s2 = inlined_call_operand.hbm [shape: bf16[128,384], index: 2, kind: input, shape index: {}]   ;;  %s2902_s3 = inlined_call_operand.hbm [shape: bf16[128,384], index: 3, kind: input, shape index: {}]   ;;  %s2903_s4 = inlined_call_operand.vmem [shape: f32[1,384], index: 4, kind: input, shape index: {}]   ;;  %s2904_s5 = inlined_call_operand.vmem [shape: f32[1,128], index: 5, kind: input, shape index: {}]   ;;  %s2905_s6 = inlined_call_operand.hbm [shape: bf16[128,128], index: 6, kind: input, shape index: {}]   ;;  %s2906_s7 = inlined_call_operand.vmem [shape: f32[1,128], index: 7, kind: input, shape index: {}]   ;;  %s2907_s8 = inlined_call_operand.hbm [shape: f32[8,128], index: 8, kind: output, shape index: {}]  }
   0x1   :  { %14 = vsyncpa [#allocation6], 0 }
   0x2   :  { %15 = vsyncpa [#allocation9], 0 }
   0x3   :  { %16 = vsyncpa [#allocation4], 0  ;;  %s2305_s27 = smov [#allocation5]  }
   0x4   :  { %s36_s28 = sshll.u32 %s2305_s27, 4  ;;  %s37_s28 = int_to_ptr.vmem [resolvable:$true] %s36_s28 }
   0x5   :  { %s2205_s29 = scalar_lea.vmem %s37_s28, 3072  ;;  %p2210_p1 = scmp.lt.s32.totalorder %s37_s28, %s37_s28 }
   0x6   :  { %p2206_p0 = scmp.ne.s32.totalorder %s37_s28, %s2205_s29  ;;  %p2211_p2 = scmp.lt.s32.totalorder %s2205_s29, %s2205_s29 }
   0x8   :  { %p2212_p3 = por %p2211_p2, %p2210_p1 }
   0xa   :  { %p2213_p4 = pnand %p2212_p3, %p2206_p0 }
   0xc   :  { %2216 = shalt.err (!%p2213_p4)
}
   0xd   :  { %s2306_s30 = smov 192   ;;  %s2307_s9 = smov 12  }
   0xe   :  { %42 = dma.hbm_to_vmem [thread:$0]  %s2901_s2, 3072, %s37_s28, [#allocation6], %s2306_s30, %s2306_s30, %s2307_s9  }
   0xf   :  { %s2308_s12 = smov [#allocation2]  }
  0x10   :  { %s22_s13 = sshll.u32 %s2308_s12, 4  ;;  %s23_s13 = int_to_ptr.vmem [resolvable:$true] %s22_s13 }
  0x11   :  { %s2225_s14 = scalar_lea.vmem %s23_s13, 512  ;;  %p2230_p6 = scmp.lt.s32.totalorder %s23_s13, %s23_s13 }
  0x12   :  { %p2226_p5 = scmp.ne.s32.totalorder %s23_s13, %s2225_s14  ;;  %p2231_p7 = scmp.lt.s32.totalorder %s2225_s14, %s2225_s14 }
  0x14   :  { %p2232_p8 = por %p2231_p7, %p2230_p6 }
  0x16   :  { %p2233_p9 = pnand %p2232_p8, %p2226_p5 }
  0x18   :  { %2236 = shalt.err (!%p2233_p9)
}
  0x19   :  { %s2309_s15 = smov 64   ;;  %s2310_s16 = smov 4  }
  0x1a   :  { %28 = dma.hbm_to_vmem [thread:$0]  %s2899_s0, 512, %s23_s13, [#allocation3], %s2309_s15, %s2309_s15, %s2310_s16  }
  0x1b   :  { %s2311_s19 = smov [#allocation7]   ;;  %s2312_s21 = smov [#allocation8]  }
  0x1c   :  { %s48_s20 = sshll.u32 %s2311_s19, 4  ;;  %s64_s2 = sshll.u32 %s2312_s21, 4  ;;  %s49_s20 = int_to_ptr.vmem [resolvable:$true] %s48_s20  ;;  %s65_s2 = int_to_ptr.vmem [resolvable:$true] %s64_s2 }
  0x1d   :  { %s2245_s22 = scalar_lea.vmem %s49_s20, 3072  ;;  %p2250_p11 = scmp.lt.s32.totalorder %s49_s20, %s49_s20 }
  0x1e   :  { %p2246_p10 = scmp.ne.s32.totalorder %s49_s20, %s2245_s22  ;;  %p2251_p12 = scmp.lt.s32.totalorder %s2245_s22, %s2245_s22 }
  0x20   :  { %p2252_p13 = por %p2251_p12, %p2250_p11 }
  0x22   :  { %p2253_p0 = pnand %p2252_p13, %p2246_p10 }
  0x24   :  { %2256 = shalt.err (!%p2253_p0)
}
  0x25   :  { %54 = dma.hbm_to_vmem [thread:$0]  %s2902_s3, 3072, %s49_s20, [#allocation6], %s2306_s30, %s2306_s30, %s2307_s9  }
  0x26   :  { %s2265_s0 = scalar_lea.vmem %s65_s2, 1024  ;;  %p2270_p2 = scmp.lt.s32.totalorder %s65_s2, %s65_s2 }
  0x27   :  { %p2266_p1 = scmp.ne.s32.totalorder %s65_s2, %s2265_s0  ;;  %p2271_p3 = scmp.lt.s32.totalorder %s2265_s0, %s2265_s0 }
  0x29   :  { %p2272_p4 = por %p2271_p3, %p2270_p2 }
  0x2b   :  { %p2273_p5 = pnand %p2272_p4, %p2266_p1 }
  0x2d   :  { %2276 = shalt.err (!%p2273_p5)
}
  0x2e   :  { %70 = dma.hbm_to_vmem [thread:$0]  %s2905_s6, 1024, %s65_s2, [#allocation9], %s2309_s15, %s2309_s15, %s2310_s16  }
  0x2f   :  { %2297 = dma.done.wait [#allocation3], 512  }
  0x30   :  { %2298 = vsyncadd [#allocation3], 4294966784 }
  0x31   :  { %2299 = dma.done.wait [#allocation6], 6144  }
  0x32   :  { %2300 = vsyncadd [#allocation6], 4294961152 }
  0x33   :  { %2301 = dma.done.wait [#allocation9], 1024  }
  0x34   :  { %2302 = vsyncadd [#allocation9], 4294966272  ;;  %v2908_v0 = vmov 0   ;;  %v2015_v1 = vld [vmem:[#allocation5 + $0xac] ss:$12 sps:$4 sm:$0xff]   ;;  %v2041_v12 = vld [vmem:[#allocation2] sm:$0xff]   ;;  %v136_v59 = vlaneseq }
  0x35   :  { %335 = vmatprep.mubr.bf16.mxu0 %v2908_v0  ;;  %2013 = vset.pattern.permute.xlu0 %v2908_v0  ;;  %v2017_v2 = vld [vmem:[#allocation5 + $0xa8] ss:$12 sps:$4 sm:$0xff]   ;;  %v2020_v4 = vld [vmem:[#allocation5 + $0x90] ss:$12 sps:$4 sm:$0xff]   ;;  %v2023_v6 = vld [vmem:[#allocation5 + $0x78] ss:$12 sps:$4 sm:$0xff]  }
  0x36   :  { %2014 = vset.pattern.permute.xlu1 %v2908_v0  ;;  %303 = vmatprep.subr.bf16.mxu0 %v2015_v1  ;;  %v2018_v3 = vld [vmem:[#allocation5 + $0x94] ss:$12 sps:$4 sm:$0xff]   ;;  %v2021_v5 = vld [vmem:[#allocation5 + $0x7c] ss:$12 sps:$4 sm:$0xff]   ;;  %v2024_v7 = vld [vmem:[#allocation5 + $0x64] ss:$12 sps:$4 sm:$0xff]  }
  0x37   :  { %304 = vmatpush1.bf16.msra.mxu0 %v2017_v2  ;;  %v2036_v8 = vld [vmem:[#allocation5 + $0xb0] ss:$12 sps:$4 sm:$0xff]   ;;  %v2026_v9 = vld [vmem:[#allocation5 + $0x60] ss:$12 sps:$4 sm:$0xff]   ;;  %v2040_v11 = vld [vmem:[#allocation5 + $0x98] ss:$12 sps:$4 sm:$0xff]   ;;  %1813 = vmatprep.mubr.bf16.mxu1 %v2041_v12 }
  0x38   :  { %305 = vmatprep.subr.bf16.mxu0 %v2018_v3  ;;  %v2027_v10 = vld [vmem:[#allocation5 + $0x4c] ss:$12 sps:$4 sm:$0xff]   ;;  %1797 = vmatprep.subr.bf16.mxu1 %v2036_v8  ;;  %v2029_v13 = vld [vmem:[#allocation5 + $0x48] ss:$12 sps:$4 sm:$0xff]   ;;  %v2032_v17 = vld [vmem:[#allocation5 + $0x30] ss:$12 sps:$4 sm:$0xff]  }
  0x39   :  { %1798 = vmatpush3.bf16.msra.mxu1 %v2036_v8  ;;  %v2045_v14 = vld [vmem:[#allocation5 + $0x80] ss:$12 sps:$4 sm:$0xff]   ;;  %v2049_v16 = vld [vmem:[#allocation5 + $0x68] ss:$12 sps:$4 sm:$0xff]   ;;  %v2054_v19 = vld [vmem:[#allocation5 + $0x50] ss:$12 sps:$4 sm:$0xff]  }
  0x3a   :  { %1799 = vmatprep.subr.bf16.mxu1 %v2040_v11  ;;  %v2030_v15 = vld [vmem:[#allocation5 + $0x34] ss:$12 sps:$4 sm:$0xff]   ;;  %v2033_v18 = vld [vmem:[#allocation5 + $0x1c] ss:$12 sps:$4 sm:$0xff]   ;;  %v2035_v20 = vld [vmem:[#allocation5 + $0x18] ss:$12 sps:$4 sm:$0xff]  }
  0x3b   :  { %306 = vmatpush1.bf16.msra.mxu0 %v2020_v4  ;;  %v2037_v21 = vld [vmem:[#allocation5 + $0x4] ss:$12 sps:$4 sm:$0xff]   ;;  %v2039_v23 = vld [vmem:[#allocation5] ss:$12 sps:$4 sm:$0xff]   ;;  %v2385_v26 = vld [vmem:[#allocation7 + $0xa8] ss:$12 sps:$4 sm:$0xff]  }
  0x3c   :  { %307 = vmatprep.subr.bf16.mxu0 %v2021_v5  ;;  %v2058_v22 = vld [vmem:[#allocation5 + $0x38] ss:$12 sps:$4 sm:$0xff]   ;;  %v2063_v25 = vld [vmem:[#allocation5 + $0x20] ss:$12 sps:$4 sm:$0xff]   ;;  %v2067_v28 = vld [vmem:[#allocation5 + $0x8] ss:$12 sps:$4 sm:$0xff]  }
  0x3d   :  { %1800 = vmatpush3.bf16.msra.mxu1 %v2040_v11  ;;  %v2383_v24 = vld [vmem:[#allocation7 + $0xac] ss:$12 sps:$4 sm:$0xff]   ;;  %v2388_v27 = vld [vmem:[#allocation7 + $0x94] ss:$12 sps:$4 sm:$0xff]   ;;  %v2391_v29 = vld [vmem:[#allocation7 + $0x90] ss:$12 sps:$4 sm:$0xff]  }
  0x3e   :  { %1801 = vmatprep.subr.bf16.mxu1 %v2045_v14  ;;  %v2395_v30 = vld [vmem:[#allocation7 + $0x7c] ss:$12 sps:$4 sm:$0xff]   ;;  %v2398_v32 = vld [vmem:[#allocation7 + $0x78] ss:$12 sps:$4 sm:$0xff]   ;;  %v2403_v34 = vld [vmem:[#allocation7 + $0x60] ss:$12 sps:$4 sm:$0xff]  }
  0x3f   :  { %308 = vmatpush1.bf16.msra.mxu0 %v2023_v6  ;;  %v2050_v31 = vld [vmem:[#allocation2 + $0x8] sm:$0xff]   ;;  %v2401_v33 = vld [vmem:[#allocation7 + $0x64] ss:$12 sps:$4 sm:$0xff]   ;;  %v2910_v38 = vmov 0.0   ;;  %v2425_v43 = vld [vmem:[#allocation7 + $0x34] ss:$12 sps:$4 sm:$0xff]  }
  0x40   :  { %309 = vmatprep.subr.bf16.mxu0 %v2024_v7  ;;  %v2405_v35 = vld [vmem:[#allocation7 + $0xb0] ss:$12 sps:$4 sm:$0xff]   ;;  %v2410_v36 = vld [vmem:[%s2900_s1] sm:$0xff]  ;;  %v2412_v37 = vld [vmem:[#allocation7 + $0x4c] ss:$12 sps:$4 sm:$0xff]   ;;  %vm2315_vm2 = vmmov 0  }
  0x41   :  { %1802 = vmatpush3.bf16.msra.mxu1 %v2045_v14  ;;  %vm704_vm0 = vcmp.gt.s32.totalorder %v2410_v36, 0  ;;  %v2059_v39 = vld [vmem:[#allocation2 + $0x10] sm:$0xff]   ;;  %v2418_v40 = vld [vmem:[#allocation7 + $0x98] ss:$12 sps:$4 sm:$0xff]   ;;  %vm815_vm1 = vcmp.gt.s32.totalorder %v2410_v36, 1  ;;  %vm1148_vm3 = vcmp.gt.s32.totalorder %v2410_v36, 4 }
  0x42   :  { %1803 = vmatprep.subr.bf16.mxu1 %v2049_v16  ;;  %v705_v41 = vsel %vm704_vm0, 1, %v2908_v0  ;;  %v2422_v42 = vld [vmem:[#allocation7 + $0x48] ss:$12 sps:$4 sm:$0xff]   ;;  %v2432_v44 = vld [vmem:[#allocation7 + $0x80] ss:$12 sps:$4 sm:$0xff]   ;;  %v2068_v45 = vld [vmem:[#allocation2 + $0x18] sm:$0xff]  }
  0x43   :  { %310 = vmatpush1.bf16.msra.mxu0 %v2026_v9  ;;  %707 = vperm.xlu0 %2013, %v705_v41   ;;  %v2436_v46 = vld [vmem:[#allocation7 + $0x30] ss:$12 sps:$4 sm:$0xff]   ;;  %v816_v47 = vsel %vm815_vm1, 1, %v2908_v0  ;;  %v2444_v49 = vld [vmem:[#allocation7 + $0x68] ss:$12 sps:$4 sm:$0xff]   ;;  %v1149_v53 = vsel %vm1148_vm3, 1, %v2908_v0 }
  0x44   :  { %311 = vmatprep.subr.bf16.mxu0 %v2027_v10  ;;  %v2441_v48 = vld [vmem:[#allocation7 + $0x1c] ss:$12 sps:$4 sm:$0xff]   ;;  %v2451_v50 = vld [vmem:[#allocation7 + $0x18] ss:$12 sps:$4 sm:$0xff]   ;;  %vm1370_vm4 = vcmp.gt.s32.totalorder %v2410_v36, 6  ;;  %v137_v60 = vshrl.u32 %v136_v59, 7 }
  0x45   :  { %1804 = vmatpush3.bf16.msra.mxu1 %v2049_v16  ;;  %v2454_v51 = vld [vmem:[#allocation7 + $0x4] ss:$12 sps:$4 sm:$0xff]   ;;  %v2463_v54 = vld [vmem:[#allocation7] ss:$12 sps:$4 sm:$0xff]   ;;  %v1371_v56 = vsel %vm1370_vm4, 1, %v2908_v0  ;;  %vm926_vm7 = vcmp.gt.s32.totalorder %v2410_v36, 2 }
  0x46   :  { %1805 = vmatprep.subr.bf16.mxu1 %v2054_v19  ;;  %v2457_v52 = vld [vmem:[#allocation7 + $0x50] ss:$12 sps:$4 sm:$0xff]   ;;  %v2468_v55 = vld [vmem:[#allocation7 + $0x38] ss:$12 sps:$4 sm:$0xff]   ;;  %v2475_v57 = vld [vmem:[#allocation7 + $0x20] ss:$12 sps:$4 sm:$0xff]  }
  0x47   :  { %312 = vmatpush1.bf16.msra.mxu0 %v2029_v13  ;;  %818 = vperm.xlu0 %2013, %v816_v47   ;;  %v2483_v58 = vld [vmem:[#allocation7 + $0x8] ss:$12 sps:$4 sm:$0xff]   ;;  %v138_v61 = vsub.s32 0, %v137_v60  ;;  %v87_v62 = vld [vmem:[%s2903_s4] sm:$0x7]  ;;  %v142_v1 = vsub.s32 1, %v137_v60 }
  0x48   :  { %313 = vmatprep.subr.bf16.mxu0 %v2030_v15  ;;  %v146_v4 = vsub.s32 2, %v137_v60  ;;  %vm1037_vm8 = vcmp.gt.s32.totalorder %v2410_v36, 3  ;;  %vm1259_vm9 = vcmp.gt.s32.totalorder %v2410_v36, 5  ;;  %vm1481_vm10 = vcmp.gt.s32.totalorder %v2410_v36, 7  ;;  %s2316_s30 = smov [#allocation10]  }
  0x49   :  { %1806 = vmatpush3.bf16.msra.mxu1 %v2054_v19  ;;  %v139_v3 = vrot.slane %v87_v62, %v138_v61  ;;  %v143_v6 = vrot.slane %v87_v62, %v142_v1  ;;  %s1609_s9 = sshll.u32 %s2316_s30, 4  ;;  %s1610_s9 = int_to_ptr.vmem [resolvable:$true] %s1609_s9 }
  0x4a   :  { %1807 = vmatprep.subr.bf16.mxu1 %v2058_v22  ;;  %v2528_v10 = vrot.slane %v87_v62, %v146_v4  ;;  %s2277_s10 = scalar_lea.vmem %s1610_s9, 128  ;;  %p2282_p7 = scmp.lt.s32.totalorder %s1610_s9, %s1610_s9 }
  0x4b   :  { %314 = vmatpush1.bf16.msra.mxu0 %v2032_v17  ;;  %1151 = vperm.xlu0 %2013, %v1149_v53   ;;  %p2278_p6 = scmp.ne.s32.totalorder %s1610_s9, %s2277_s10  ;;  %p2283_p8 = scmp.lt.s32.totalorder %s2277_s10, %s2277_s10 }
  0x4c   :  { %315 = vmatprep.subr.bf16.mxu0 %v2033_v18 }
  0x4d   :  { %1808 = vmatpush3.bf16.msra.mxu1 %v2058_v22  ;;  %p2284_p9 = por %p2283_p8, %p2282_p7 }
  0x4e   :  { %1809 = vmatprep.subr.bf16.mxu1 %v2063_v25 }
  0x4f   :  { %316 = vmatpush1.bf16.msra.mxu0 %v2035_v20  ;;  %1373 = vperm.xlu0 %2013, %v1371_v56   ;;  %p2285_p10 = pnand %p2284_p9, %p2278_p6 }
  0x50   :  { %317 = vmatprep.subr.bf16.mxu0 %v2037_v21 }
  0x51   :  { %1810 = vmatpush3.bf16.msra.mxu1 %v2063_v25 }
  0x52   :  { %1811 = vmatprep.subr.bf16.mxu1 %v2067_v28 }
  0x53   :  { %318 = vmatpush1.bf16.msra.mxu0 %v2039_v23 }
  0x54   :  { %601 = vmatprep.subr.bf16.mxu0 %v2383_v24 }
  0x55   :  { %1812 = vmatpush3.bf16.msra.mxu1 %v2067_v28 }
  0x56   :  { %336 = vmatmul.mubr.bf16.vlgmr.msra.gmra.mxu0 %v2041_v12  ;;  %1821 = vmatprep.subr.bf16.mxu1 %v2910_v38 }
  0x57   :  { %602 = vmatpush1.bf16.msra.mxu0 %v2385_v26  ;;  %345 = vmatprep.mubr.bf16.mxu0 %v2908_v0 }
  0x58   :  { %603 = vmatprep.subr.bf16.mxu0 %v2388_v27  ;;  %1814 = vmatmul.mubr.bf16.vlgmr.msra.gmra.mxu1 %v2050_v31 }
  0x59   :  { %1822 = vmatpush3.bf16.msra.mxu1 %v2405_v35  ;;  %1817 = vmatprep.mubr.bf16.mxu1 %v2059_v39 }
  0x5a   :  { %1823 = vmatprep.subr.bf16.mxu1 %v2910_v38 }
  0x5b   :  { %604 = vmatpush1.bf16.msra.mxu0 %v2391_v29 }
  0x5c   :  { %605 = vmatprep.subr.bf16.mxu0 %v2395_v30 }
  0x5d   :  { %1824 = vmatpush3.bf16.msra.mxu1 %v2418_v40 }
  0x5e   :  { %346 = vmatmul.mubr.bf16.gmra.mxu0 %v2050_v31  ;;  %1825 = vmatprep.subr.bf16.mxu1 %v2910_v38 }
  0x5f   :  { %606 = vmatpush1.bf16.msra.mxu0 %v2398_v32  ;;  %355 = vmatprep.mubr.bf16.mxu0 %v2908_v0 }
  0x60   :  { %607 = vmatprep.subr.bf16.mxu0 %v2401_v33  ;;  %1818 = vmatmul.mubr.bf16.gmra.mxu1 %v2068_v45 }
  0x61   :  { %1826 = vmatpush3.bf16.msra.mxu1 %v2432_v44  ;;  %1837 = vmatprep.mubr.msk.bf16.mxu1 %vm2315_vm2, %v2910_v38 }
  0x62   :  { %1827 = vmatprep.subr.bf16.mxu1 %v2910_v38 }
  0x63   :  { %608 = vmatpush1.bf16.msra.mxu0 %v2403_v34 }
  0x64   :  { %609 = vmatprep.subr.bf16.mxu0 %v2412_v37 }
  0x65   :  { %1828 = vmatpush3.bf16.msra.mxu1 %v2444_v49 }
  0x66   :  { %356 = vmatmul.mubr.bf16.gmra.mxu0 %v2059_v39  ;;  %1829 = vmatprep.subr.bf16.mxu1 %v2910_v38 }
  0x67   :  { %610 = vmatpush1.bf16.msra.mxu0 %v2422_v42  ;;  %365 = vmatprep.mubr.bf16.mxu0 %v2908_v0 }
  0x68   :  { %611 = vmatprep.subr.bf16.mxu0 %v2425_v43 }
  0x69   :  { %1830 = vmatpush3.bf16.msra.mxu1 %v2457_v52 }
  0x6a   :  { %1831 = vmatprep.subr.bf16.mxu1 %v2910_v38 }
  0x6b   :  { %612 = vmatpush1.bf16.msra.mxu0 %v2436_v46 }
  0x6c   :  { %613 = vmatprep.subr.bf16.mxu0 %v2441_v48 }
  0x6d   :  { %1832 = vmatpush3.bf16.msra.mxu1 %v2468_v55 }
  0x6e   :  { %366 = vmatmul.mubr.bf16.gmra.mxu0 %v2068_v45  ;;  %1833 = vmatprep.subr.bf16.mxu1 %v2910_v38 }
  0x6f   :  { %614 = vmatpush1.bf16.msra.mxu0 %v2451_v50  ;;  %633 = vmatprep.mubr.bf16.mxu0 %v2908_v0 }
  0x70   :  { %615 = vmatprep.subr.bf16.mxu0 %v2454_v51 }
  0x71   :  { %1834 = vmatpush3.bf16.msra.mxu1 %v2475_v57 }
  0x72   :  { %1835 = vmatprep.subr.bf16.mxu1 %v2910_v38 }
  0x73   :  { %616 = vmatpush1.bf16.msra.mxu0 %v2463_v54 }
  0x74   :  { %712 = vmatprep.subr.bf16.mxu0 %v2383_v24 }
  0x75   :  { %1836 = vmatpush3.bf16.msra.mxu1 %v2483_v58 }
  0x76   :  { %634 = vmatmul.mubr.bf16.vlgmr.msra.gmra.mxu0 %v2908_v0  ;;  %1841 = vmatprep.subr.bf16.mxu1 %v2910_v38 }
  0x77   :  { %713 = vmatpush1.bf16.msra.mxu0 %v2385_v26  ;;  %744 = vmatprep.mubr.bf16.mxu0 %v2908_v0 }
  0x78   :  { %714 = vmatprep.subr.bf16.mxu0 %v2388_v27  ;;  %1838 = vmatmul.mubr.bf16.vlgmr.msra.gmra.mxu1 %v2908_v0 }
  0x79   :  { %1842 = vmatpush3.bf16.msra.mxu1 %v2405_v35  ;;  %1857 = vmatprep.mubr.msk.bf16.mxu1 %vm2315_vm2, %v2910_v38 }
  0x7a   :  { %1843 = vmatprep.subr.bf16.mxu1 %v2910_v38 }
  0x7b   :  { %715 = vmatpush1.bf16.msra.mxu0 %v2391_v29 }
  0x7c   :  { %716 = vmatprep.subr.bf16.mxu0 %v2395_v30 }
  0x7d   :  { %1844 = vmatpush3.bf16.msra.mxu1 %v2418_v40 }
  0x7e   :  { %1845 = vmatprep.subr.bf16.mxu1 %v2910_v38 }
  0x7f   :  { %717 = vmatpush1.bf16.msra.mxu0 %v2398_v32 }
  0x80   :  { %718 = vmatprep.subr.bf16.mxu0 %v2401_v33 }
  0x81   :  { %1846 = vmatpush3.bf16.msra.mxu1 %v2432_v44 }
  0x82   :  { %1847 = vmatprep.subr.bf16.mxu1 %v2910_v38 }
  0x83   :  { %719 = vmatpush1.bf16.msra.mxu0 %v2403_v34 }
  0x84   :  { %720 = vmatprep.subr.bf16.mxu0 %v2412_v37 }
  0x85   :  { %1848 = vmatpush3.bf16.msra.mxu1 %v2444_v49 }
  0x86   :  { %1849 = vmatprep.subr.bf16.mxu1 %v2910_v38 }
  0x87   :  { %721 = vmatpush1.bf16.msra.mxu0 %v2422_v42 }
  0x88   :  { %722 = vmatprep.subr.bf16.mxu0 %v2425_v43 }
  0x89   :  { %1850 = vmatpush3.bf16.msra.mxu1 %v2457_v52 }
  0x8a   :  { %1851 = vmatprep.subr.bf16.mxu1 %v2910_v38 }
  0x8b   :  { %723 = vmatpush1.bf16.msra.mxu0 %v2436_v46 }
  0x8c   :  { %724 = vmatprep.subr.bf16.mxu0 %v2441_v48 }
  0x8d   :  { %1852 = vmatpush3.bf16.msra.mxu1 %v2468_v55 }
  0x8e   :  { %1853 = vmatprep.subr.bf16.mxu1 %v2910_v38 }
  0x8f   :  { %725 = vmatpush1.bf16.msra.mxu0 %v2451_v50 }
  0x90   :  { %726 = vmatprep.subr.bf16.mxu0 %v2454_v51 }
  0x91   :  { %1854 = vmatpush3.bf16.msra.mxu1 %v2475_v57 }
  0x92   :  { %1855 = vmatprep.subr.bf16.mxu1 %v2910_v38 }
  0x93   :  { %727 = vmatpush1.bf16.msra.mxu0 %v2463_v54 }
  0x94   :  { %823 = vmatprep.subr.bf16.mxu0 %v2383_v24 }
  0x95   :  { %1856 = vmatpush3.bf16.msra.mxu1 %v2483_v58 }
  0x96   :  { %1861 = vmatprep.subr.bf16.mxu1 %v2910_v38 }
 0x116   :  { %v337_v63 = vpop.f32.mrf.mxu0 }
 0x118   :  { %v339_v2 = vpop.f32.mrf.mxu0  ;;  %v1815_v14 = vpop.f32.mrf.mxu1 }
 0x119   :  { %v2535_v16 = vadd.f32 %v1815_v14, %v2528_v10 }
 0x11a   :  { %v341_v5 = vpop.f32.mrf.mxu0  ;;  %v410_v18 = vpop.f32.mrf.mxu1 }
 0x11b   :  { %v2524_v7 = vadd.f32 %v341_v5, %v139_v3 }
 0x11c   :  { %v343_v8 = vpop.f32.mrf.mxu0  ;;  %v1816_v21 = vpop.f32.mrf.mxu1 }
 0x11d   :  { %v2526_v9 = vadd.f32 %v343_v8, %v143_v6  ;;  %v2542_v23 = vadd.f32 %v1816_v21, %v2528_v10 }
 0x11e   :  { %v347_v11 = vpop.f32.mrf.mxu0  ;;  %v413_v28 = vpop.f32.mrf.mxu1 }
 0x11f   :  { %v2530_v12 = vadd.f32 %v347_v11, %v139_v3  ;;  %v2547_v39 = vadd.f32 %v413_v28, %v2528_v10 }
 0x120   :  { %v349_v13 = vpop.f32.mrf.mxu0  ;;  %v1819_v45 = vpop.f32.mrf.mxu1 }
 0x121   :  { %v2532_v15 = vadd.f32 %v349_v13, %v143_v6  ;;  %v2552_v53 = vadd.f32 %v1819_v45, %v2528_v10 }
 0x122   :  { %v351_v17 = vpop.f32.mrf.mxu0  ;;  %v426_v59 = vpop.f32.mrf.mxu1 }
 0x123   :  { %v2537_v19 = vadd.f32 %v351_v17, %v139_v3  ;;  %2912 = vst [vmem:[#allocation15_spill] sm:$0xff] %v2552_v53  ;;  %v2557_v61 = vadd.f32 %v426_v59, %v2528_v10 }
 0x124   :  { %v353_v20 = vpop.f32.mrf.mxu0  ;;  %v1820_v1 = vpop.f32.mrf.mxu1 }
 0x125   :  { %v2539_v22 = vadd.f32 %v353_v20, %v143_v6  ;;  %v2562_v5 = vadd.f32 %v1820_v1, %v2528_v10 }
 0x126   :  { %v357_v25 = vpop.f32.mrf.mxu0  ;;  %v429_v11 = vpop.f32.mrf.mxu1 }
 0x127   :  { %v2544_v31 = vadd.f32 %v357_v25, %v139_v3  ;;  %2913 = vst [vmem:[#allocation16_spill] sm:$0xff] %v2562_v5  ;;  %v2567_v14 = vadd.f32 %v429_v11, %v2528_v10 }
 0x128   :  { %v359_v41 = vpop.f32.mrf.mxu0 }
 0x129   :  { %v2549_v47 = vadd.f32 %v359_v41, %v143_v6  ;;  %v338_v41 = vadd.f32 %v337_v63, %v139_v3 }
 0x12a   :  { %v361_v56 = vpop.f32.mrf.mxu0 }
 0x12b   :  { %v2554_v60 = vadd.f32 %v361_v56, %v139_v3 }
 0x12c   :  { %v363_v62 = vpop.f32.mrf.mxu0 }
 0x12d   :  { %v2559_v4 = vadd.f32 %v363_v62, %v143_v6 }
 0x12e   :  { %v367_v8 = vpop.f32.mrf.mxu0 }
 0x12f   :  { %v2564_v13 = vadd.f32 %v367_v8, %v139_v3  ;;  %v340_v8 = vadd.f32 %v339_v2, %v143_v6 }
 0x130   :  { %v369_v17 = vpop.f32.mrf.mxu0 }
 0x131   :  { %2914 = vst [vmem:[#allocation17_spill] sm:$0xff] %v2564_v13  ;;  %v2569_v20 = vadd.f32 %v369_v17, %v143_v6 }
 0x132   :  { %v371_v21 = vpop.f32.mrf.mxu0 }
 0x133   :  { %2915 = vst [vmem:[#allocation18_spill] sm:$0xff] %v2569_v20  ;;  %v2571_v25 = vadd.f32 %v371_v21, %v139_v3  ;;  %v2578_v3 = vld [vmem:[%s2904_s5] ss:$0 sm:$0xff] }
 0x134   :  { %v373_v28 = vpop.f32.mrf.mxu0 }
 0x135   :  { %2916 = vst [vmem:[#allocation19_spill] sm:$0xff] %v2571_v25  ;;  %v2573_v45 = vadd.f32 %v373_v28, %v143_v6  ;;  %v411_v6 = vadd.f32 %v410_v18, %v2528_v10  ;;  %v2917_v18 = vmov 0.0  }
 0x136   :  { %v635_v56 = vpop.f32.mrf.mxu0 }
 0x137   :  { %v682_v59 = vadd.f32 %v635_v56, %v338_v41 }
 0x138   :  { %v637_v62 = vpop.f32.mrf.mxu0  ;;  %v676_v5 = vpop.f32.mrf.mxu1 }
 0x139   :  { %v1673_v1 = vmul.f32 -1.442695, %v682_v59  ;;  %v689_v11 = vadd.f32 %v637_v62, %v340_v8  ;;  %v696_v2 = vadd.f32 %v2578_v3, %v676_v5  ;;  %v2918_v5 = vmov 0  }
 0x13a   :  { %v639_v0 = vpop.f32.mrf.mxu0  ;;  %v1839_v17 = vpop.f32.mrf.mxu1  ;;  %v1038_v8 = vsel %vm1037_vm8, 1, %v2918_v5 }
 0x13b   :  { %2091 = vpow2.f32 %v1673_v1  ;;  %v1674_v53 = vmul.f32 -1.442695, %v689_v11  ;;  %v927_v1 = vsel %vm926_vm7, 1, %v2918_v5  ;;  %v1260_v11 = vsel %vm1259_vm9, 1, %v2918_v5 }
 0x13c   :  { %v640_v38 = vpop.f32.mrf.mxu0  ;;  %v679_v20 = vpop.f32.mrf.mxu1  ;;  %929 = vperm.xlu1 %2014, %v927_v1   ;;  %v1482_v17 = vsel %vm1481_vm10, 1, %v2918_v5 }
 0x13d   :  { %2093 = vpow2.f32 %v1674_v53 }
 0x13e   :  { %v1840_v21 = vpop.f32.mrf.mxu1 }
 0x140   :  { %1040 = vperm.xlu1 %2014, %v1038_v8  }
 0x144   :  { %1262 = vperm.xlu1 %2014, %v1260_v11  }
 0x148   :  { %v2092_v25 = vpop.eup %2091  ;;  %1484 = vperm.xlu1 %2014, %v1482_v17  }
 0x149   :  { %v686_v13 = vadd.f32 1.0, %v2092_v25 }
 0x14a   :  { %v2094_v63 = vpop.eup %2093 }
 0x14b   :  { %2095 = vrcp.f32 %v686_v13  ;;  %v693_v0 = vadd.f32 1.0, %v2094_v63  ;;  %v2582_v13 = vpop.permute.xlu0 %707 }
 0x14c   :  { %vm709_vm5 = vcmp.eq.s32.totalorder %v2582_v13, 1 }
 0x14d   :  { %2097 = vrcp.f32 %v693_v0  ;;  %vm1675_vm6 = vmpackc.low %vm709_vm5, %vm709_vm5 }
 0x158   :  { %v2096_v38 = vpop.eup %2095 }
 0x159   :  { %v697_v28 = vmul.f32 %v2096_v38, %v696_v2 }
 0x15a   :  { %v2098_v53 = vpop.eup %2097 }
 0x15b   :  { %v698_v20 = vadd.f32 %v697_v28, %v411_v6  ;;  %v700_v41 = vsub.f32 1.0, %v2098_v53  ;;  %v702_v59 = vmul.f32 0.0, %v2098_v53 }
 0x15d   :  { %2099 = vtanh.f32 %v698_v20 }
 0x16a   :  { %v2100_v25 = vpop.eup %2099 }
 0x16b   :  { %v701_v56 = vmul.f32 %v2100_v25, %v700_v41 }
 0x16d   :  { %v2585_v62 = vadd.f32 %v702_v59, %v701_v56 }
 0x16f   :  { %v1676_v10 = vpack.c.bf16 %v2585_v62, %v2585_v62 }
 0x171   :  { %1677 = vmatmul.mubr.msk.bf16.vlgmr.msra.gmra.mxu0 %vm1675_vm6, %v1676_v10  ;;  %1858 = vmatmul.mubr.msk.bf16.vlgmr.msra.gmra.mxu1 %vm1675_vm6, %v1676_v10 }
 0x172   :  { %824 = vmatpush1.bf16.msra.mxu0 %v2385_v26  ;;  %1862 = vmatpush3.bf16.msra.mxu1 %v2405_v35 }
 0x173   :  { %825 = vmatprep.subr.bf16.mxu0 %v2388_v27  ;;  %1863 = vmatprep.subr.bf16.mxu1 %v2917_v18 }
 0x174   :  { %855 = vmatprep.mubr.bf16.mxu0 %v2918_v5  ;;  %1877 = vmatprep.mubr.msk.bf16.mxu1 %vm2315_vm2, %v2917_v18 }
 0x176   :  { %826 = vmatpush1.bf16.msra.mxu0 %v2391_v29  ;;  %1864 = vmatpush3.bf16.msra.mxu1 %v2418_v40 }
 0x177   :  { %827 = vmatprep.subr.bf16.mxu0 %v2395_v30  ;;  %1865 = vmatprep.subr.bf16.mxu1 %v2917_v18 }
 0x17a   :  { %828 = vmatpush1.bf16.msra.mxu0 %v2398_v32  ;;  %1866 = vmatpush3.bf16.msra.mxu1 %v2432_v44 }
 0x17b   :  { %829 = vmatprep.subr.bf16.mxu0 %v2401_v33  ;;  %1867 = vmatprep.subr.bf16.mxu1 %v2917_v18 }
 0x17e   :  { %830 = vmatpush1.bf16.msra.mxu0 %v2403_v34  ;;  %1868 = vmatpush3.bf16.msra.mxu1 %v2444_v49 }
 0x17f   :  { %831 = vmatprep.subr.bf16.mxu0 %v2412_v37  ;;  %1869 = vmatprep.subr.bf16.mxu1 %v2917_v18 }
 0x182   :  { %832 = vmatpush1.bf16.msra.mxu0 %v2422_v42  ;;  %1870 = vmatpush3.bf16.msra.mxu1 %v2457_v52 }
 0x183   :  { %833 = vmatprep.subr.bf16.mxu0 %v2425_v43  ;;  %1871 = vmatprep.subr.bf16.mxu1 %v2917_v18 }
 0x186   :  { %834 = vmatpush1.bf16.msra.mxu0 %v2436_v46  ;;  %1872 = vmatpush3.bf16.msra.mxu1 %v2468_v55 }
 0x187   :  { %835 = vmatprep.subr.bf16.mxu0 %v2441_v48  ;;  %1873 = vmatprep.subr.bf16.mxu1 %v2917_v18 }
 0x18a   :  { %836 = vmatpush1.bf16.msra.mxu0 %v2451_v50  ;;  %1874 = vmatpush3.bf16.msra.mxu1 %v2475_v57 }
 0x18b   :  { %837 = vmatprep.subr.bf16.mxu0 %v2454_v51  ;;  %1875 = vmatprep.subr.bf16.mxu1 %v2917_v18 }
 0x18e   :  { %838 = vmatpush1.bf16.msra.mxu0 %v2463_v54  ;;  %1876 = vmatpush3.bf16.msra.mxu1 %v2483_v58 }
 0x18f   :  { %934 = vmatprep.subr.bf16.mxu0 %v2383_v24  ;;  %1881 = vmatprep.subr.bf16.mxu1 %v2917_v18 }
 0x231   :  { %v746_v21 = vpop.f32.mrf.mxu0  ;;  %v787_v63 = vpop.f32.mrf.mxu1 }
 0x232   :  { %v793_v0 = vadd.f32 %v746_v21, %v2524_v7  ;;  %v807_v7 = vadd.f32 %v2578_v3, %v787_v63 }
 0x233   :  { %v748_v2 = vpop.f32.mrf.mxu0  ;;  %v1859_v38 = vpop.f32.mrf.mxu1 }
 0x234   :  { %v1681_v6 = vmul.f32 -1.442695, %v793_v0  ;;  %v800_v28 = vadd.f32 %v748_v2, %v2526_v9  ;;  %v710_v9 = vsel %vm709_vm5, %v2585_v62, 0.0 }
 0x235   :  { %v750_v20 = vpop.f32.mrf.mxu0  ;;  %v790_v53 = vpop.f32.mrf.mxu1 }
 0x236   :  { %2101 = vpow2.f32 %v1681_v6  ;;  %v1682_v41 = vmul.f32 -1.442695, %v800_v28  ;;  %v819_v28 = vpop.permute.xlu0 %818 }
 0x237   :  { %v751_v25 = vpop.f32.mrf.mxu0  ;;  %v1860_v56 = vpop.f32.mrf.mxu1  ;;  %vm820_vm11 = vcmp.eq.s32.totalorder %v819_v28, 1 }
 0x238   :  { %2103 = vpow2.f32 %v1682_v41 }
 0x243   :  { %v2102_v36 = vpop.eup %2101 }
 0x244   :  { %v797_v59 = vadd.f32 1.0, %v2102_v36 }
 0x245   :  { %v2104_v10 = vpop.eup %2103 }
 0x246   :  { %2105 = vrcp.f32 %v797_v59  ;;  %v804_v1 = vadd.f32 1.0, %v2104_v10 }
 0x248   :  { %2107 = vrcp.f32 %v804_v1 }
 0x253   :  { %v2106_v8 = vpop.eup %2105 }
 0x254   :  { %v808_v11 = vmul.f32 %v2106_v8, %v807_v7 }
 0x255   :  { %v2108_v17 = vpop.eup %2107 }
 0x256   :  { %v809_v21 = vadd.f32 %v808_v11, %v2547_v39  ;;  %v813_v0 = vmul.f32 %v2108_v17, %v710_v9  ;;  %v811_v2 = vsub.f32 1.0, %v2108_v17 }
 0x258   :  { %2109 = vtanh.f32 %v809_v21 }
 0x265   :  { %v2110_v38 = vpop.eup %2109 }
 0x266   :  { %v812_v6 = vmul.f32 %v2110_v38, %v811_v2 }
 0x268   :  { %v814_v20 = vadd.f32 %v813_v0, %v812_v6 }
 0x26a   :  { %v2642_v53 = vsel %vm820_vm11, %v814_v20, %v710_v9 }
 0x26b   :  { %v822_v63 = vpack.c.bf16 %v2642_v53, %v2642_v53 }
 0x26d   :  { %856 = vmatmul.mubr.bf16.vlgmr.msra.gmra.mxu0 %v822_v63  ;;  %1878 = vmatmul.mubr.bf16.vlgmr.msra.gmra.mxu1 %v822_v63 }
 0x26e   :  { %935 = vmatpush1.bf16.msra.mxu0 %v2385_v26  ;;  %1882 = vmatpush3.bf16.msra.mxu1 %v2405_v35 }
 0x26f   :  { %936 = vmatprep.subr.bf16.mxu0 %v2388_v27  ;;  %1883 = vmatprep.subr.bf16.mxu1 %v2917_v18 }
 0x270   :  { %966 = vmatprep.mubr.bf16.mxu0 %v2918_v5  ;;  %1897 = vmatprep.mubr.msk.bf16.mxu1 %vm2315_vm2, %v2917_v18 }
 0x272   :  { %937 = vmatpush1.bf16.msra.mxu0 %v2391_v29  ;;  %1884 = vmatpush3.bf16.msra.mxu1 %v2418_v40 }
 0x273   :  { %938 = vmatprep.subr.bf16.mxu0 %v2395_v30  ;;  %1885 = vmatprep.subr.bf16.mxu1 %v2917_v18 }
 0x276   :  { %939 = vmatpush1.bf16.msra.mxu0 %v2398_v32  ;;  %1886 = vmatpush3.bf16.msra.mxu1 %v2432_v44 }
 0x277   :  { %940 = vmatprep.subr.bf16.mxu0 %v2401_v33  ;;  %1887 = vmatprep.subr.bf16.mxu1 %v2917_v18 }
 0x27a   :  { %941 = vmatpush1.bf16.msra.mxu0 %v2403_v34  ;;  %1888 = vmatpush3.bf16.msra.mxu1 %v2444_v49 }
 0x27b   :  { %942 = vmatprep.subr.bf16.mxu0 %v2412_v37  ;;  %1889 = vmatprep.subr.bf16.mxu1 %v2917_v18 }
 0x27e   :  { %943 = vmatpush1.bf16.msra.mxu0 %v2422_v42  ;;  %1890 = vmatpush3.bf16.msra.mxu1 %v2457_v52 }
 0x27f   :  { %944 = vmatprep.subr.bf16.mxu0 %v2425_v43  ;;  %1891 = vmatprep.subr.bf16.mxu1 %v2917_v18 }
 0x282   :  { %945 = vmatpush1.bf16.msra.mxu0 %v2436_v46  ;;  %1892 = vmatpush3.bf16.msra.mxu1 %v2468_v55 }
 0x283   :  { %946 = vmatprep.subr.bf16.mxu0 %v2441_v48  ;;  %1893 = vmatprep.subr.bf16.mxu1 %v2917_v18 }
 0x286   :  { %947 = vmatpush1.bf16.msra.mxu0 %v2451_v50  ;;  %1894 = vmatpush3.bf16.msra.mxu1 %v2475_v57 }
 0x287   :  { %948 = vmatprep.subr.bf16.mxu0 %v2454_v51  ;;  %1895 = vmatprep.subr.bf16.mxu1 %v2917_v18 }
 0x28a   :  { %949 = vmatpush1.bf16.msra.mxu0 %v2463_v54  ;;  %1896 = vmatpush3.bf16.msra.mxu1 %v2483_v58 }
 0x28b   :  { %1045 = vmatprep.subr.bf16.mxu0 %v2383_v24  ;;  %1901 = vmatprep.subr.bf16.mxu1 %v2917_v18 }
 0x32d   :  { %v857_v39 = vpop.f32.mrf.mxu0  ;;  %v898_v62 = vpop.f32.mrf.mxu1 }
 0x32e   :  { %v904_v41 = vadd.f32 %v857_v39, %v2530_v12  ;;  %v918_v2 = vadd.f32 %v2578_v3, %v898_v62  ;;  %v930_v39 = vpop.permute.xlu1 %929 }
 0x32f   :  { %v859_v25 = vpop.f32.mrf.mxu0  ;;  %v1879_v56 = vpop.f32.mrf.mxu1  ;;  %vm931_vm12 = vcmp.eq.s32.totalorder %v930_v39, 1 }
 0x330   :  { %v1683_v36 = vmul.f32 -1.442695, %v904_v41  ;;  %v911_v8 = vadd.f32 %v859_v25, %v2532_v15 }
 0x331   :  { %v861_v59 = vpop.f32.mrf.mxu0  ;;  %v901_v10 = vpop.f32.mrf.mxu1 }
 0x332   :  { %2111 = vpow2.f32 %v1683_v36  ;;  %v1684_v11 = vmul.f32 -1.442695, %v911_v8 }
 0x333   :  { %v862_v1 = vpop.f32.mrf.mxu0  ;;  %v1880_v7 = vpop.f32.mrf.mxu1 }
 0x334   :  { %2113 = vpow2.f32 %v1684_v11 }
 0x33f   :  { %v2112_v17 = vpop.eup %2111 }
 0x340   :  { %v908_v9 = vadd.f32 1.0, %v2112_v17 }
 0x341   :  { %v2114_v21 = vpop.eup %2113 }
 0x342   :  { %2115 = vrcp.f32 %v908_v9  ;;  %v915_v0 = vadd.f32 1.0, %v2114_v21 }
 0x344   :  { %2117 = vrcp.f32 %v915_v0 }
 0x34f   :  { %v2116_v12 = vpop.eup %2115 }
 0x350   :  { %v919_v38 = vmul.f32 %v2116_v12, %v918_v2 }
 0x351   :  { %v2118_v28 = vpop.eup %2117 }
 0x352   :  { %v920_v6 = vadd.f32 %v919_v38, %v2535_v16  ;;  %v922_v20 = vsub.f32 1.0, %v2118_v28  ;;  %v924_v41 = vmul.f32 %v2118_v28, %v2642_v53 }
 0x354   :  { %2119 = vtanh.f32 %v920_v6 }
 0x361   :  { %v2120_v63 = vpop.eup %2119 }
 0x362   :  { %v923_v15 = vmul.f32 %v2120_v63, %v922_v20 }
 0x364   :  { %v925_v25 = vadd.f32 %v924_v41, %v923_v15  ;;  %v1041_v41 = vpop.permute.xlu1 %1040 }
 0x365   :  { %vm1042_vm13 = vcmp.eq.s32.totalorder %v1041_v41, 1  ;;  %v2822_v41 = vld [vmem:[#allocation7 + $0x48] ss:$12 sps:$4 sm:$0xff]  }
 0x366   :  { %v2687_v56 = vsel %vm931_vm12, %v925_v25, %v2642_v53 }
 0x367   :  { %v933_v62 = vpack.c.bf16 %v2687_v56, %v2687_v56 }
 0x369   :  { %967 = vmatmul.mubr.bf16.vlgmr.msra.gmra.mxu0 %v933_v62  ;;  %1898 = vmatmul.mubr.bf16.vlgmr.msra.gmra.mxu1 %v933_v62 }
 0x36a   :  { %1046 = vmatpush1.bf16.msra.mxu0 %v2385_v26  ;;  %1902 = vmatpush3.bf16.msra.mxu1 %v2405_v35 }
 0x36b   :  { %1047 = vmatprep.subr.bf16.mxu0 %v2388_v27  ;;  %1903 = vmatprep.subr.bf16.mxu1 %v2917_v18 }
 0x36c   :  { %1077 = vmatprep.mubr.bf16.mxu0 %v2918_v5  ;;  %1917 = vmatprep.mubr.msk.bf16.mxu1 %vm2315_vm2, %v2917_v18 }
 0x36e   :  { %1048 = vmatpush1.bf16.msra.mxu0 %v2391_v29  ;;  %1904 = vmatpush3.bf16.msra.mxu1 %v2418_v40 }
 0x36f   :  { %1049 = vmatprep.subr.bf16.mxu0 %v2395_v30  ;;  %1905 = vmatprep.subr.bf16.mxu1 %v2917_v18 }
 0x372   :  { %1050 = vmatpush1.bf16.msra.mxu0 %v2398_v32  ;;  %1906 = vmatpush3.bf16.msra.mxu1 %v2432_v44 }
 0x373   :  { %1051 = vmatprep.subr.bf16.mxu0 %v2401_v33  ;;  %1907 = vmatprep.subr.bf16.mxu1 %v2917_v18 }
 0x376   :  { %1052 = vmatpush1.bf16.msra.mxu0 %v2403_v34  ;;  %1908 = vmatpush3.bf16.msra.mxu1 %v2444_v49 }
 0x377   :  { %1053 = vmatprep.subr.bf16.mxu0 %v2412_v37  ;;  %1909 = vmatprep.subr.bf16.mxu1 %v2917_v18 }
 0x37a   :  { %1054 = vmatpush1.bf16.msra.mxu0 %v2422_v42  ;;  %1910 = vmatpush3.bf16.msra.mxu1 %v2457_v52 }
 0x37b   :  { %1055 = vmatprep.subr.bf16.mxu0 %v2425_v43  ;;  %1911 = vmatprep.subr.bf16.mxu1 %v2917_v18 }
 0x37e   :  { %1056 = vmatpush1.bf16.msra.mxu0 %v2436_v46  ;;  %1912 = vmatpush3.bf16.msra.mxu1 %v2468_v55 }
 0x37f   :  { %1057 = vmatprep.subr.bf16.mxu0 %v2441_v48  ;;  %1913 = vmatprep.subr.bf16.mxu1 %v2917_v18 }
 0x382   :  { %1058 = vmatpush1.bf16.msra.mxu0 %v2451_v50  ;;  %1914 = vmatpush3.bf16.msra.mxu1 %v2475_v57 }
 0x383   :  { %1059 = vmatprep.subr.bf16.mxu0 %v2454_v51  ;;  %1915 = vmatprep.subr.bf16.mxu1 %v2917_v18 }
 0x386   :  { %1060 = vmatpush1.bf16.msra.mxu0 %v2463_v54  ;;  %1916 = vmatpush3.bf16.msra.mxu1 %v2483_v58 }
 0x387   :  { %1156 = vmatprep.subr.bf16.mxu0 %v2383_v24  ;;  %1921 = vmatprep.subr.bf16.mxu1 %v2917_v18 }
 0x429   :  { %v968_v16 = vpop.f32.mrf.mxu0  ;;  %v1009_v53 = vpop.f32.mrf.mxu1 }
 0x42a   :  { %v1015_v36 = vadd.f32 %v968_v16, %v2537_v19  ;;  %v1029_v38 = vadd.f32 %v2578_v3, %v1009_v53 }
 0x42b   :  { %v970_v59 = vpop.f32.mrf.mxu0  ;;  %v1899_v10 = vpop.f32.mrf.mxu1 }
 0x42c   :  { %v1685_v1 = vmul.f32 -1.442695, %v1015_v36  ;;  %v1022_v9 = vadd.f32 %v970_v59, %v2539_v22 }
 0x42d   :  { %v972_v7 = vpop.f32.mrf.mxu0  ;;  %v1012_v8 = vpop.f32.mrf.mxu1 }
 0x42e   :  { %2121 = vpow2.f32 %v1685_v1  ;;  %v1686_v21 = vmul.f32 -1.442695, %v1022_v9 }
 0x42f   :  { %v973_v11 = vpop.f32.mrf.mxu0  ;;  %v1900_v17 = vpop.f32.mrf.mxu1 }
 0x430   :  { %2123 = vpow2.f32 %v1686_v21 }
 0x43b   :  { %v2122_v0 = vpop.eup %2121 }
 0x43c   :  { %v1019_v24 = vadd.f32 1.0, %v2122_v0  ;;  %v1152_v0 = vpop.permute.xlu0 %1151 }
 0x43d   :  { %v2124_v2 = vpop.eup %2123  ;;  %vm1153_vm14 = vcmp.eq.s32.totalorder %v1152_v0, 1 }
 0x43e   :  { %2125 = vrcp.f32 %v1019_v24  ;;  %v1026_v12 = vadd.f32 1.0, %v2124_v2 }
 0x440   :  { %2127 = vrcp.f32 %v1026_v12 }
 0x44b   :  { %v2126_v19 = vpop.eup %2125 }
 0x44c   :  { %v1030_v6 = vmul.f32 %v2126_v19, %v1029_v38  ;;  %v2783_v38 = vld [vmem:[#allocation7 + $0xa8] ss:$12 sps:$4 sm:$0xff]  }
 0x44d   :  { %v2128_v20 = vpop.eup %2127  ;;  %v2789_v19 = vld [vmem:[#allocation7 + $0x94] ss:$12 sps:$4 sm:$0xff]  }
 0x44e   :  { %v1031_v28 = vadd.f32 %v1030_v6, %v2542_v23  ;;  %v1033_v63 = vsub.f32 1.0, %v2128_v20  ;;  %v1035_v22 = vmul.f32 %v2128_v20, %v2687_v56  ;;  %v2796_v6 = vld [vmem:[#allocation7 + $0x90] ss:$12 sps:$4 sm:$0xff]  }
 0x44f   :  { %v2802_v20 = vld [vmem:[#allocation7 + $0x7c] ss:$12 sps:$4 sm:$0xff]  }
 0x450   :  { %2129 = vtanh.f32 %v1031_v28  ;;  %v2799_v28 = vld [vmem:[#allocation7 + $0x98] ss:$12 sps:$4 sm:$0xff]  }
 0x45d   :  { %v2130_v39 = vpop.eup %2129 }
 0x45e   :  { %v1034_v15 = vmul.f32 %v2130_v39, %v1033_v63  ;;  %v2806_v63 = vld [vmem:[#allocation7 + $0x78] ss:$12 sps:$4 sm:$0xff]  }
 0x45f   :  { %v2810_v39 = vld [vmem:[#allocation7 + $0x64] ss:$12 sps:$4 sm:$0xff]  }
 0x460   :  { %v1036_v25 = vadd.f32 %v1035_v22, %v1034_v15  ;;  %v2814_v15 = vld [vmem:[#allocation7 + $0x60] ss:$12 sps:$4 sm:$0xff]  }
 0x461   :  { %v2818_v22 = vld [vmem:[#allocation7 + $0x4c] ss:$12 sps:$4 sm:$0xff]  }
 0x462   :  { %v2732_v62 = vsel %vm1042_vm13, %v1036_v25, %v2687_v56 }
 0x463   :  { %v1044_v16 = vpack.c.bf16 %v2732_v62, %v2732_v62 }
 0x465   :  { %1078 = vmatmul.mubr.bf16.vlgmr.msra.gmra.mxu0 %v1044_v16  ;;  %1918 = vmatmul.mubr.bf16.vlgmr.msra.gmra.mxu1 %v1044_v16 }
 0x466   :  { %1157 = vmatpush1.bf16.msra.mxu0 %v2385_v26  ;;  %1922 = vmatpush3.bf16.msra.mxu1 %v2405_v35  ;;  %v2769_v26 = vld [vmem:[#allocation7 + $0xac] ss:$12 sps:$4 sm:$0xff]  }
 0x467   :  { %1158 = vmatprep.subr.bf16.mxu0 %v2388_v27  ;;  %1923 = vmatprep.subr.bf16.mxu1 %v2917_v18 }
 0x468   :  { %1188 = vmatprep.mubr.bf16.mxu0 %v2918_v5  ;;  %1937 = vmatprep.mubr.msk.bf16.mxu1 %vm2315_vm2, %v2917_v18 }
 0x46a   :  { %1159 = vmatpush1.bf16.msra.mxu0 %v2391_v29  ;;  %1924 = vmatpush3.bf16.msra.mxu1 %v2418_v40 }
 0x46b   :  { %1160 = vmatprep.subr.bf16.mxu0 %v2395_v30  ;;  %1925 = vmatprep.subr.bf16.mxu1 %v2917_v18 }
 0x46e   :  { %1161 = vmatpush1.bf16.msra.mxu0 %v2398_v32  ;;  %1926 = vmatpush3.bf16.msra.mxu1 %v2432_v44 }
 0x46f   :  { %1162 = vmatprep.subr.bf16.mxu0 %v2401_v33  ;;  %1927 = vmatprep.subr.bf16.mxu1 %v2917_v18 }
 0x472   :  { %1163 = vmatpush1.bf16.msra.mxu0 %v2403_v34  ;;  %1928 = vmatpush3.bf16.msra.mxu1 %v2444_v49 }
 0x473   :  { %1164 = vmatprep.subr.bf16.mxu0 %v2412_v37  ;;  %1929 = vmatprep.subr.bf16.mxu1 %v2917_v18 }
 0x476   :  { %1165 = vmatpush1.bf16.msra.mxu0 %v2422_v42  ;;  %1930 = vmatpush3.bf16.msra.mxu1 %v2457_v52 }
 0x477   :  { %1166 = vmatprep.subr.bf16.mxu0 %v2425_v43  ;;  %1931 = vmatprep.subr.bf16.mxu1 %v2917_v18 }
 0x47a   :  { %1167 = vmatpush1.bf16.msra.mxu0 %v2436_v46  ;;  %1932 = vmatpush3.bf16.msra.mxu1 %v2468_v55 }
 0x47b   :  { %1168 = vmatprep.subr.bf16.mxu0 %v2441_v48  ;;  %1933 = vmatprep.subr.bf16.mxu1 %v2917_v18 }
 0x47e   :  { %1169 = vmatpush1.bf16.msra.mxu0 %v2451_v50  ;;  %1934 = vmatpush3.bf16.msra.mxu1 %v2475_v57 }
 0x47f   :  { %1170 = vmatprep.subr.bf16.mxu0 %v2454_v51  ;;  %1935 = vmatprep.subr.bf16.mxu1 %v2917_v18 }
 0x482   :  { %1171 = vmatpush1.bf16.msra.mxu0 %v2463_v54  ;;  %1936 = vmatpush3.bf16.msra.mxu1 %v2483_v58 }
 0x483   :  { %1267 = vmatprep.subr.bf16.mxu0 %v2769_v26  ;;  %1941 = vmatprep.subr.bf16.mxu1 %v2917_v18 }
 0x525   :  { %v1079_v27 = vpop.f32.mrf.mxu0  ;;  %v1120_v29 = vpop.f32.mrf.mxu1 }
 0x526   :  { %v1126_v30 = vadd.f32 %v1079_v27, %v2544_v31  ;;  %v1140_v1 = vadd.f32 %v2578_v3, %v1120_v29 }
 0x527   :  { %v1081_v32 = vpop.f32.mrf.mxu0  ;;  %v1919_v33 = vpop.f32.mrf.mxu1 }
 0x528   :  { %v1687_v34 = vmul.f32 -1.442695, %v1126_v30  ;;  %v1133_v23 = vadd.f32 %v1081_v32, %v2549_v47 }
 0x529   :  { %v1083_v35 = vpop.f32.mrf.mxu0  ;;  %v1123_v37 = vpop.f32.mrf.mxu1 }
 0x52a   :  { %2131 = vpow2.f32 %v1687_v34  ;;  %v1688_v56 = vmul.f32 -1.442695, %v1133_v23  ;;  %v1263_v37 = vpop.permute.xlu1 %1262 }
 0x52b   :  { %v1084_v40 = vpop.f32.mrf.mxu0  ;;  %v1920_v42 = vpop.f32.mrf.mxu1  ;;  %vm1264_vm15 = vcmp.eq.s32.totalorder %v1263_v37, 1 }
 0x52c   :  { %2133 = vpow2.f32 %v1688_v56  ;;  %v2187_v56 = vld [vmem:[#allocation7 + $0x50] ss:$12 sps:$4 sm:$0xff]  }
 0x537   :  { %v2132_v53 = vpop.eup %2131 }
 0x538   :  { %v1130_v36 = vadd.f32 1.0, %v2132_v53  ;;  %v2188_v53 = vld [vmem:[#allocation7 + $0x34] ss:$12 sps:$4 sm:$0xff]  }
 0x539   :  { %v2134_v59 = vpop.eup %2133 }
 0x53a   :  { %2135 = vrcp.f32 %v1130_v36  ;;  %v1137_v10 = vadd.f32 1.0, %v2134_v59  ;;  %v2189_v36 = vld [vmem:[#allocation7 + $0x30] ss:$12 sps:$4 sm:$0xff]   ;;  %v2190_v59 = vld [vmem:[#allocation7 + $0x38] ss:$12 sps:$4 sm:$0xff]  }
 0x53c   :  { %2137 = vrcp.f32 %v1137_v10  ;;  %v2191_v10 = vld [vmem:[#allocation7 + $0x1c] ss:$12 sps:$4 sm:$0xff]  }
 0x547   :  { %v2136_v31 = vpop.eup %2135 }
 0x548   :  { %v1141_v7 = vmul.f32 %v2136_v31, %v1140_v1  ;;  %v2192_v1 = vld [vmem:[#allocation7 + $0x18] ss:$12 sps:$4 sm:$0xff]   ;;  %v2193_v31 = vld [vmem:[#allocation7 + $0x20] ss:$12 sps:$4 sm:$0xff]  }
 0x549   :  { %v2138_v11 = vpop.eup %2137 }
 0x54a   :  { %v1142_v8 = vadd.f32 %v1141_v7, %v2557_v61  ;;  %v1144_v17 = vsub.f32 1.0, %v2138_v11  ;;  %v1146_v47 = vmul.f32 %v2138_v11, %v2732_v62  ;;  %v2786_v61 = vld [vmem:[#allocation7 + $0xb0] ss:$12 sps:$4 sm:$0xff]   ;;  %v2196_v11 = vld [vmem:[#allocation7 + $0x8] ss:$12 sps:$4 sm:$0xff]  }
 0x54b   :  { %v2194_v7 = vld [vmem:[#allocation7 + $0x4] ss:$12 sps:$4 sm:$0xff]  }
 0x54c   :  { %2139 = vtanh.f32 %v1142_v8  ;;  %v2195_v8 = vld [vmem:[#allocation7] ss:$12 sps:$4 sm:$0xff]  }
 0x559   :  { %v2140_v9 = vpop.eup %2139 }
 0x55a   :  { %v1145_v21 = vmul.f32 %v2140_v9, %v1144_v17 }
 0x55c   :  { %v1147_v24 = vadd.f32 %v1146_v47, %v1145_v21  ;;  %v2919_v21 = vld [vmem:[#allocation17_spill] sm:$0xff] }
 0x55e   :  { %v2779_v2 = vsel %vm1153_vm14, %v1147_v24, %v2732_v62 }
 0x55f   :  { %v1155_v12 = vpack.c.bf16 %v2779_v2, %v2779_v2 }
 0x561   :  { %1189 = vmatmul.mubr.bf16.vlgmr.msra.gmra.mxu0 %v1155_v12  ;;  %1938 = vmatmul.mubr.bf16.vlgmr.msra.gmra.mxu1 %v1155_v12 }
 0x562   :  { %1268 = vmatpush1.bf16.msra.mxu0 %v2783_v38  ;;  %1942 = vmatpush3.bf16.msra.mxu1 %v2786_v61 }
 0x563   :  { %1269 = vmatprep.subr.bf16.mxu0 %v2789_v19  ;;  %1943 = vmatprep.subr.bf16.mxu1 %v2917_v18 }
 0x564   :  { %1299 = vmatprep.mubr.bf16.mxu0 %v2918_v5  ;;  %1957 = vmatprep.mubr.msk.bf16.mxu1 %vm2315_vm2, %v2917_v18 }
 0x566   :  { %1270 = vmatpush1.bf16.msra.mxu0 %v2796_v6  ;;  %1944 = vmatpush3.bf16.msra.mxu1 %v2799_v28 }
 0x567   :  { %1271 = vmatprep.subr.bf16.mxu0 %v2802_v20  ;;  %1945 = vmatprep.subr.bf16.mxu1 %v2917_v18 }
 0x56a   :  { %1272 = vmatpush1.bf16.msra.mxu0 %v2806_v63  ;;  %1946 = vmatpush3.bf16.msra.mxu1 %v2432_v44 }
 0x56b   :  { %1273 = vmatprep.subr.bf16.mxu0 %v2810_v39  ;;  %1947 = vmatprep.subr.bf16.mxu1 %v2917_v18 }
 0x56e   :  { %1274 = vmatpush1.bf16.msra.mxu0 %v2814_v15  ;;  %1948 = vmatpush3.bf16.msra.mxu1 %v2444_v49 }
 0x56f   :  { %1275 = vmatprep.subr.bf16.mxu0 %v2818_v22  ;;  %1949 = vmatprep.subr.bf16.mxu1 %v2917_v18 }
 0x572   :  { %1276 = vmatpush1.bf16.msra.mxu0 %v2822_v41  ;;  %1950 = vmatpush3.bf16.msra.mxu1 %v2457_v52 }
 0x573   :  { %1277 = vmatprep.subr.bf16.mxu0 %v2425_v43  ;;  %1951 = vmatprep.subr.bf16.mxu1 %v2917_v18 }
 0x576   :  { %1278 = vmatpush1.bf16.msra.mxu0 %v2436_v46  ;;  %1952 = vmatpush3.bf16.msra.mxu1 %v2468_v55 }
 0x577   :  { %1279 = vmatprep.subr.bf16.mxu0 %v2441_v48  ;;  %1953 = vmatprep.subr.bf16.mxu1 %v2917_v18 }
 0x57a   :  { %1280 = vmatpush1.bf16.msra.mxu0 %v2451_v50  ;;  %1954 = vmatpush3.bf16.msra.mxu1 %v2475_v57 }
 0x57b   :  { %1281 = vmatprep.subr.bf16.mxu0 %v2454_v51  ;;  %1955 = vmatprep.subr.bf16.mxu1 %v2917_v18 }
 0x57e   :  { %1282 = vmatpush1.bf16.msra.mxu0 %v2463_v54  ;;  %1956 = vmatpush3.bf16.msra.mxu1 %v2483_v58 }
 0x57f   :  { %1378 = vmatprep.subr.bf16.mxu0 %v2769_v26  ;;  %1961 = vmatprep.subr.bf16.mxu1 %v2917_v18 }
 0x621   :  { %v1190_v43 = vpop.f32.mrf.mxu0  ;;  %v1231_v44 = vpop.f32.mrf.mxu1 }
 0x622   :  { %v1237_v46 = vadd.f32 %v1190_v43, %v2554_v60  ;;  %v1251_v27 = vadd.f32 %v2578_v3, %v1231_v44 }
 0x623   :  { %v1192_v48 = vpop.f32.mrf.mxu0  ;;  %v1939_v49 = vpop.f32.mrf.mxu1 }
 0x624   :  { %v1689_v50 = vmul.f32 -1.442695, %v1237_v46  ;;  %v1244_v54 = vadd.f32 %v1192_v48, %v2559_v4  ;;  %v2921_v46 = vld [vmem:[#allocation15_spill] sm:$0xff] }
 0x625   :  { %v1194_v52 = vpop.f32.mrf.mxu0  ;;  %v1234_v55 = vpop.f32.mrf.mxu1 }
 0x626   :  { %2141 = vpow2.f32 %v1689_v50  ;;  %v1690_v25 = vmul.f32 -1.442695, %v1244_v54  ;;  %v1374_v55 = vpop.permute.xlu0 %1373 }
 0x627   :  { %v1195_v51 = vpop.f32.mrf.mxu0  ;;  %v1940_v57 = vpop.f32.mrf.mxu1  ;;  %vm1375_vm0 = vcmp.eq.s32.totalorder %v1374_v55, 1 }
 0x628   :  { %2143 = vpow2.f32 %v1690_v25 }
 0x633   :  { %v2142_v58 = vpop.eup %2141 }
 0x634   :  { %v1241_v62 = vadd.f32 1.0, %v2142_v58 }
 0x635   :  { %v2144_v16 = vpop.eup %2143 }
 0x636   :  { %2145 = vrcp.f32 %v1241_v62  ;;  %v1248_v26 = vadd.f32 1.0, %v2144_v16  ;;  %v2083_v62 = vld [vmem:[#allocation8 + $0x38] sm:$0xff]   ;;  %v2084_v16 = vld [vmem:[#allocation8 + $0x30] sm:$0xff]  }
 0x638   :  { %2147 = vrcp.f32 %v1248_v26  ;;  %v2085_v26 = vld [vmem:[#allocation8 + $0x28] sm:$0xff]  }
 0x643   :  { %v2146_v60 = vpop.eup %2145 }
 0x644   :  { %v1252_v29 = vmul.f32 %v2146_v60, %v1251_v27  ;;  %v2086_v27 = vld [vmem:[#allocation8 + $0x20] sm:$0xff]   ;;  %v2087_v60 = vld [vmem:[#allocation8 + $0x18] sm:$0xff]  }
 0x645   :  { %v2148_v32 = vpop.eup %2147 }
 0x646   :  { %v1253_v30 = vadd.f32 %v1252_v29, %v2567_v14  ;;  %v1255_v33 = vsub.f32 1.0, %v2148_v32  ;;  %v1257_v4 = vmul.f32 %v2148_v32, %v2779_v2  ;;  %v2185_v14 = vld [vmem:[#allocation7 + $0x80] ss:$12 sps:$4 sm:$0xff]   ;;  %v2088_v29 = vld [vmem:[#allocation8 + $0x10] sm:$0xff]  }
 0x647   :  { %v2090_v32 = vld [vmem:[#allocation8] sm:$0xff]  }
 0x648   :  { %2149 = vtanh.f32 %v1253_v30  ;;  %v2089_v30 = vld [vmem:[#allocation8 + $0x8] sm:$0xff]  }
 0x655   :  { %v2150_v34 = vpop.eup %2149 }
 0x656   :  { %v1256_v35 = vmul.f32 %v2150_v34, %v1255_v33 }
 0x658   :  { %v1258_v40 = vadd.f32 %v1257_v4, %v1256_v35  ;;  %v2922_v35 = vld [vmem:[#allocation19_spill] sm:$0xff] }
 0x65a   :  { %v2846_v42 = vsel %vm1264_vm15, %v1258_v40, %v2779_v2 }
 0x65b   :  { %v1266_v23 = vpack.c.bf16 %v2846_v42, %v2846_v42 }
 0x65d   :  { %1300 = vmatmul.mubr.bf16.vlgmr.msra.gmra.mxu0 %v1266_v23  ;;  %1958 = vmatmul.mubr.bf16.vlgmr.msra.gmra.mxu1 %v1266_v23 }
 0x65e   :  { %1379 = vmatpush1.bf16.msra.mxu0 %v2783_v38  ;;  %1962 = vmatpush3.bf16.msra.mxu1 %v2786_v61 }
 0x65f   :  { %1380 = vmatprep.subr.bf16.mxu0 %v2789_v19  ;;  %1963 = vmatprep.subr.bf16.mxu1 %v2917_v18 }
 0x660   :  { %1410 = vmatprep.mubr.bf16.mxu0 %v2918_v5  ;;  %1977 = vmatprep.mubr.msk.bf16.mxu1 %vm2315_vm2, %v2917_v18  ;;  %v2186_v5 = vld [vmem:[#allocation7 + $0x68] ss:$12 sps:$4 sm:$0xff]  }
 0x662   :  { %1381 = vmatpush1.bf16.msra.mxu0 %v2796_v6  ;;  %1964 = vmatpush3.bf16.msra.mxu1 %v2799_v28  ;;  %v2920_v6 = vld [vmem:[#allocation18_spill] sm:$0xff] }
 0x663   :  { %1382 = vmatprep.subr.bf16.mxu0 %v2802_v20  ;;  %1965 = vmatprep.subr.bf16.mxu1 %v2917_v18 }
 0x666   :  { %1383 = vmatpush1.bf16.msra.mxu0 %v2806_v63  ;;  %1966 = vmatpush3.bf16.msra.mxu1 %v2185_v14 }
 0x667   :  { %1384 = vmatprep.subr.bf16.mxu0 %v2810_v39  ;;  %1967 = vmatprep.subr.bf16.mxu1 %v2917_v18 }
 0x66a   :  { %1385 = vmatpush1.bf16.msra.mxu0 %v2814_v15  ;;  %1968 = vmatpush3.bf16.msra.mxu1 %v2186_v5 }
 0x66b   :  { %1386 = vmatprep.subr.bf16.mxu0 %v2818_v22  ;;  %1969 = vmatprep.subr.bf16.mxu1 %v2917_v18 }
 0x66e   :  { %1387 = vmatpush1.bf16.msra.mxu0 %v2822_v41  ;;  %1970 = vmatpush3.bf16.msra.mxu1 %v2187_v56 }
 0x66f   :  { %1388 = vmatprep.subr.bf16.mxu0 %v2188_v53  ;;  %1971 = vmatprep.subr.bf16.mxu1 %v2917_v18 }
 0x672   :  { %1389 = vmatpush1.bf16.msra.mxu0 %v2189_v36  ;;  %1972 = vmatpush3.bf16.msra.mxu1 %v2190_v59 }
 0x673   :  { %1390 = vmatprep.subr.bf16.mxu0 %v2191_v10  ;;  %1973 = vmatprep.subr.bf16.mxu1 %v2917_v18 }
 0x676   :  { %1391 = vmatpush1.bf16.msra.mxu0 %v2192_v1  ;;  %1974 = vmatpush3.bf16.msra.mxu1 %v2193_v31 }
 0x677   :  { %1392 = vmatprep.subr.bf16.mxu0 %v2194_v7  ;;  %1975 = vmatprep.subr.bf16.mxu1 %v2917_v18 }
 0x67a   :  { %1393 = vmatpush1.bf16.msra.mxu0 %v2195_v8  ;;  %1976 = vmatpush3.bf16.msra.mxu1 %v2196_v11  ;;  %v2923_v11 = vld [vmem:[#allocation16_spill] sm:$0xff] }
 0x67b   :  { %1981 = vmatprep.subr.bf16.mxu0 %v2917_v18 }
 0x71d   :  { %v1301_v17 = vpop.f32.mrf.mxu0  ;;  %v1342_v9 = vpop.f32.mrf.mxu1 }
 0x71e   :  { %v1348_v47 = vadd.f32 %v1301_v17, %v2919_v21  ;;  %v1362_v41 = vadd.f32 %v2578_v3, %v1342_v9 }
 0x71f   :  { %v1303_v0 = vpop.f32.mrf.mxu0  ;;  %v1959_v24 = vpop.f32.mrf.mxu1 }
 0x720   :  { %v1691_v2 = vmul.f32 -1.442695, %v1348_v47  ;;  %v1355_v28 = vadd.f32 %v1303_v0, %v2920_v6  ;;  %v1485_v0 = vpop.permute.xlu1 %1484 }
 0x721   :  { %v1305_v12 = vpop.f32.mrf.mxu0  ;;  %v1345_v38 = vpop.f32.mrf.mxu1  ;;  %vm1486_vm1 = vcmp.eq.s32.totalorder %v1485_v0, 1 }
 0x722   :  { %2151 = vpow2.f32 %v1691_v2  ;;  %v1692_v20 = vmul.f32 -1.442695, %v1355_v28 }
 0x723   :  { %v1306_v61 = vpop.f32.mrf.mxu0  ;;  %v1960_v19 = vpop.f32.mrf.mxu1 }
 0x724   :  { %2153 = vpow2.f32 %v1692_v20 }
 0x72f   :  { %v2152_v63 = vpop.eup %2151 }
 0x730   :  { %v1352_v39 = vadd.f32 1.0, %v2152_v63 }
 0x731   :  { %v2154_v15 = vpop.eup %2153 }
 0x732   :  { %2155 = vrcp.f32 %v1352_v39  ;;  %v1359_v22 = vadd.f32 1.0, %v2154_v15 }
 0x734   :  { %2157 = vrcp.f32 %v1359_v22 }
 0x73f   :  { %v2156_v43 = vpop.eup %2155 }
 0x740   :  { %v1363_v44 = vmul.f32 %v2156_v43, %v1362_v41 }
 0x741   :  { %v2158_v49 = vpop.eup %2157 }
 0x742   :  { %v1364_v48 = vadd.f32 %v1363_v44, %v2921_v46  ;;  %v1366_v50 = vsub.f32 1.0, %v2158_v49  ;;  %v1368_v57 = vmul.f32 %v2158_v49, %v2846_v42 }
 0x744   :  { %2159 = vtanh.f32 %v1364_v48 }
 0x751   :  { %v2160_v52 = vpop.eup %2159 }
 0x752   :  { %v1367_v51 = vmul.f32 %v2160_v52, %v1366_v50 }
 0x754   :  { %v1369_v54 = vadd.f32 %v1368_v57, %v1367_v51 }
 0x756   :  { %v1376_v25 = vsel %vm1375_vm0, %v1369_v54, %v2846_v42 }
 0x757   :  { %v1377_v58 = vpack.c.bf16 %v1376_v25, %v1376_v25 }
 0x759   :  { %1411 = vmatmul.mubr.bf16.vlgmr.msra.gmra.mxu0 %v1377_v58  ;;  %1978 = vmatmul.mubr.bf16.vlgmr.msra.gmra.mxu1 %v1377_v58 }
 0x75a   :  { %1997 = vmatprep.mubr.msk.bf16.mxu0 %vm2315_vm2, %v2917_v18  ;;  %1982 = vmatpush3.bf16.msra.mxu0 %v2083_v62 }
 0x75b   :  { %1983 = vmatprep.subr.bf16.mxu0 %v2917_v18 }
 0x75e   :  { %1984 = vmatpush3.bf16.msra.mxu0 %v2084_v16 }
 0x75f   :  { %1985 = vmatprep.subr.bf16.mxu0 %v2917_v18 }
 0x762   :  { %1986 = vmatpush3.bf16.msra.mxu0 %v2085_v26 }
 0x763   :  { %1987 = vmatprep.subr.bf16.mxu0 %v2917_v18 }
 0x766   :  { %1988 = vmatpush3.bf16.msra.mxu0 %v2086_v27 }
 0x767   :  { %1989 = vmatprep.subr.bf16.mxu0 %v2917_v18 }
 0x76a   :  { %1990 = vmatpush3.bf16.msra.mxu0 %v2087_v60 }
 0x76b   :  { %1991 = vmatprep.subr.bf16.mxu0 %v2917_v18 }
 0x76e   :  { %1992 = vmatpush3.bf16.msra.mxu0 %v2088_v29 }
 0x76f   :  { %1993 = vmatprep.subr.bf16.mxu0 %v2917_v18 }
 0x772   :  { %1994 = vmatpush3.bf16.msra.mxu0 %v2089_v30 }
 0x773   :  { %1995 = vmatprep.subr.bf16.mxu0 %v2917_v18 }
 0x776   :  { %1996 = vmatpush3.bf16.msra.mxu0 %v2090_v32 }
 0x819   :  { %v1412_v33 = vpop.f32.mrf.mxu0  ;;  %v1453_v34 = vpop.f32.mrf.mxu1 }
 0x81a   :  { %v1459_v4 = vadd.f32 %v1412_v33, %v2922_v35  ;;  %v1473_v31 = vadd.f32 %v2578_v3, %v1453_v34  ;;  %v1695_v3 = vld [vmem:[%s2906_s7] ss:$0 sm:$0xff] }
 0x81b   :  { %v1414_v37 = vpop.f32.mrf.mxu0  ;;  %v1979_v40 = vpop.f32.mrf.mxu1 }
 0x81c   :  { %v1693_v42 = vmul.f32 -1.442695, %v1459_v4  ;;  %v1466_v53 = vadd.f32 %v1414_v37, %v2573_v45 }
 0x81d   :  { %v1416_v23 = vpop.f32.mrf.mxu0  ;;  %v1456_v14 = vpop.f32.mrf.mxu1 }
 0x81e   :  { %2161 = vpow2.f32 %v1693_v42  ;;  %v1694_v36 = vmul.f32 -1.442695, %v1466_v53 }
 0x81f   :  { %v1417_v5 = vpop.f32.mrf.mxu0  ;;  %v1980_v56 = vpop.f32.mrf.mxu1 }
 0x820   :  { %2163 = vpow2.f32 %v1694_v36 }
 0x82b   :  { %v2162_v59 = vpop.eup %2161 }
 0x82c   :  { %v1463_v10 = vadd.f32 1.0, %v2162_v59 }
 0x82d   :  { %v2164_v18 = vpop.eup %2163 }
 0x82e   :  { %2165 = vrcp.f32 %v1463_v10  ;;  %v1470_v1 = vadd.f32 1.0, %v2164_v18 }
 0x830   :  { %2167 = vrcp.f32 %v1470_v1 }
 0x83b   :  { %v2166_v7 = vpop.eup %2165 }
 0x83c   :  { %v1474_v8 = vmul.f32 %v2166_v7, %v1473_v31 }
 0x83d   :  { %v2168_v9 = vpop.eup %2167 }
 0x83e   :  { %v1475_v17 = vadd.f32 %v1474_v8, %v2923_v11  ;;  %v1477_v21 = vsub.f32 1.0, %v2168_v9  ;;  %v1479_v24 = vmul.f32 %v2168_v9, %v1376_v25 }
 0x840   :  { %2169 = vtanh.f32 %v1475_v17 }
 0x84d   :  { %v2170_v47 = vpop.eup %2169 }
 0x84e   :  { %v1478_v45 = vmul.f32 %v2170_v47, %v1477_v21 }
 0x850   :  { %v1480_v2 = vadd.f32 %v1479_v24, %v1478_v45 }
 0x852   :  { %v1487_v12 = vsel %vm1486_vm1, %v1480_v2, %v1376_v25 }
 0x853   :  { %v1488_v38 = vpack.c.bf16 %v1487_v12, %v1487_v12 }
 0x855   :  { %1998 = vmatmul.mubr.bf16.vlgmr.msra.gmra.mxu0 %v1488_v38 }
 0x915   :  { %v1594_v61 = vpop.f32.mrf.mxu0 }
 0x916   :  { %v1595_v19 = vadd.f32 %v1695_v3, %v1594_v61 }
 0x917   :  { %v1999_v6 = vpop.f32.mrf.mxu0 }
 0x918   :  { %2171 = vtanh.f32 %v1595_v19 }
 0x919   :  { %v1597_v28 = vpop.f32.mrf.mxu0 }
 0x91b   :  { %v2000_v20 = vpop.f32.mrf.mxu0 }
 0x925   :  { %v2172_v63 = vpop.eup %2171 }
 0x926   :  { %v1601_v39 = vsel %vm709_vm5, %v2172_v63, 0.0 }
 0x927   :  { %1602 = vst [vmem:[#allocation10] sm:$0xff] %v1601_v39 }
 0x928   :  { %2288 = shalt.err (!%p2285_p10)
}
 0x929   :  { %1612 = dma.vmem_to_hbm [thread:$0]  %s1610_s9, 128, %s2907_s8, [#allocation4]  }
 0x92a   :  { %2303 = dma.done.wait [#allocation4], 128  }
 0x92b   :  { %2304 = vsyncadd [#allocation4], 4294967168 }
 0x92c   :  { %1616 = vsyncpa [#allocation3], 1 }
 0x92d   :  { %1617 = vsyncpa [#allocation6], 1 }
 0x92e   :  { %1618 = vsyncpa [#allocation9], 1 }
 0x92f   :  { %1619 = vsyncpa [#allocation4], 1 }

</bundles_post_ra>
